<compile_context>
chip_gen: v7x
topology: tpu7x:2x2x1
jax: 0.10.0
libtpu: 0.0.40
codegen_flags: <defaults>
</compile_context>

<pallas_src>
import jax
import jax.numpy as jnp
from jax.experimental import pallas as pl
from jax.experimental.pallas import tpu as pltpu


HIDDEN = 256
MAX_B_BLK = 8      # bounds the static unroll of the per-b normalization tail


def _mlp_kernel(x_ref, w1_ref, b1_ref, w2_ref, b2_ref, o_ref):
    # x_ref : (1, C, b_blk*N)    sampled features for the batch block, wide layout
    # w1_ref: (HIDDEN, C)        first linear, PyTorch (out, in) layout
    # b1_ref: (HIDDEN, 1)
    # w2_ref: (HIDDEN, HIDDEN)
    # b2_ref: (HIDDEN, 1)
    # o_ref : (b_blk, HIDDEN, N)
    b_blk, _, n = o_ref.shape
    c_in = w1_ref.shape[1]

    x_all = x_ref[0].astype(jnp.float32)            # (C, b_blk*N)
    w1 = w1_ref[...]
    b1 = b1_ref[...]

    if c_in <= 8:
        # fc_l0 path (C=3): K is tiny, so the MXU would do ~1% useful work.
        # C broadcast FMAs on the VPU over the full wide tile instead.
        h1 = w1[:, 0:1] * x_all[0:1, :]
        for c in range(1, c_in):
            h1 = h1 + w1[:, c:c + 1] * x_all[c:c + 1, :]
        h1 = h1 + b1
    else:
        # Single wide MXU matmul for the whole batch block.
        h1 = jnp.dot(w1, x_all, preferred_element_type=jnp.float32) + b1

    h1 = jnp.maximum(h1, 0.0)                       # ReLU

    # One wide 256 x 256 x (b_blk*N) MXU matmul: amortizes pipeline fill/drain
    # and the W2 weight pushes across the batch block.
    h2_all = jnp.dot(w2_ref[...], h1, preferred_element_type=jnp.float32) + b2_ref[...]

    # Cheap per-b tail (b_blk <= MAX_B_BLK, static slices at multiples of N):
    # L2 normalization over the sample axis, then a lane-dense store.
    for b in range(b_blk):
        h2 = h2_all[:, b * n:(b + 1) * n]                        # (HIDDEN, N)
        sumsq = jnp.sum(h2 * h2, axis=1, keepdims=True)          # (HIDDEN, 1)
        inv = pl.reciprocal(jnp.sqrt(sumsq) + 1e-7, approx=False)
        o_ref[b] = (h2 * inv).astype(o_ref.dtype)


def init_params(key):
    """Deterministic parameter init (PyTorch Linear-style uniform bounds).

    Weights stay in the native PyTorch (out_features, in_features) layout;
    biases are (out_features, 1) so the kernel adds them in the transposed
    (HIDDEN, N) layout without reshapes.
    """
    names_dims = [
        ("fc_l16", 256), ("fc_l12", 256), ("fc_l8", 256),
        ("fc_l4", 128), ("fc_l0", 3), ("fc2", 256),
    ]
    params = {}
    keys = jax.random.split(key, 2 * len(names_dims))
    for i, (name, fan_in) in enumerate(names_dims):
        kw, kb = keys[2 * i], keys[2 * i + 1]
        bound = 1.0 / (fan_in ** 0.5)
        w = jax.random.uniform(kw, (HIDDEN, fan_in), jnp.float32, -bound, bound)
        b = jax.random.uniform(kb, (HIDDEN, 1), jnp.float32, -bound, bound)
        params[name] = (w, b)
    return params


def _chip_info():
    """Per-generation knobs: (tensorcores/chip, IO budget for b_blk, VMEM limit cap)."""
    kind = ""
    try:
        kind = jax.devices()[0].device_kind.lower()
    except Exception:
        pass
    if "v6" in kind:
        return 1, 40 << 20, 96 << 20       # v6e: 128 MiB physical VMEM, 1 TC
    if "v5" in kind and ("lite" in kind or "5e" in kind):
        return 1, 24 << 20, 64 << 20       # v5e: 128 MiB physical, 16 MiB default scoped
    if "7" in kind:
        return 2, 20 << 20, 48 << 20       # v7x: 64 MiB physical per TC, 2 TCs
    return 1, 16 << 20, 48 << 20           # unknown / older: conservative


def _pick_b_blk(B, C, N, io_budget, num_cores):
    """Batch elements per grid step, sized against the per-generation VMEM budget."""
    per_b = 2 * 4 * N * (C + HIDDEN)       # double-buffered f32 x + out per batch elem
    b_blk = max(1, io_budget // max(per_b, 1))
    if num_cores >= 2 and B >= num_cores:
        # Keep >= num_cores grid steps so the "parallel" batch axis shards
        # across both v7x TensorCores. Single-TC chips use the full budget.
        b_blk = min(b_blk, max(1, B // num_cores))
    b_blk = max(1, min(b_blk, B, MAX_B_BLK))
    while B % b_blk:                       # keep blocks exact (no partial batch block)
        b_blk -= 1
    return int(b_blk)


def _vmem_limit_bytes(b_blk, C, N, cap):
    """Real VMEM need: weight + IO double-buffers, live intermediates, headroom."""
    f32 = 4
    weights = 2 * f32 * (HIDDEN * C + HIDDEN + HIDDEN * HIDDEN + HIDDEN)
    io = 2 * f32 * b_blk * N * (C + HIDDEN)            # x + out, double-buffered
    live = 3 * f32 * HIDDEN * b_blk * N                # h1 / h2 / tail temporaries
    total = weights + io + live + (4 << 20)            # spill headroom
    return int(min(max(total, 32 << 20), cap))


def mlp_forward(map_nchw, params, sample_list=None, patch_num=256, enc_layer=0,
                b_blk=None):
    B, C, H, W = map_nchw.shape
    N = min(H * W, patch_num)
    if sample_list is None:
        # deterministic stand-in for random.sample(range(H*W), N)
        sample_list = jax.random.permutation(jax.random.PRNGKey(1), H * W)[:N]

    layer_name = {16: "fc_l16", 12: "fc_l12", 8: "fc_l8", 4: "fc_l4"}.get(
        enc_layer, "fc_l0")
    w1, b1 = params[layer_name]            # (HIDDEN, C), (HIDDEN, 1)
    w2, b2 = params["fc2"]                 # (HIDDEN, HIDDEN), (HIDDEN, 1)
    assert w1.shape[1] == C, f"enc_layer={enc_layer} expects C={w1.shape[1]}, got {C}"

    num_cores, io_budget, vmem_cap = _chip_info()
    if b_blk is None:
        b_blk = _pick_b_blk(B, C, N, io_budget, num_cores)
    nb = B // b_blk

    # Gather the sampled spatial positions straight from the NCHW map (no full
    # permuted map in HBM), then regroup the batch block into the lane axis so
    # each grid step feeds one wide (C, b_blk*N) RHS to the MXU. This is layout
    # plumbing that XLA fuses with the gather.
    x_t = map_nchw.reshape(B, C, H * W)[:, :, sample_list]          # (B, C, N)
    x_wide = (x_t.reshape(nb, b_blk, C, N)
                 .transpose(0, 2, 1, 3)
                 .reshape(nb, C, b_blk * N))                        # (nb, C, b_blk*N)

    out = pl.pallas_call(
        _mlp_kernel,
        out_shape=jax.ShapeDtypeStruct((B, HIDDEN, N), jnp.float32),
        grid=(nb,),
        in_specs=[
            pl.BlockSpec((1, C, b_blk * N), lambda i: (i, 0, 0)),   # x, wide layout
            pl.BlockSpec((HIDDEN, C), lambda i: (0, 0)),            # w1
            pl.BlockSpec((HIDDEN, 1), lambda i: (0, 0)),            # b1
            pl.BlockSpec((HIDDEN, HIDDEN), lambda i: (0, 0)),       # w2
            pl.BlockSpec((HIDDEN, 1), lambda i: (0, 0)),            # b2
        ],
        out_specs=pl.BlockSpec((b_blk, HIDDEN, N), lambda i: (i, 0, 0)),
        compiler_params=pltpu.CompilerParams(
            dimension_semantics=("parallel",),
            vmem_limit_bytes=_vmem_limit_bytes(b_blk, C, N, vmem_cap)),
    )(x_wide, w1, b1, w2, b2)
    return out, sample_list


def _reference(map_nchw, params, sample_list, patch_num=256, enc_layer=0):
    """Pure-JAX reference mirroring the PyTorch forward, for sanity checking."""
    B, C, H, W = map_nchw.shape
    feat = jnp.transpose(map_nchw, (0, 2, 3, 1)).reshape(B, H * W, C)
    N = min(H * W, patch_num)
    x = feat[:, sample_list, :]                                   # (B, N, C)
    name = {16: "fc_l16", 12: "fc_l12", 8: "fc_l8", 4: "fc_l4"}.get(enc_layer, "fc_l0")
    w1, b1 = params[name]
    w2, b2 = params["fc2"]
    out = jax.nn.relu(x @ w1.T + b1[:, 0])
    out = out @ w2.T + b2[:, 0]
    norm = jnp.sqrt(jnp.sum(out ** 2, axis=1, keepdims=True))
    out = out / (norm + 1e-7)
    return jnp.transpose(out, (0, 2, 1))                          # (B, 256, N)


if __name__ == "__main__":
    params = init_params(jax.random.PRNGKey(0))
    B, H, W = 2, 16, 16
    patch_num = 256                        # N = min(H*W, patch_num) = 256

    # enc_layer=0 branch -> fc_l0: Linear(3, 256)  (VPU small-C path)
    x0 = jax.random.normal(jax.random.PRNGKey(42), (B, 3, H, W), jnp.float32)
    out0, sl0 = mlp_forward(x0, params, patch_num=patch_num, enc_layer=0)
    out0 = jax.block_until_ready(out0)
    ref0 = _reference(x0, params, sl0, patch_num=patch_num, enc_layer=0)
    assert out0.shape == (B, HIDDEN, min(H * W, patch_num)), out0.shape
    assert jnp.allclose(out0, ref0, atol=1e-5, rtol=1e-5), "mismatch (enc_layer=0)"

    # enc_layer=16 branch -> fc_l16: Linear(256, 256)  (MXU path)
    x16 = jax.random.normal(jax.random.PRNGKey(7), (B, 256, H, W), jnp.float32)
    out16, sl16 = mlp_forward(x16, params, patch_num=patch_num, enc_layer=16)
    out16 = jax.block_until_ready(out16)
    ref16 = _reference(x16, params, sl16, patch_num=patch_num, enc_layer=16)
    assert out16.shape == (B, HIDDEN, min(H * W, patch_num)), out16.shape
    assert jnp.allclose(out16, ref16, atol=1e-5, rtol=1e-5), "mismatch (enc_layer=16)"

    print("KERNEL_OK")
</pallas_src>

<mosaic_0001>
module attributes {stable_mosaic.version = 11 : i64} {
  func.func @_mlp_kernel(%arg0: i32, %arg1: memref<1x3x512xf32, #tpu.memory_space<vmem>>, %arg2: memref<256x3xf32, #tpu.memory_space<vmem>>, %arg3: memref<256x1xf32, #tpu.memory_space<vmem>>, %arg4: memref<256x256xf32, #tpu.memory_space<vmem>>, %arg5: memref<256x1xf32, #tpu.memory_space<vmem>>, %arg6: memref<2x256x256xf32, #tpu.memory_space<vmem>>) attributes {dimension_semantics = [#tpu.dimension_semantics<parallel>], iteration_bounds = array<i64: 1>, scalar_prefetch = 0 : i64, scratch_operands = 0 : i64, tpu.core_type = #tpu.core_type<tc>, window_params = [{transform_indices = @transform_0, window_bounds = array<i64: 1, 3, 512>}, {pipeline_mode = #tpu.pipeline_mode<synchronous>, transform_indices = @transform_1, window_bounds = array<i64: 256, 3>}, {pipeline_mode = #tpu.pipeline_mode<synchronous>, transform_indices = @transform_2, window_bounds = array<i64: 256, 1>}, {pipeline_mode = #tpu.pipeline_mode<synchronous>, transform_indices = @transform_3, window_bounds = array<i64: 256, 256>}, {pipeline_mode = #tpu.pipeline_mode<synchronous>, transform_indices = @transform_4, window_bounds = array<i64: 256, 1>}, {transform_indices = @transform_5, window_bounds = array<i64: 2, 256, 256>}]} {
    %c0 = arith.constant 0 : index
    %c0_0 = arith.constant 0 : index
    %c0_1 = arith.constant 0 : index
    %0 = vector.load %arg1[%c0, %c0_0, %c0_1] : memref<1x3x512xf32, #tpu.memory_space<vmem>>, vector<1x3x512xf32>
    %1 = vector.shape_cast %0 : vector<1x3x512xf32> to vector<3x512xf32>
    %c0_2 = arith.constant 0 : index
    %c0_3 = arith.constant 0 : index
    %2 = vector.load %arg2[%c0_2, %c0_3] : memref<256x3xf32, #tpu.memory_space<vmem>>, vector<256x3xf32>
    %c0_4 = arith.constant 0 : index
    %c0_5 = arith.constant 0 : index
    %3 = vector.load %arg3[%c0_4, %c0_5] : memref<256x1xf32, #tpu.memory_space<vmem>>, vector<256x1xf32>
    %4 = vector.extract_strided_slice %2 {offsets = [0, 0], sizes = [256, 1], strides = [1, 1]} : vector<256x3xf32> to vector<256x1xf32>
    %5 = vector.extract_strided_slice %1 {offsets = [0, 0], sizes = [1, 512], strides = [1, 1]} : vector<3x512xf32> to vector<1x512xf32>
    %6 = vector.broadcast %4 : vector<256x1xf32> to vector<256x512xf32>
    %7 = vector.broadcast %5 : vector<1x512xf32> to vector<256x512xf32>
    %8 = arith.mulf %6, %7 : vector<256x512xf32>
    %9 = vector.extract_strided_slice %2 {offsets = [0, 1], sizes = [256, 1], strides = [1, 1]} : vector<256x3xf32> to vector<256x1xf32>
    %10 = vector.extract_strided_slice %1 {offsets = [1, 0], sizes = [1, 512], strides = [1, 1]} : vector<3x512xf32> to vector<1x512xf32>
    %11 = vector.broadcast %9 : vector<256x1xf32> to vector<256x512xf32>
    %12 = vector.broadcast %10 : vector<1x512xf32> to vector<256x512xf32>
    %13 = arith.mulf %11, %12 : vector<256x512xf32>
    %14 = arith.addf %8, %13 : vector<256x512xf32>
    %15 = vector.extract_strided_slice %2 {offsets = [0, 2], sizes = [256, 1], strides = [1, 1]} : vector<256x3xf32> to vector<256x1xf32>
    %16 = vector.extract_strided_slice %1 {offsets = [2, 0], sizes = [1, 512], strides = [1, 1]} : vector<3x512xf32> to vector<1x512xf32>
    %17 = vector.broadcast %15 : vector<256x1xf32> to vector<256x512xf32>
    %18 = vector.broadcast %16 : vector<1x512xf32> to vector<256x512xf32>
    %19 = arith.mulf %17, %18 : vector<256x512xf32>
    %20 = arith.addf %14, %19 : vector<256x512xf32>
    %21 = vector.broadcast %3 : vector<256x1xf32> to vector<256x512xf32>
    %22 = arith.addf %20, %21 : vector<256x512xf32>
    %cst = arith.constant 0.000000e+00 : f32
    %23 = vector.broadcast %cst : f32 to vector<256x512xf32>
    %24 = arith.maximumf %22, %23 : vector<256x512xf32>
    %c0_6 = arith.constant 0 : index
    %c0_7 = arith.constant 0 : index
    %25 = vector.load %arg4[%c0_6, %c0_7] : memref<256x256xf32, #tpu.memory_space<vmem>>, vector<256x256xf32>
    %cst_8 = arith.constant dense<0.000000e+00> : vector<256x512xf32>
    %26 = tpu.matmul %25, %24, %cst_8 {dimension_numbers = #tpu.dot_dimension_numbers<[1], [0], [0], [1], [0, 0, 1, 1], [], []>} : vector<256x256xf32>, vector<256x512xf32>, vector<256x512xf32> -> vector<256x512xf32>
    %c0_9 = arith.constant 0 : index
    %c0_10 = arith.constant 0 : index
    %27 = vector.load %arg5[%c0_9, %c0_10] : memref<256x1xf32, #tpu.memory_space<vmem>>, vector<256x1xf32>
    %28 = vector.broadcast %27 : vector<256x1xf32> to vector<256x512xf32>
    %29 = arith.addf %26, %28 : vector<256x512xf32>
    %30 = vector.extract_strided_slice %29 {offsets = [0, 0], sizes = [256, 256], strides = [1, 1]} : vector<256x512xf32> to vector<256x256xf32>
    %31 = arith.mulf %30, %30 : vector<256x256xf32>
    %cst_11 = arith.constant dense<0.000000e+00> : vector<256xf32>
    %32 = vector.multi_reduction <add>, %31, %cst_11 [1] : vector<256x256xf32> to vector<256xf32>
    %33 = vector.shape_cast %32 : vector<256xf32> to vector<256x1xf32>
    %34 = math.sqrt %33 : vector<256x1xf32>
    %cst_12 = arith.constant 1.000000e-07 : f32
    %35 = vector.broadcast %cst_12 : f32 to vector<256x1xf32>
    %36 = arith.addf %34, %35 : vector<256x1xf32>
    %37 = tpu.reciprocal %36 : vector<256x1xf32> -> vector<256x1xf32>
    %38 = vector.broadcast %37 : vector<256x1xf32> to vector<256x256xf32>
    %39 = arith.mulf %30, %38 : vector<256x256xf32>
    %c0_13 = arith.constant 0 : index
    %c0_14 = arith.constant 0 : index
    %c0_15 = arith.constant 0 : index
    %40 = vector.load %arg6[%c0_13, %c0_14, %c0_15] : memref<2x256x256xf32, #tpu.memory_space<vmem>>, vector<1x256x256xf32>
    %41 = vector.shape_cast %40 : vector<1x256x256xf32> to vector<256x256xf32>
    %42 = vector.shape_cast %39 : vector<256x256xf32> to vector<1x256x256xf32>
    tpu.vector_store %arg6[%c0_13, %c0_14, %c0_15], %42 {strides = array<i32>} : memref<2x256x256xf32, #tpu.memory_space<vmem>>, vector<1x256x256xf32>,
    %43 = vector.extract_strided_slice %29 {offsets = [0, 256], sizes = [256, 256], strides = [1, 1]} : vector<256x512xf32> to vector<256x256xf32>
    %44 = arith.mulf %43, %43 : vector<256x256xf32>
    %cst_16 = arith.constant dense<0.000000e+00> : vector<256xf32>
    %45 = vector.multi_reduction <add>, %44, %cst_16 [1] : vector<256x256xf32> to vector<256xf32>
    %46 = vector.shape_cast %45 : vector<256xf32> to vector<256x1xf32>
    %47 = math.sqrt %46 : vector<256x1xf32>
    %cst_17 = arith.constant 1.000000e-07 : f32
    %48 = vector.broadcast %cst_17 : f32 to vector<256x1xf32>
    %49 = arith.addf %47, %48 : vector<256x1xf32>
    %50 = tpu.reciprocal %49 : vector<256x1xf32> -> vector<256x1xf32>
    %51 = vector.broadcast %50 : vector<256x1xf32> to vector<256x256xf32>
    %52 = arith.mulf %43, %51 : vector<256x256xf32>
    %c1 = arith.constant 1 : index
    %c0_18 = arith.constant 0 : index
    %c0_19 = arith.constant 0 : index
    %53 = vector.load %arg6[%c1, %c0_18, %c0_19] : memref<2x256x256xf32, #tpu.memory_space<vmem>>, vector<1x256x256xf32>
    %54 = vector.shape_cast %53 : vector<1x256x256xf32> to vector<256x256xf32>
    %55 = vector.shape_cast %52 : vector<256x256xf32> to vector<1x256x256xf32>
    tpu.vector_store %arg6[%c1, %c0_18, %c0_19], %55 {strides = array<i32>} : memref<2x256x256xf32, #tpu.memory_space<vmem>>, vector<1x256x256xf32>,
    return
  }
  func.func @transform_0(%arg0: i32) -> (i32, i32, i32) {
    %c0_i32 = arith.constant 0 : i32
    %c0_i32_0 = arith.constant 0 : i32
    %c0_i32_1 = arith.constant 0 : i32
    return %arg0, %c0_i32, %c0_i32_0 : i32, i32, i32
  }
  func.func @transform_1(%arg0: i32) -> (i32, i32) {
    %c0_i32 = arith.constant 0 : i32
    %c0_i32_0 = arith.constant 0 : i32
    %c0_i32_1 = arith.constant 0 : i32
    return %c0_i32, %c0_i32_0 : i32, i32
  }
  func.func @transform_2(%arg0: i32) -> (i32, i32) {
    %c0_i32 = arith.constant 0 : i32
    %c0_i32_0 = arith.constant 0 : i32
    %c0_i32_1 = arith.constant 0 : i32
    return %c0_i32, %c0_i32_0 : i32, i32
  }
  func.func @transform_3(%arg0: i32) -> (i32, i32) {
    %c0_i32 = arith.constant 0 : i32
    %c0_i32_0 = arith.constant 0 : i32
    %c0_i32_1 = arith.constant 0 : i32
    return %c0_i32, %c0_i32_0 : i32, i32
  }
  func.func @transform_4(%arg0: i32) -> (i32, i32) {
    %c0_i32 = arith.constant 0 : i32
    %c0_i32_0 = arith.constant 0 : i32
    %c0_i32_1 = arith.constant 0 : i32
    return %c0_i32, %c0_i32_0 : i32, i32
  }
  func.func @transform_5(%arg0: i32) -> (i32, i32, i32) {
    %c0_i32 = arith.constant 0 : i32
    %c0_i32_0 = arith.constant 0 : i32
    %c0_i32_1 = arith.constant 0 : i32
    return %arg0, %c0_i32, %c0_i32_0 : i32, i32, i32
  }
}

</mosaic_0001>

<bundles_post_ra>
// kernel: tpu_custom_call.1
= control target key start
LH: loop header
LB: loop body
LE: loop exit
PB: predicated region body
PF: predicated region fallthrough
CT: control target
= control target key end

     0   :  { %v7612_v2 = vmov 0   ;;  %s7604_s0 = inlined_call_operand.vmem [shape: f32[1,3,512], index: 0, kind: input, shape index: {}]   ;;  %s7605_s1 = inlined_call_operand.vmem [shape: f32[256,3], index: 1, kind: input, shape index: {}]   ;;  %s7606_s2 = inlined_call_operand.vmem [shape: f32[256,1], index: 2, kind: input, shape index: {}]   ;;  %s7607_s3 = inlined_call_operand.vmem [shape: f32[256,256], index: 3, kind: input, shape index: {}]   ;;  %s7608_s4 = inlined_call_operand.vmem [shape: f32[256,1], index: 4, kind: input, shape index: {}]   ;;  %s7609_s5 = inlined_call_operand.hbm [shape: f32[2,256,256], index: 5, kind: output, shape index: {}]  }
   0x1   :  { %v4110_v0 = vld [vmem:[%s7605_s1 + $0x10] sm:$0xff]  ;;  %v4115_v1 = vld [vmem:[%s7605_s1] sm:$0xff]  ;;  %3743 = vset.pattern.permute.xlu1 %v7612_v2  ;;  %3742 = vset.pattern.permute.xlu0 %v7612_v2  ;;  %v4124_v3 = vld [vmem:[%s7605_s1 + $0x18] sm:$0xff] }
   0x2   :  { %99 = vperm.xlu1 %3743, %v4110_v0   ;;  %89 = vperm.xlu0 %3742, %v4115_v1   ;;  %v4129_v4 = vld [vmem:[%s7605_s1 + $0x8] sm:$0xff]  ;;  %v4141_v6 = vld [vmem:[%s7605_s1 + $0x20] sm:$0xff]  ;;  %v4148_v7 = vld [vmem:[%s7605_s1 + $0x38] sm:$0xff] }
   0x3   :  { %v4136_v5 = vld [vmem:[%s7605_s1 + $0x28] sm:$0xff]  ;;  %v4153_v8 = vld [vmem:[%s7605_s1 + $0x30] sm:$0xff] }
   0x6   :  { %104 = vperm.xlu1 %3743, %v4124_v3   ;;  %94 = vperm.xlu0 %3742, %v4129_v4  }
   0xa   :  { %114 = vperm.xlu1 %3743, %v4136_v5   ;;  %109 = vperm.xlu0 %3742, %v4141_v6  }
   0xe   :  { %124 = vperm.xlu1 %3743, %v4148_v7   ;;  %119 = vperm.xlu0 %3742, %v4153_v8  }
   0xf   :  { %10 = vsyncpa [#allocation3], 0  ;;  %v4160_v9 = vld [vmem:[%s7605_s1 + $0x48] sm:$0xff]  ;;  %v4165_v10 = vld [vmem:[%s7605_s1 + $0x40] sm:$0xff]  ;;  %v7614_v34 = vmov 1   ;;  %v7610_v38 = vmov 2  }
  0x10   :  { %v4172_v11 = vld [vmem:[%s7605_s1 + $0x58] sm:$0xff]  ;;  %v4177_v12 = vld [vmem:[%s7605_s1 + $0x50] sm:$0xff]  ;;  %v4184_v13 = vld [vmem:[%s7605_s1 + $0x68] sm:$0xff] }
  0x11   :  { %v4189_v14 = vld [vmem:[%s7605_s1 + $0x60] sm:$0xff]  ;;  %v4196_v15 = vld [vmem:[%s7605_s1 + $0x78] sm:$0xff]  ;;  %v4201_v16 = vld [vmem:[%s7605_s1 + $0x70] sm:$0xff] }
  0x12   :  { %134 = vperm.xlu1 %3743, %v4160_v9   ;;  %129 = vperm.xlu0 %3742, %v4165_v10   ;;  %v4208_v17 = vld [vmem:[%s7605_s1 + $0x88] sm:$0xff]  ;;  %v4213_v18 = vld [vmem:[%s7605_s1 + $0x80] sm:$0xff]  ;;  %v4220_v19 = vld [vmem:[%s7605_s1 + $0x98] sm:$0xff] }
  0x13   :  { %v4225_v20 = vld [vmem:[%s7605_s1 + $0x90] sm:$0xff]  ;;  %v4232_v21 = vld [vmem:[%s7605_s1 + $0xa8] sm:$0xff]  ;;  %v4237_v22 = vld [vmem:[%s7605_s1 + $0xa0] sm:$0xff] }
  0x14   :  { %v4244_v23 = vld [vmem:[%s7605_s1 + $0xb8] sm:$0xff]  ;;  %v4249_v24 = vld [vmem:[%s7605_s1 + $0xb0] sm:$0xff]  ;;  %v4256_v25 = vld [vmem:[%s7605_s1 + $0xc8] sm:$0xff] }
  0x15   :  { %7765 = vst [vmem:[#allocation5_spill] sm:$0xff] %v4244_v23  ;;  %7766 = vst [vmem:[#allocation6_spill] sm:$0xff] %v4249_v24  ;;  %v4261_v26 = vld [vmem:[%s7605_s1 + $0xc0] sm:$0xff]  ;;  %v4268_v27 = vld [vmem:[%s7605_s1 + $0xd8] sm:$0xff] }
  0x16   :  { %144 = vperm.xlu1 %3743, %v4172_v11   ;;  %139 = vperm.xlu0 %3742, %v4177_v12   ;;  %7767 = vst [vmem:[#allocation7_spill] sm:$0xff] %v4256_v25  ;;  %7768 = vst [vmem:[#allocation8_spill] sm:$0xff] %v4261_v26  ;;  %v4273_v28 = vld [vmem:[%s7605_s1 + $0xd0] sm:$0xff]  ;;  %v4280_v29 = vld [vmem:[%s7605_s1 + $0xe8] sm:$0xff] }
  0x17   :  { %v4285_v30 = vld [vmem:[%s7605_s1 + $0xe0] sm:$0xff]  ;;  %v4292_v31 = vld [vmem:[%s7605_s1 + $0xf8] sm:$0xff]  ;;  %v4297_v32 = vld [vmem:[%s7605_s1 + $0xf0] sm:$0xff] }
  0x18   :  { %v55_v33 = vld [vmem:[%s7606_s2] sm:$0xff]  ;;  %v56_v39 = vld [vmem:[%s7606_s2 + $0x8] sm:$0xff]  ;;  %v57_v40 = vld [vmem:[%s7606_s2 + $0x10] sm:$0xff] }
  0x19   :  { %v59_v35 = vld [vmem:[%s7606_s2 + $0x20] sm:$0xff]  ;;  %v58_v41 = vld [vmem:[%s7606_s2 + $0x18] sm:$0xff]  ;;  %v60_v48 = vld [vmem:[%s7606_s2 + $0x28] sm:$0xff] }
  0x1a   :  { %154 = vperm.xlu1 %3743, %v4184_v13   ;;  %149 = vperm.xlu0 %3742, %v4189_v14   ;;  %v63_v36 = vld [vmem:[%s7606_s2 + $0x40] sm:$0xff]  ;;  %v61_v53 = vld [vmem:[%s7606_s2 + $0x30] sm:$0xff]  ;;  %v62_v56 = vld [vmem:[%s7606_s2 + $0x38] sm:$0xff] }
  0x1b   :  { %v67_v37 = vld [vmem:[%s7606_s2 + $0x60] sm:$0xff]  ;;  %v64_v63 = vld [vmem:[%s7606_s2 + $0x48] sm:$0xff] }
  0x1e   :  { %164 = vperm.xlu1 %3743, %v4196_v15   ;;  %159 = vperm.xlu0 %3742, %v4201_v16  }
  0x22   :  { %174 = vperm.xlu1 %3743, %v4208_v17   ;;  %169 = vperm.xlu0 %3742, %v4213_v18  }
  0x26   :  { %184 = vperm.xlu1 %3743, %v4220_v19   ;;  %179 = vperm.xlu0 %3742, %v4225_v20  }
  0x2a   :  { %194 = vperm.xlu1 %3743, %v4232_v21   ;;  %189 = vperm.xlu0 %3742, %v4237_v22  }
  0x2e   :  { %204 = vperm.xlu1 %3743, %v4244_v23   ;;  %199 = vperm.xlu0 %3742, %v4249_v24  }
  0x32   :  { %214 = vperm.xlu1 %3743, %v4256_v25   ;;  %209 = vperm.xlu0 %3742, %v4261_v26  }
  0x36   :  { %224 = vperm.xlu1 %3743, %v4268_v27   ;;  %219 = vperm.xlu0 %3742, %v4273_v28  }
  0x3a   :  { %234 = vperm.xlu1 %3743, %v4280_v29   ;;  %229 = vperm.xlu0 %3742, %v4285_v30  }
  0x3e   :  { %244 = vperm.xlu1 %3743, %v4292_v31   ;;  %239 = vperm.xlu0 %3742, %v4297_v32  }
  0x42   :  { %3744 = vset.pattern.permute.xlu1 %v7614_v34  ;;  %1255 = vperm.xlu0 %3742, %v55_v33  }
  0x43   :  { %418 = vperm.xlu1 %3744, %v4129_v4  }
  0x46   :  { %1275 = vperm.xlu0 %3742, %v59_v35   ;;  %v69_v35 = vld [vmem:[%s7606_s2 + $0x70] sm:$0xff] }
  0x47   :  { %422 = vperm.xlu1 %3744, %v4110_v0  }
  0x4a   :  { %1295 = vperm.xlu0 %3742, %v63_v36  }
  0x4b   :  { %430 = vperm.xlu1 %3744, %v4141_v6  }
  0x4e   :  { %1315 = vperm.xlu0 %3742, %v67_v37  }
  0x4f   :  { %438 = vperm.xlu1 %3744, %v4153_v8  }
  0x52   :  { %3758 = vset.pattern.permute.xlu0 %v7614_v34 }
  0x53   :  { %446 = vperm.xlu1 %3744, %v4165_v10   ;;  %414 = vperm.xlu0 %3758, %v4115_v1  }
  0x57   :  { %454 = vperm.xlu1 %3744, %v4177_v12   ;;  %426 = vperm.xlu0 %3758, %v4124_v3  }
  0x5b   :  { %462 = vperm.xlu1 %3744, %v4189_v14   ;;  %434 = vperm.xlu0 %3758, %v4136_v5  }
  0x5f   :  { %470 = vperm.xlu1 %3744, %v4201_v16   ;;  %442 = vperm.xlu0 %3758, %v4148_v7  }
  0x63   :  { %478 = vperm.xlu1 %3744, %v4213_v18   ;;  %450 = vperm.xlu0 %3758, %v4160_v9  }
  0x67   :  { %3745 = vset.pattern.permute.xlu1 %v7610_v38  ;;  %458 = vperm.xlu0 %3758, %v4172_v11  }
  0x68   :  { %834 = vperm.xlu1 %3745, %v4115_v1  }
  0x6b   :  { %466 = vperm.xlu0 %3758, %v4184_v13  }
  0x6c   :  { %842 = vperm.xlu1 %3745, %v4110_v0  }
  0x6f   :  { %474 = vperm.xlu0 %3758, %v4196_v15  }
  0x70   :  { %846 = vperm.xlu1 %3745, %v4124_v3  }
  0x73   :  { %482 = vperm.xlu0 %3758, %v4208_v17  }
  0x74   :  { %3746 = vset.pattern.permute.xlu1 %v7612_v2 }
  0x75   :  { %1260 = vperm.xlu1 %3746, %v56_v39  }
  0x77   :  { %486 = vperm.xlu0 %3758, %v4225_v20  }
  0x79   :  { %3747 = vset.pattern.permute.xlu1 %v7610_v38 }
  0x7a   :  { %850 = vperm.xlu1 %3747, %v4141_v6  }
  0x7b   :  { %494 = vperm.xlu0 %3758, %v4237_v22  }
  0x7e   :  { %3748 = vset.pattern.permute.xlu1 %v7612_v2 }
  0x7f   :  { %1265 = vperm.xlu1 %3748, %v57_v40   ;;  %502 = vperm.xlu0 %3758, %v4249_v24   ;;  %v21_v40 = vld [vmem:[%s7604_s0] sm:$0x77]  ;;  %v72_v24 = vld [vmem:[%s7606_s2 + $0x88] sm:$0xff] }
  0x81   :  { %v4353_v42 = vpop.permute.xlu1 %99  ;;  %v4355_v43 = vpop.permute.xlu0 %89 }
  0x83   :  { %1270 = vperm.xlu1 %3748, %v58_v41   ;;  %510 = vperm.xlu0 %3758, %v4261_v26  }
  0x85   :  { %v4358_v44 = vpop.permute.xlu1 %104  ;;  %v4360_v45 = vpop.permute.xlu0 %94 }
  0x87   :  { %3749 = vset.pattern.permute.xlu1 %v7610_v38  ;;  %518 = vperm.xlu0 %3758, %v4273_v28  }
  0x88   :  { %862 = vperm.xlu1 %3749, %v4148_v7  }
  0x89   :  { %v4365_v46 = vpop.permute.xlu1 %114  ;;  %v4367_v47 = vpop.permute.xlu0 %109 }
  0x8b   :  { %526 = vperm.xlu0 %3758, %v4285_v30  }
  0x8c   :  { %3750 = vset.pattern.permute.xlu1 %v7612_v2 }
  0x8d   :  { %v4374_v49 = vpop.permute.xlu1 %124  ;;  %1280 = vperm.xlu1 %3750, %v60_v48   ;;  %v4376_v50 = vpop.permute.xlu0 %119  ;;  %v22_v48 = vld [vmem:[%s7604_s0 + $0x8] sm:$0x77] }
  0x8f   :  { %534 = vperm.xlu0 %3758, %v4297_v32  }
  0x91   :  { %v4379_v51 = vpop.permute.xlu1 %134  ;;  %3751 = vset.pattern.permute.xlu1 %v7610_v38  ;;  %v4382_v52 = vpop.permute.xlu0 %129 }
  0x92   :  { %866 = vperm.xlu1 %3751, %v4165_v10  }
  0x93   :  { %3780 = vset.pattern.permute.xlu0 %v7610_v38 }
  0x94   :  { %838 = vperm.xlu0 %3780, %v4129_v4  }
  0x95   :  { %v4390_v54 = vpop.permute.xlu1 %144  ;;  %v4392_v55 = vpop.permute.xlu0 %139 }
  0x96   :  { %3752 = vset.pattern.permute.xlu1 %v7612_v2 }
  0x97   :  { %1285 = vperm.xlu1 %3752, %v61_v53  }
  0x98   :  { %854 = vperm.xlu0 %3780, %v4136_v5   ;;  %v65_v5 = vld [vmem:[%s7606_s2 + $0x50] sm:$0xff] }
  0x99   :  { %v4399_v57 = vpop.permute.xlu1 %154  ;;  %v4401_v58 = vpop.permute.xlu0 %149 }
  0x9b   :  { %1290 = vperm.xlu1 %3752, %v62_v56  }
  0x9c   :  { %858 = vperm.xlu0 %3780, %v4153_v8   ;;  %v66_v8 = vld [vmem:[%s7606_s2 + $0x58] sm:$0xff] }
  0x9d   :  { %v4404_v59 = vpop.permute.xlu1 %164  ;;  %v4406_v60 = vpop.permute.xlu0 %159 }
  0x9f   :  { %3753 = vset.pattern.permute.xlu1 %v7610_v38 }
  0xa0   :  { %878 = vperm.xlu1 %3753, %v4172_v11   ;;  %870 = vperm.xlu0 %3780, %v4160_v9  }
  0xa1   :  { %v4411_v61 = vpop.permute.xlu1 %174  ;;  %v4413_v62 = vpop.permute.xlu0 %169 }
  0xa2   :  { %7769 = vst [vmem:[#allocation9_spill] sm:$0xff] %v4411_v61  ;;  %7770 = vst [vmem:[#allocation10_spill] sm:$0xff] %v4413_v62 }
  0xa4   :  { %3754 = vset.pattern.permute.xlu1 %v7612_v2  ;;  %874 = vperm.xlu0 %3780, %v4177_v12  }
  0xa5   :  { %v4420_v0 = vpop.permute.xlu1 %184  ;;  %1300 = vperm.xlu1 %3754, %v64_v63   ;;  %v4422_v1 = vpop.permute.xlu0 %179 }
  0xa6   :  { %7771 = vst [vmem:[#allocation11_spill] sm:$0xff] %v4420_v0  ;;  %7772 = vst [vmem:[#allocation12_spill] sm:$0xff] %v4422_v1 }
  0xa8   :  { %886 = vperm.xlu0 %3780, %v4184_v13  }
  0xa9   :  { %v4425_v3 = vpop.permute.xlu1 %194  ;;  %3755 = vset.pattern.permute.xlu1 %v7610_v38  ;;  %v4428_v4 = vpop.permute.xlu0 %189 }
  0xaa   :  { %7773 = vst [vmem:[#allocation13_spill] sm:$0xff] %v4425_v3  ;;  %7774 = vst [vmem:[#allocation14_spill] sm:$0xff] %v4428_v4  ;;  %882 = vperm.xlu1 %3755, %v4189_v14  }
  0xac   :  { %890 = vperm.xlu0 %3780, %v4201_v16   ;;  %v68_v16 = vld [vmem:[%s7606_s2 + $0x68] sm:$0xff] }
  0xad   :  { %v4435_v6 = vpop.permute.xlu1 %204  ;;  %v4437_v7 = vpop.permute.xlu0 %199 }
  0xae   :  { %7775 = vst [vmem:[#allocation15_spill] sm:$0xff] %v4435_v6  ;;  %7776 = vst [vmem:[#allocation16_spill] sm:$0xff] %v4437_v7  ;;  %3756 = vset.pattern.permute.xlu1 %v7612_v2 }
  0xaf   :  { %1305 = vperm.xlu1 %3756, %v65_v5  }
  0xb0   :  { %902 = vperm.xlu0 %3780, %v4208_v17  }
  0xb1   :  { %v4444_v9 = vpop.permute.xlu1 %214  ;;  %v4446_v10 = vpop.permute.xlu0 %209 }
  0xb2   :  { %7777 = vst [vmem:[#allocation17_spill] sm:$0xff] %v4444_v9  ;;  %7778 = vst [vmem:[#allocation18_spill] sm:$0xff] %v4446_v10  ;;  %v7792_v10 = vmov 0  }
  0xb3   :  { %1310 = vperm.xlu1 %3756, %v66_v8  }
  0xb4   :  { %910 = vperm.xlu0 %3780, %v4220_v19  }
  0xb5   :  { %v4449_v11 = vpop.permute.xlu1 %224  ;;  %v4451_v12 = vpop.permute.xlu0 %219 }
  0xb6   :  { %7779 = vst [vmem:[#allocation19_spill] sm:$0xff] %v4449_v11  ;;  %7780 = vst [vmem:[#allocation20_spill] sm:$0xff] %v4451_v12 }
  0xb7   :  { %3757 = vset.pattern.permute.xlu1 %v7610_v38 }
  0xb8   :  { %894 = vperm.xlu1 %3757, %v4196_v15   ;;  %918 = vperm.xlu0 %3780, %v4232_v21   ;;  %v249_v15 = vlaneseq }
  0xb9   :  { %v4456_v13 = vpop.permute.xlu1 %234  ;;  %v4458_v14 = vpop.permute.xlu0 %229 }
  0xba   :  { %7781 = vst [vmem:[#allocation21_spill] sm:$0xff] %v4456_v13  ;;  %7782 = vst [vmem:[#allocation22_spill] sm:$0xff] %v4458_v14  ;;  %v250_v32 = vshrl.u32 %v249_v15, 7  ;;  %v85_v14 = vld [vmem:[%s7606_s2 + $0xf0] sm:$0xff] }
  0xbc   :  { %3759 = vset.pattern.permute.xlu1 %v7612_v2  ;;  %926 = vperm.xlu0 %3780, %v4244_v23   ;;  %v251_v37 = vsub.s32 0, %v250_v32  ;;  %v255_v41 = vsub.s32 4, %v250_v32  ;;  %v543_v56 = vsub.s32 1, %v250_v32  ;;  %v547_v5 = vsub.s32 5, %v250_v32 }
  0xbd   :  { %v4465_v17 = vpop.permute.xlu1 %244  ;;  %1320 = vperm.xlu1 %3759, %v68_v16   ;;  %v4467_v28 = vpop.permute.xlu0 %239  ;;  %v963_v8 = vsub.s32 2, %v250_v32  ;;  %v967_v16 = vsub.s32 6, %v250_v32  ;;  %v7790_v32 = vmov 1  }
  0xbe   :  { %7783 = vst [vmem:[#allocation23_spill] sm:$0xff] %v4465_v17  ;;  %7784 = vst [vmem:[#allocation24_spill] sm:$0xff] %v4467_v28  ;;  %v252_v53 = vrot.slane %v21_v40, %v251_v37  ;;  %v256_v15 = vrot.slane %v21_v40, %v255_v41  ;;  %v544_v34 = vrot.slane %v21_v40, %v543_v56 }
  0xbf   :  { %v552_v28 = vrot.slane %v22_v48, %v543_v56  ;;  %v556_v13 = vrot.slane %v22_v48, %v547_v5  ;;  %v964_v12 = vrot.slane %v21_v40, %v963_v8 }
  0xc0   :  { %934 = vperm.xlu0 %3780, %v4256_v25   ;;  %v4510_v11 = vrot.slane %v256_v15, %v251_v37  ;;  %v4518_v7 = vrot.slane %v544_v34, %v543_v56 }
  0xc1   :  { %3760 = vset.pattern.permute.xlu1 %v7610_v38  ;;  %v4471_v30 = vpop.permute.xlu0 %1255  ;;  %v264_v38 = vrot.slane %v22_v48, %v255_v41  ;;  %v972_v41 = vrot.slane %v22_v48, %v963_v8  ;;  %v4533_v15 = vrot.slane %v964_v12, %v963_v8 }
  0xc2   :  { %7785 = vst [vmem:[#allocation25_spill] sm:$0xff] %v4471_v30  ;;  %v4473_v33 = vpop.permute.xlu1 %418  ;;  %898 = vperm.xlu1 %3760, %v4213_v18   ;;  %v70_v18 = vld [vmem:[%s7606_s2 + $0x78] sm:$0xff]  ;;  %7791 = vst [vmem:[#allocation30_spill] sm:$0xff] %v4510_v11  ;;  %v4737_v23 = vmul.f32 %v4510_v11, %v4390_v54 }
  0xc3   :  { %v4516_v6 = vrot.slane %v264_v38, %v251_v37  ;;  %7795 = vst [vmem:[#allocation33_spill] sm:$0xff] %v4518_v7  ;;  %7799 = vst [vmem:[#allocation37_spill] sm:$0xff] %v4533_v15  ;;  %v1738_v15 = vld [vmem:[%s7608_s4 + $0x28] sm:$0xff] }
  0xc4   :  { %942 = vperm.xlu0 %3780, %v4268_v27   ;;  %7820 = vst [vmem:[#allocation57_spill] sm:$0xff] %v4737_v23 }
  0xc5   :  { %v4480_v36 = vpop.permute.xlu0 %1275  ;;  %7794 = vst [vmem:[#allocation32_spill] sm:$0xff] %v4516_v6  ;;  %v4596_v0 = vmul.f32 %v4516_v6, %v4358_v44  ;;  %v4761_v23 = vmul.f32 %v4516_v6, %v4392_v55 }
  0xc6   :  { %7786 = vst [vmem:[#allocation26_spill] sm:$0xff] %v4480_v36  ;;  %v4482_v39 = vpop.permute.xlu1 %422  ;;  %3761 = vset.pattern.permute.xlu1 %v7612_v2  ;;  %v4502_v2 = vrot.slane %v252_v53, %v251_v37  ;;  %v976_v53 = vrot.slane %v22_v48, %v967_v16  ;;  %v4631_v36 = vmul.f32 %v4516_v6, %v4365_v46 }
  0xc7   :  { %1325 = vperm.xlu1 %3761, %v69_v35   ;;  %v260_v35 = vrot.slane %v22_v48, %v251_v37 }
  0xc8   :  { %950 = vperm.xlu0 %3780, %v4280_v29   ;;  %7789 = vst [vmem:[#allocation29_spill] sm:$0xff] %v4502_v2  ;;  %v4539_v34 = vmul.f32 %v4502_v2, %v4353_v42  ;;  %v4600_v1 = vmul.f32 %v4502_v2, %v4360_v45  ;;  %v4611_v62 = vmul.f32 %v4502_v2, %v4365_v46  ;;  %7808 = vst [vmem:[#allocation45_spill] sm:$0xff] %v4631_v36 }
  0xc9   :  { %v4492_v27 = vpop.permute.xlu0 %1295  ;;  %v4514_v9 = vrot.slane %v260_v35, %v251_v37  ;;  %v4546_v37 = vrot.slane %v972_v41, %v963_v8  ;;  %v4548_v35 = vrot.slane %v976_v53, %v963_v8  ;;  %v4584_v53 = vmul.f32 %v4516_v6, %v4355_v43 }
  0xca   :  { %7787 = vst [vmem:[#allocation27_spill] sm:$0xff] %v4492_v27  ;;  %v4497_v63 = vpop.permute.xlu1 %430  ;;  %7805 = vst [vmem:[#allocation42_spill] sm:$0xff] %v4611_v62  ;;  %v4623_v27 = vmul.f32 %v4510_v11, %v4365_v46  ;;  %v4636_v25 = vmul.f32 %v4502_v2, %v4367_v47  ;;  %v4706_v36 = vmul.f32 %v4516_v6, %v4379_v51 }
  0xcb   :  { %1330 = vperm.xlu1 %3761, %v70_v18   ;;  %v548_v18 = vrot.slane %v21_v40, %v547_v5  ;;  %7793 = vst [vmem:[#allocation31_spill] sm:$0xff] %v4514_v9  ;;  %v4520_v5 = vrot.slane %v552_v28, %v543_v56  ;;  %v7801_v28 = vmov 2   ;;  %7802 = vst [vmem:[#allocation39_spill] sm:$0xff] %v4546_v37  ;;  %v4552_v12 = vmul.f32 %v4514_v9, %v4353_v42 }
  0xcc   :  { %958 = vperm.xlu0 %3780, %v4292_v31   ;;  %v968_v31 = vrot.slane %v21_v40, %v967_v16  ;;  %v4531_v16 = vrot.slane %v556_v13, %v543_v56  ;;  %7803 = vst [vmem:[#allocation40_spill] sm:$0xff] %v4548_v35  ;;  %v4556_v13 = vmul.f32 %v4516_v6, %v4353_v42  ;;  %7806 = vst [vmem:[#allocation43_spill] sm:$0xff] %v4623_v27 }
  0xcd   :  { %v4500_v29 = vpop.permute.xlu0 %1315  ;;  %7796 = vst [vmem:[#allocation34_spill] sm:$0xff] %v4520_v5  ;;  %v4529_v48 = vrot.slane %v548_v18, %v543_v56  ;;  %v4560_v56 = vmul.f32 %v4502_v2, %v4355_v43  ;;  %v4565_v18 = vmul.f32 %v4514_v9, %v4355_v43  ;;  %v4592_v4 = vmul.f32 %v4514_v9, %v4358_v44 }
  0xce   :  { %7788 = vst [vmem:[#allocation28_spill] sm:$0xff] %v4500_v29  ;;  %v4504_v17 = vpop.permute.xlu1 %438  ;;  %7798 = vst [vmem:[#allocation36_spill] sm:$0xff] %v4531_v16  ;;  %v4535_v38 = vrot.slane %v968_v31, %v963_v8  ;;  %v4569_v8 = vmul.f32 %v4502_v2, %v4358_v44  ;;  %v4607_v61 = vmul.f32 %v4514_v9, %v4360_v45 }
  0xcf   :  { %3762 = vset.pattern.permute.xlu1 %v7790_v32  ;;  %7797 = vst [vmem:[#allocation35_spill] sm:$0xff] %v4529_v48  ;;  %7804 = vst [vmem:[#allocation41_spill] sm:$0xff] %v4592_v4  ;;  %v4619_v29 = vmul.f32 %v4516_v6, %v4360_v45  ;;  %v4627_v26 = vmul.f32 %v4514_v9, %v4365_v46  ;;  %v4644_v30 = vmul.f32 %v4514_v9, %v4367_v47 }
  0xd0   :  { %490 = vperm.xlu1 %3762, %v4220_v19   ;;  %3784 = vset.pattern.permute.xlu0 %v7792_v10  ;;  %v1734_v19 = vld [vmem:[%s7608_s4 + $0x8] sm:$0xff]  ;;  %7800 = vst [vmem:[#allocation38_spill] sm:$0xff] %v4535_v38  ;;  %v4648_v37 = vmul.f32 %v4516_v6, %v4367_v47  ;;  %v4659_v35 = vmul.f32 %v4502_v2, %v4374_v49  ;;  %7816 = vst [vmem:[#allocation53_spill] sm:$0xff] %v4706_v36 }
  0xd1   :  { %1405 = vperm.xlu0 %3784, %v85_v14   ;;  %v4543_v14 = vmul.f32 %v4510_v11, %v4353_v42  ;;  %v1736_v42 = vld [vmem:[%s7608_s4 + $0x18] sm:$0xff]  ;;  %7807 = vst [vmem:[#allocation44_spill] sm:$0xff] %v4627_v26  ;;  %v4663_v38 = vmul.f32 %v4510_v11, %v4374_v49  ;;  %v4678_v26 = vmul.f32 %v4502_v2, %v4376_v50 }
  0xd2   :  { %v4522_v3 = vpop.permute.xlu1 %446  ;;  %v4524_v40 = vpop.permute.xlu0 %414  ;;  %7809 = vst [vmem:[#allocation46_spill] sm:$0xff] %v4659_v35  ;;  %v4682_v35 = vmul.f32 %v4510_v11, %v4376_v50  ;;  %v4702_v62 = vmul.f32 %v4514_v9, %v4379_v51  ;;  %v4733_v36 = vmul.f32 %v4502_v2, %v4390_v54  ;;  %v4842_v4 = vmul.f32 %v4514_v9, %v4406_v60 }
  0xd3   :  { %7810 = vst [vmem:[#allocation47_spill] sm:$0xff] %v4663_v38  ;;  %v4686_v38 = vmul.f32 %v4514_v9, %v4376_v50 }
  0xd4   :  { %3763 = vset.pattern.permute.xlu1 %v7801_v28  ;;  %7815 = vst [vmem:[#allocation52_spill] sm:$0xff] %v4702_v62  ;;  %v4722_v62 = vmul.f32 %v4516_v6, %v4382_v52  ;;  %7819 = vst [vmem:[#allocation56_spill] sm:$0xff] %v4733_v36  ;;  %v4757_v36 = vmul.f32 %v4514_v9, %v4392_v55 }
  0xd5   :  { %906 = vperm.xlu1 %3763, %v4225_v20   ;;  %1772 = vperm.xlu0 %3784, %v1734_v19   ;;  %v4580_v20 = vmul.f32 %v4510_v11, %v4355_v43  ;;  %v4588_v19 = vmul.f32 %v4510_v11, %v4358_v44  ;;  %v71_v43 = vld [vmem:[%s7606_s2 + $0x80] sm:$0xff]  ;;  %v4615_v44 = vmul.f32 %v4510_v11, %v4360_v45 }
  0xd6   :  { %v4571_v31 = vpop.permute.xlu1 %454  ;;  %v4573_v41 = vpop.permute.xlu0 %426  ;;  %v4640_v45 = vmul.f32 %v4510_v11, %v4367_v47  ;;  %v4667_v47 = vmul.f32 %v4514_v9, %v4374_v49  ;;  %7824 = vst [vmem:[#allocation61_spill] sm:$0xff] %v4757_v36  ;;  %7840 = vst [vmem:[#allocation77_spill] sm:$0xff] %v4842_v4 }
  0xd8   :  { %7811 = vst [vmem:[#allocation48_spill] sm:$0xff] %v4667_v47  ;;  %v4694_v47 = vmul.f32 %v4502_v2, %v4379_v51 }
  0xd9   :  { %3764 = vset.pattern.permute.xlu1 %v7792_v10  ;;  %1782 = vperm.xlu0 %3784, %v1736_v42  }
  0xda   :  { %v4650_v46 = vpop.permute.xlu1 %462  ;;  %1335 = vperm.xlu1 %3764, %v71_v43   ;;  %v4652_v42 = vpop.permute.xlu0 %434  ;;  %v4671_v43 = vmul.f32 %v4516_v6, %v4374_v49  ;;  %v4690_v49 = vmul.f32 %v4516_v6, %v4376_v50  ;;  %7813 = vst [vmem:[#allocation50_spill] sm:$0xff] %v4694_v47  ;;  %v4710_v50 = vmul.f32 %v4502_v2, %v4382_v52 }
  0xdb   :  { %v4714_v47 = vmul.f32 %v4510_v11, %v4382_v52 }
  0xdc   :  { %7812 = vst [vmem:[#allocation49_spill] sm:$0xff] %v4671_v43  ;;  %v4698_v43 = vmul.f32 %v4510_v11, %v4379_v51 }
  0xdd   :  { %1792 = vperm.xlu0 %3784, %v1738_v15   ;;  %v1740_v15 = vld [vmem:[%s7608_s4 + $0x38] sm:$0xff] }
  0xde   :  { %7814 = vst [vmem:[#allocation51_spill] sm:$0xff] %v4698_v43  ;;  %v4718_v43 = vmul.f32 %v4514_v9, %v4382_v52  ;;  %v4724_v27 = vpop.permute.xlu1 %470  ;;  %1340 = vperm.xlu1 %3764, %v72_v24   ;;  %v4726_v51 = vpop.permute.xlu0 %442  ;;  %v4741_v52 = vmul.f32 %v4514_v9, %v4390_v54  ;;  %v4745_v24 = vmul.f32 %v4516_v6, %v4390_v54 }
  0xdf   :  { %7817 = vst [vmem:[#allocation54_spill] sm:$0xff] %v4724_v27  ;;  %7818 = vst [vmem:[#allocation55_spill] sm:$0xff] %v4726_v51  ;;  %v4749_v51 = vmul.f32 %v4502_v2, %v4392_v55  ;;  %v4753_v27 = vmul.f32 %v4510_v11, %v4392_v55  ;;  %v4765_v54 = vmul.f32 %v4502_v2, %v4399_v57 }
  0xe0   :  { %7821 = vst [vmem:[#allocation58_spill] sm:$0xff] %v4741_v52  ;;  %7822 = vst [vmem:[#allocation59_spill] sm:$0xff] %v4745_v24  ;;  %v4769_v52 = vmul.f32 %v4510_v11, %v4399_v57  ;;  %v4773_v24 = vmul.f32 %v4514_v9, %v4399_v57  ;;  %v4781_v55 = vmul.f32 %v4502_v2, %v4401_v58 }
  0xe1   :  { %7823 = vst [vmem:[#allocation60_spill] sm:$0xff] %v4749_v51  ;;  %7825 = vst [vmem:[#allocation62_spill] sm:$0xff] %v4765_v54  ;;  %v4777_v51 = vmul.f32 %v4516_v6, %v4399_v57  ;;  %1802 = vperm.xlu0 %3784, %v1740_v15   ;;  %v4785_v54 = vmul.f32 %v4510_v11, %v4401_v58  ;;  %v1742_v15 = vld [vmem:[%s7608_s4 + $0x48] sm:$0xff] }
  0xe2   :  { %7826 = vst [vmem:[#allocation63_spill] sm:$0xff] %v4769_v52  ;;  %7827 = vst [vmem:[#allocation64_spill] sm:$0xff] %v4773_v24  ;;  %v4789_v52 = vmul.f32 %v4514_v9, %v4401_v58  ;;  %v4793_v24 = vmul.f32 %v4516_v6, %v4401_v58  ;;  %v4795_v36 = vpop.permute.xlu1 %478  ;;  %3765 = vset.pattern.permute.xlu1 %v7790_v32  ;;  %v4798_v57 = vpop.permute.xlu0 %450  ;;  %v4813_v58 = vmul.f32 %v4514_v9, %v4404_v59 }
  0xe3   :  { %7828 = vst [vmem:[#allocation65_spill] sm:$0xff] %v4777_v51  ;;  %7829 = vst [vmem:[#allocation66_spill] sm:$0xff] %v4781_v55  ;;  %v4805_v51 = vmul.f32 %v4502_v2, %v4404_v59  ;;  %498 = vperm.xlu1 %3765, %v4232_v21   ;;  %v583_v55 = vmul.f32 %v4520_v5, %v4473_v33  ;;  %v4832_v21 = vmul.f32 %v4502_v2, %v4406_v60 }
  0xe4   :  { %7830 = vst [vmem:[#allocation67_spill] sm:$0xff] %v4785_v54  ;;  %7831 = vst [vmem:[#allocation68_spill] sm:$0xff] %v4789_v52  ;;  %v4809_v52 = vmul.f32 %v4510_v11, %v4404_v59  ;;  %v588_v54 = vmul.f32 %v4531_v16, %v4482_v39  ;;  %v587_v2 = vmul.f32 %v4520_v5, %v4482_v39 }
  0xe5   :  { %7832 = vst [vmem:[#allocation69_spill] sm:$0xff] %v4793_v24  ;;  %7833 = vst [vmem:[#allocation70_spill] sm:$0xff] %v4795_v36  ;;  %v582_v36 = vmul.f32 %v4529_v48, %v4473_v33  ;;  %v4836_v24 = vmul.f32 %v4510_v11, %v4406_v60  ;;  %1812 = vperm.xlu0 %3784, %v1742_v15   ;;  %v1744_v15 = vld [vmem:[%s7608_s4 + $0x58] sm:$0xff]  ;;  %v593_v9 = vmul.f32 %v4518_v7, %v4497_v63 }
  0xe6   :  { %7834 = vst [vmem:[#allocation71_spill] sm:$0xff] %v4798_v57  ;;  %7835 = vst [vmem:[#allocation72_spill] sm:$0xff] %v4805_v51  ;;  %v581_v57 = vmul.f32 %v4518_v7, %v4473_v33  ;;  %v586_v51 = vmul.f32 %v4529_v48, %v4482_v39  ;;  %v4852_v11 = vpop.permute.xlu0 %458 }
  0xe7   :  { %7836 = vst [vmem:[#allocation73_spill] sm:$0xff] %v4809_v52  ;;  %7837 = vst [vmem:[#allocation74_spill] sm:$0xff] %v4813_v58  ;;  %v584_v52 = vmul.f32 %v4531_v16, %v4473_v33  ;;  %v4828_v58 = vmul.f32 %v4516_v6, %v4404_v59  ;;  %v4846_v59 = vmul.f32 %v4516_v6, %v4406_v60  ;;  %3766 = vset.pattern.permute.xlu1 %v7801_v28  ;;  %v4864_v6 = vpop.permute.xlu1 %834 }
  0xe8   :  { %7839 = vst [vmem:[#allocation76_spill] sm:$0xff] %v4832_v21  ;;  %v585_v33 = vmul.f32 %v4518_v7, %v4482_v39  ;;  %7842 = vst [vmem:[#allocation79_spill] sm:$0xff] %v4852_v11  ;;  %v596_v60 = vmul.f32 %v4531_v16, %v4497_v63  ;;  %v4867_v39 = vadd.f32 %v582_v36, %v4615_v44  ;;  %914 = vperm.xlu1 %3766, %v4237_v22  }
  0xe9   :  { %7838 = vst [vmem:[#allocation75_spill] sm:$0xff] %v4828_v58  ;;  %7841 = vst [vmem:[#allocation78_spill] sm:$0xff] %v4846_v59  ;;  %v594_v58 = vmul.f32 %v4529_v48, %v4497_v63  ;;  %v4871_v4 = vadd.f32 %v584_v52, %v4619_v29  ;;  %v4874_v21 = vadd.f32 %v581_v57, %v4600_v1  ;;  %1822 = vperm.xlu0 %3784, %v1744_v15  }
  0xea   :  { %7843 = vst [vmem:[#allocation80_spill] sm:$0xff] %v4864_v6  ;;  %7844 = vst [vmem:[#allocation81_spill] sm:$0xff] %v4867_v39  ;;  %v4877_v11 = vadd.f32 %v583_v55, %v4607_v61  ;;  %v4880_v59 = vadd.f32 %v586_v51, %v4543_v14  ;;  %v595_v6 = vmul.f32 %v4520_v5, %v4497_v63  ;;  %v4895_v14 = vpop.permute.xlu0 %466  ;;  %v73_v63 = vld [vmem:[%s7606_s2 + $0x90] sm:$0xff] }
  0xeb   :  { %7845 = vst [vmem:[#allocation82_spill] sm:$0xff] %v4871_v4  ;;  %7846 = vst [vmem:[#allocation83_spill] sm:$0xff] %v4874_v21  ;;  %v602_v36 = vmul.f32 %v4529_v48, %v4504_v17  ;;  %v604_v22 = vmul.f32 %v4531_v16, %v4504_v17  ;;  %v4889_v29 = vadd.f32 %v588_v54, %v4556_v13  ;;  %v4908_v52 = vpop.permute.xlu1 %842  ;;  %v7909_v4 = vld [vmem:[#allocation52_spill] sm:$0xff] }
  0xec   :  { %7847 = vst [vmem:[#allocation84_spill] sm:$0xff] %v4877_v11  ;;  %v601_v61 = vmul.f32 %v4518_v7, %v4504_v17  ;;  %v603_v1 = vmul.f32 %v4520_v5, %v4504_v17  ;;  %v4901_v44 = vadd.f32 %v585_v33, %v4539_v34  ;;  %v4904_v51 = vadd.f32 %v587_v2, %v4552_v12  ;;  %v1746_v34 = vld [vmem:[%s7608_s4 + $0x68] sm:$0xff]  ;;  %v7906_v11 = vld [vmem:[#allocation51_spill] sm:$0xff] }
  0xed   :  { %v610_v13 = vmul.f32 %v4529_v48, %v4522_v3  ;;  %v4911_v54 = vadd.f32 %v594_v58, %v4640_v45  ;;  %v4914_v17 = vadd.f32 %v596_v60, %v4648_v37  ;;  %v4917_v55 = vadd.f32 %v593_v9, %v4636_v25  ;;  %3767 = vset.pattern.permute.xlu1 %v7792_v10 }
  0xee   :  { %v609_v2 = vmul.f32 %v4518_v7, %v4522_v3  ;;  %v612_v12 = vmul.f32 %v4531_v16, %v4522_v3  ;;  %v578_v45 = vmul.f32 %v4529_v48, %v4524_v40  ;;  %v580_v37 = vmul.f32 %v4531_v16, %v4524_v40  ;;  %1345 = vperm.xlu1 %3767, %v73_v63   ;;  %v4946_v60 = vpop.permute.xlu0 %474  ;;  %v74_v63 = vld [vmem:[%s7606_s2 + $0x98] sm:$0xff] }
  0xef   :  { %v577_v25 = vmul.f32 %v4518_v7, %v4524_v40  ;;  %v4934_v9 = vadd.f32 %v595_v6, %v4644_v30  ;;  %v4937_v57 = vadd.f32 %v602_v36, %v4682_v35  ;;  %v4940_v58 = vadd.f32 %v604_v22, %v4690_v49  ;;  %7850 = vst [vmem:[#allocation87_spill] sm:$0xff] %v4946_v60  ;;  %v4963_v49 = vpop.permute.xlu1 %846 }
  0xf0   :  { %v611_v33 = vmul.f32 %v4520_v5, %v4522_v3  ;;  %v579_v15 = vmul.f32 %v4520_v5, %v4524_v40  ;;  %v4952_v6 = vadd.f32 %v601_v61, %v4678_v26  ;;  %v4955_v30 = vadd.f32 %v603_v1, %v4686_v38  ;;  %1832 = vperm.xlu0 %3784, %v1746_v34   ;;  %v1748_v26 = vld [vmem:[%s7608_s4 + $0x78] sm:$0xff] }
  0xf1   :  { %7848 = vst [vmem:[#allocation85_spill] sm:$0xff] %v4937_v57  ;;  %7849 = vst [vmem:[#allocation86_spill] sm:$0xff] %v4940_v58  ;;  %v618_v35 = vmul.f32 %v4529_v48, %v4571_v31  ;;  %v620_v3 = vmul.f32 %v4531_v16, %v4571_v31  ;;  %v590_v40 = vmul.f32 %v4529_v48, %v4573_v41  ;;  %v7900_v57 = vld [vmem:[#allocation39_spill] sm:$0xff] }
  0xf2   :  { %7851 = vst [vmem:[#allocation88_spill] sm:$0xff] %v4952_v6  ;;  %7852 = vst [vmem:[#allocation89_spill] sm:$0xff] %v4955_v30  ;;  %v4966_v36 = vadd.f32 %v610_v13, %v4714_v47  ;;  %v4972_v38 = vadd.f32 %v578_v45, %v4580_v20  ;;  %v4975_v22 = vadd.f32 %v580_v37, %v4584_v53  ;;  %1350 = vperm.xlu1 %3767, %v74_v63   ;;  %v1750_v45 = vld [vmem:[%s7608_s4 + $0x88] sm:$0xff]  ;;  %v7861_v63 = vld [vmem:[#allocation41_spill] sm:$0xff] }
  0xf3   :  { %v4978_v61 = vadd.f32 %v612_v12, %v4722_v62  ;;  %v4981_v1 = vadd.f32 %v609_v2, %v4710_v50  ;;  %v589_v47 = vmul.f32 %v4518_v7, %v4573_v41  ;;  %v591_v13 = vmul.f32 %v4520_v5, %v4573_v41  ;;  %v4996_v50 = vpop.permute.xlu0 %482 }
  0xf4   :  { %7853 = vst [vmem:[#allocation90_spill] sm:$0xff] %v4966_v36  ;;  %v592_v34 = vmul.f32 %v4531_v16, %v4573_v41  ;;  %v4990_v20 = vadd.f32 %v577_v25, %v4560_v56  ;;  %v617_v62 = vmul.f32 %v4518_v7, %v4571_v31  ;;  %v619_v53 = vmul.f32 %v4520_v5, %v4571_v31 }
  0xf5   :  { %7854 = vst [vmem:[#allocation91_spill] sm:$0xff] %v4978_v61  ;;  %7855 = vst [vmem:[#allocation92_spill] sm:$0xff] %v4981_v1  ;;  %v4999_v2 = vadd.f32 %v579_v15, %v4565_v18  ;;  %v5002_v12 = vadd.f32 %v611_v33, %v4718_v43  ;;  %1842 = vperm.xlu0 %3784, %v1748_v26   ;;  %v626_v41 = vmul.f32 %v4529_v48, %v4650_v46  ;;  %v5026_v33 = vpop.permute.xlu1 %1260  ;;  %v7862_v26 = vld [vmem:[#allocation5_spill] sm:$0xff] }
  0xf6   :  { %7856 = vst [vmem:[#allocation93_spill] sm:$0xff] %v4996_v50  ;;  %v5007_v56 = vadd.f32 %v590_v40, %v4588_v19  ;;  %v5013_v31 = vadd.f32 %v618_v35, %v4753_v27  ;;  %v5016_v18 = vadd.f32 %v620_v3, %v4761_v23  ;;  %v628_v43 = vmul.f32 %v4531_v16, %v4650_v46  ;;  %v7864_v50 = vld [vmem:[#allocation60_spill] sm:$0xff] }
  0xf7   :  { %7857 = vst [vmem:[#allocation94_spill] sm:$0xff] %v5002_v12  ;;  %v597_v37 = vmul.f32 %v4518_v7, %v4652_v42  ;;  %v598_v19 = vmul.f32 %v4529_v48, %v4652_v42  ;;  %v600_v25 = vmul.f32 %v4531_v16, %v4652_v42  ;;  %7860 = vst [vmem:[#allocation97_spill] sm:$0xff] %v5026_v33  ;;  %3768 = vset.pattern.permute.xlu1 %v7790_v32  ;;  %v7899_v12 = vld [vmem:[#allocation37_spill] sm:$0xff]  ;;  %v7905_v33 = vld [vmem:[#allocation48_spill] sm:$0xff] }
  0xf8   :  { %7858 = vst [vmem:[#allocation95_spill] sm:$0xff] %v5013_v31  ;;  %7859 = vst [vmem:[#allocation96_spill] sm:$0xff] %v5016_v18  ;;  %v599_v27 = vmul.f32 %v4520_v5, %v4652_v42  ;;  %v5032_v23 = vadd.f32 %v592_v34, %v4596_v0  ;;  %v5035_v15 = vadd.f32 %v589_v47, %v4569_v8  ;;  %506 = vperm.xlu1 %3768, %v7862_v26   ;;  %v5045_v42 = vpop.permute.xlu0 %486  ;;  %v7866_v34 = vld [vmem:[#allocation54_spill] sm:$0xff]  ;;  %v7869_v18 = vld [vmem:[#allocation67_spill] sm:$0xff] }
  0xf9   :  { %v5038_v35 = vadd.f32 %v591_v13, %v7861_v63  ;;  %v625_v3 = vmul.f32 %v4518_v7, %v4650_v46  ;;  %v627_v40 = vmul.f32 %v4520_v5, %v4650_v46  ;;  %7863 = vst [vmem:[#allocation41_spill] sm:$0xff] %v5045_v42  ;;  %1852 = vperm.xlu0 %3784, %v1750_v45   ;;  %v7867_v13 = vld [vmem:[#allocation61_spill] sm:$0xff]  ;;  %v7871_v46 = vld [vmem:[#allocation43_spill] sm:$0xff] }
  0xfa   :  { %v5048_v0 = vadd.f32 %v617_v62, %v7864_v50  ;;  %v634_v8 = vmul.f32 %v4529_v48, %v7866_v34  ;;  %v636_v47 = vmul.f32 %v4531_v16, %v7866_v34  ;;  %v5055_v63 = vadd.f32 %v619_v53, %v7867_v13  ;;  %v7873_v42 = vld [vmem:[#allocation45_spill] sm:$0xff]  ;;  %v7875_v62 = vld [vmem:[#allocation42_spill] sm:$0xff] }
  0xfb   :  { %v5058_v31 = vadd.f32 %v626_v41, %v7869_v18  ;;  %v5061_v26 = vadd.f32 %v598_v19, %v7871_v46  ;;  %v5064_v45 = vadd.f32 %v600_v25, %v7873_v42  ;;  %v5067_v50 = vadd.f32 %v597_v37, %v7875_v62  ;;  %v7881_v41 = vld [vmem:[#allocation55_spill] sm:$0xff]  ;;  %v5082_v19 = vpop.permute.xlu1 %850  ;;  %v7882_v25 = vld [vmem:[#allocation44_spill] sm:$0xff]  ;;  %v7885_v46 = vld [vmem:[#allocation66_spill] sm:$0xff] }
  0xfc   :  { %7865 = vst [vmem:[#allocation5_spill] sm:$0xff] %v5048_v0  ;;  %7868 = vst [vmem:[#allocation60_spill] sm:$0xff] %v5055_v63  ;;  %v7877_v0 = vld [vmem:[#allocation69_spill] sm:$0xff]  ;;  %v5074_v6 = vmul.f32 %v4518_v7, %v7866_v34  ;;  %v5078_v53 = vmul.f32 %v4520_v5, %v7866_v34  ;;  %v605_v18 = vmul.f32 %v4518_v7, %v7881_v41  ;;  %3769 = vset.pattern.permute.xlu1 %v7801_v28  ;;  %v5097_v13 = vpop.permute.xlu0 %494  ;;  %v7887_v62 = vld [vmem:[#allocation71_spill] sm:$0xff] }
  0xfd   :  { %7870 = vst [vmem:[#allocation54_spill] sm:$0xff] %v5058_v31  ;;  %7872 = vst [vmem:[#allocation61_spill] sm:$0xff] %v5061_v26  ;;  %v5070_v30 = vadd.f32 %v628_v43, %v7877_v0  ;;  %v5085_v42 = vadd.f32 %v599_v27, %v7882_v25  ;;  %v1752_v43 = vld [vmem:[%s7608_s4 + $0x98] sm:$0xff]  ;;  %v606_v37 = vmul.f32 %v4529_v48, %v7881_v41  ;;  %v7892_v63 = vld [vmem:[#allocation78_spill] sm:$0xff] }
  0xfe   :  { %7874 = vst [vmem:[#allocation67_spill] sm:$0xff] %v5064_v45  ;;  %7876 = vst [vmem:[#allocation43_spill] sm:$0xff] %v5067_v50  ;;  %v607_v0 = vmul.f32 %v4520_v5, %v7881_v41  ;;  %v608_v34 = vmul.f32 %v4531_v16, %v7881_v41  ;;  %v5100_v27 = vadd.f32 %v625_v3, %v7885_v46  ;;  %1862 = vperm.xlu0 %3784, %v1752_v43   ;;  %v1754_v50 = vld [vmem:[%s7608_s4 + $0xa8] sm:$0xff] }
  0xff   :  { %7878 = vst [vmem:[#allocation45_spill] sm:$0xff] %v5070_v30  ;;  %7879 = vst [vmem:[#allocation42_spill] sm:$0xff] %v5074_v6  ;;  %v614_v25 = vmul.f32 %v4529_v48, %v7887_v62  ;;  %v7889_v6 = vld [vmem:[#allocation68_spill] sm:$0xff]  ;;  %v5109_v31 = vadd.f32 %v634_v8, %v4836_v24  ;;  %v5112_v41 = vadd.f32 %v636_v47, %v7892_v63  ;;  %v7896_v47 = vld [vmem:[#allocation38_spill] sm:$0xff]  ;;  %v5135_v43 = vpop.permute.xlu1 %1265 }
 0x100   :  { %7880 = vst [vmem:[#allocation69_spill] sm:$0xff] %v5078_v53  ;;  %7883 = vst [vmem:[#allocation55_spill] sm:$0xff] %v5085_v42  ;;  %v7888_v53 = vld [vmem:[#allocation6_spill] sm:$0xff]  ;;  %v5106_v30 = vadd.f32 %v627_v40, %v7889_v6  ;;  %v615_v3 = vmul.f32 %v4520_v5, %v7887_v62  ;;  %v616_v46 = vmul.f32 %v4531_v16, %v7887_v62  ;;  %v75_v40 = vld [vmem:[%s7606_s2 + $0xa0] sm:$0xff] }
 0x101   :  { %7884 = vst [vmem:[#allocation44_spill] sm:$0xff] %v5097_v13  ;;  %7886 = vst [vmem:[#allocation66_spill] sm:$0xff] %v5100_v27  ;;  %922 = vperm.xlu1 %3769, %v7888_v53   ;;  %v613_v13 = vmul.f32 %v4518_v7, %v7887_v62  ;;  %v7894_v27 = vld [vmem:[#allocation79_spill] sm:$0xff]  ;;  %v7895_v8 = vld [vmem:[#allocation80_spill] sm:$0xff]  ;;  %v5157_v36 = vadd.f32 %v607_v0, %v7905_v33 }
 0x102   :  { %7890 = vst [vmem:[#allocation71_spill] sm:$0xff] %v5106_v30  ;;  %7891 = vst [vmem:[#allocation6_spill] sm:$0xff] %v5109_v31  ;;  %v622_v53 = vmul.f32 %v4529_v48, %v7894_v27  ;;  %v621_v24 = vmul.f32 %v4518_v7, %v7894_v27  ;;  %v624_v6 = vmul.f32 %v4531_v16, %v7894_v27  ;;  %v5137_v30 = vpop.permute.xlu0 %502  ;;  %v7901_v42 = vld [vmem:[#allocation47_spill] sm:$0xff]  ;;  %v7904_v26 = vld [vmem:[#allocation46_spill] sm:$0xff]  ;;  %1872 = vperm.xlu0 %3784, %v1754_v50  }
 0x103   :  { %7893 = vst [vmem:[#allocation68_spill] sm:$0xff] %v5112_v41  ;;  %v998_v63 = vmul.f32 %v7896_v47, %v7895_v8  ;;  %v7897_v41 = vld [vmem:[#allocation40_spill] sm:$0xff]  ;;  %v623_v31 = vmul.f32 %v4520_v5, %v7894_v27  ;;  %7898 = vst [vmem:[#allocation78_spill] sm:$0xff] %v5137_v30  ;;  %v997_v58 = vmul.f32 %v7899_v12, %v7895_v8  ;;  %v7903_v27 = vld [vmem:[#allocation49_spill] sm:$0xff] }
 0x104   :  { %v1000_v62 = vmul.f32 %v7897_v41, %v7895_v8  ;;  %v999_v1 = vmul.f32 %v7900_v57, %v7895_v8  ;;  %v5144_v61 = vadd.f32 %v606_v37, %v7901_v42  ;;  %v5151_v45 = vadd.f32 %v608_v34, %v7903_v27  ;;  %v7907_v42 = vld [vmem:[#allocation53_spill] sm:$0xff]  ;;  %v76_v33 = vld [vmem:[%s7606_s2 + $0xa8] sm:$0xff] }
 0x105   :  { %3770 = vset.pattern.permute.xlu1 %v7792_v10  ;;  %v5154_v30 = vadd.f32 %v605_v18, %v7904_v26  ;;  %v5160_v8 = vadd.f32 %v614_v25, %v7906_v11  ;;  %v5163_v37 = vadd.f32 %v616_v46, %v7907_v42  ;;  %v5169_v39 = vadd.f32 %v615_v3, %v7909_v4  ;;  %v7910_v34 = vld [vmem:[#allocation57_spill] sm:$0xff]  ;;  %v7911_v18 = vld [vmem:[#allocation59_spill] sm:$0xff]  ;;  %v7913_v25 = vld [vmem:[#allocation56_spill] sm:$0xff] }
 0x106   :  { %7902 = vst [vmem:[#allocation79_spill] sm:$0xff] %v5144_v61  ;;  %1355 = vperm.xlu1 %3770, %v75_v40   ;;  %v7908_v61 = vld [vmem:[#allocation50_spill] sm:$0xff]  ;;  %v5172_v27 = vadd.f32 %v622_v53, %v7910_v34  ;;  %v1126_v11 = vadd.f32 %v998_v63, %v4972_v38  ;;  %v1128_v26 = vadd.f32 %v1000_v62, %v4975_v22  ;;  %v5191_v3 = vpop.permute.xlu0 %510  ;;  %v7918_v62 = vld [vmem:[#allocation25_spill] sm:$0xff] }
 0x107   :  { %v5166_v21 = vadd.f32 %v613_v13, %v7908_v61  ;;  %v5180_v0 = vadd.f32 %v624_v6, %v7911_v18  ;;  %v5183_v61 = vadd.f32 %v621_v24, %v7913_v25  ;;  %v5187_v4 = vmul.f32 %v4518_v7, %v4895_v14  ;;  %v5189_v13 = vpop.permute.xlu1 %1270  ;;  %7915 = vst [vmem:[#allocation40_spill] sm:$0xff] %v5191_v3  ;;  %v7916_v22 = vld [vmem:[#allocation58_spill] sm:$0xff]  ;;  %v1756_v24 = vld [vmem:[%s7608_s4 + $0xb8] sm:$0xff] }
 0x108   :  { %v1125_v46 = vadd.f32 %v997_v58, %v4990_v20  ;;  %v1127_v38 = vadd.f32 %v999_v1, %v4999_v2  ;;  %v5196_v53 = vadd.f32 %v623_v31, %v7916_v22  ;;  %v630_v50 = vmul.f32 %v4529_v48, %v4895_v14  ;;  %1882 = vperm.xlu0 %3784, %v1756_v24  }
 0x109   :  { %7912 = vst [vmem:[#allocation80_spill] sm:$0xff] %v5180_v0  ;;  %7914 = vst [vmem:[#allocation38_spill] sm:$0xff] %v5183_v61  ;;  %v5205_v6 = vmul.f32 %v4520_v5, %v4895_v14  ;;  %v632_v40 = vmul.f32 %v4531_v16, %v4895_v14  ;;  %v1006_v58 = vmul.f32 %v7896_v47, %v4908_v52  ;;  %v7921_v5 = vld [vmem:[#allocation7_spill] sm:$0xff] }
 0x10a   :  { %7917 = vst [vmem:[#allocation37_spill] sm:$0xff] %v5196_v53  ;;  %v1008_v1 = vmul.f32 %v7897_v41, %v4908_v52  ;;  %v1013_v20 = vmul.f32 %v7899_v12, %v5082_v19  ;;  %v1014_v2 = vmul.f32 %v7896_v47, %v5082_v19  ;;  %v1016_v31 = vmul.f32 %v7897_v41, %v5082_v19 }
 0x10b   :  { %1360 = vperm.xlu1 %3770, %v76_v33   ;;  %v1005_v63 = vmul.f32 %v7899_v12, %v4908_v52  ;;  %v1007_v14 = vmul.f32 %v7900_v57, %v4908_v52  ;;  %v5224_v42 = vadd.f32 %v7918_v62, %v1126_v11  ;;  %v5227_v34 = vadd.f32 %v7918_v62, %v1128_v26  ;;  %v5233_v33 = vpop.permute.xlu0 %518  ;;  %v863_v3 = vpop.permute.xlu1 %862 }
 0x10c   :  { %v1010_v18 = vmul.f32 %v7896_v47, %v4963_v49  ;;  %v1012_v25 = vmul.f32 %v7897_v41, %v4963_v49  ;;  %7919 = vst [vmem:[#allocation39_spill] sm:$0xff] %v5233_v33  ;;  %v5236_v22 = vadd.f32 %v7918_v62, %v1125_v46  ;;  %v5239_v52 = vadd.f32 %v7918_v62, %v1127_v38  ;;  %v1758_v46 = vld [vmem:[%s7608_s4 + $0xc8] sm:$0xff] }
 0x10d   :  { %v1009_v11 = vmul.f32 %v7899_v12, %v4963_v49  ;;  %v1011_v26 = vmul.f32 %v7900_v57, %v4963_v49  ;;  %v1015_v24 = vmul.f32 %v7900_v57, %v5082_v19  ;;  %v1134_v16 = vadd.f32 %v1006_v58, %v4880_v59  ;;  %1892 = vperm.xlu0 %3784, %v1758_v46   ;;  %v7935_v59 = vld [vmem:[#allocation82_spill] sm:$0xff]  ;;  %v7950_v0 = vld [vmem:[#allocation79_spill] sm:$0xff] }
 0x10e   :  { %v1136_v38 = vadd.f32 %v1008_v1, %v4889_v29  ;;  %v1142_v62 = vadd.f32 %v1014_v2, %v4911_v54  ;;  %v1144_v33 = vadd.f32 %v1016_v31, %v4914_v17  ;;  %v1141_v49 = vadd.f32 %v1013_v20, %v4917_v55  ;;  %v7934_v54 = vld [vmem:[#allocation81_spill] sm:$0xff] }
 0x10f   :  { %3771 = vset.pattern.permute.xlu1 %v7790_v32  ;;  %v5258_v19 = vmul.f32 %v4518_v7, %v4946_v60  ;;  %v1133_v58 = vadd.f32 %v1005_v63, %v4901_v44  ;;  %v1135_v48 = vadd.f32 %v1007_v14, %v4904_v51  ;;  %v5264_v53 = vpop.permute.xlu0 %526  ;;  %v1138_v17 = vadd.f32 %v1010_v18, %v5007_v56  ;;  %v7923_v44 = vld [vmem:[#allocation63_spill] sm:$0xff]  ;;  %v1760_v51 = vld [vmem:[%s7608_s4 + $0xd8] sm:$0xff]  ;;  %v5279_v31 = vpop.permute.xlu1 %1280  ;;  %v7925_v63 = vld [vmem:[#allocation26_spill] sm:$0xff] }
 0x110   :  { %514 = vperm.xlu1 %3771, %v7921_v5   ;;  %7922 = vst [vmem:[#allocation49_spill] sm:$0xff] %v5264_v53  ;;  %v1140_v55 = vadd.f32 %v1012_v25, %v5032_v23  ;;  %v1137_v1 = vadd.f32 %v1009_v11, %v5035_v15  ;;  %v1139_v5 = vadd.f32 %v1011_v26, %v5038_v35  ;;  %v7936_v53 = vld [vmem:[#allocation83_spill] sm:$0xff]  ;;  %v7937_v7 = vld [vmem:[#allocation84_spill] sm:$0xff] }
 0x111   :  { %7920 = vst [vmem:[#allocation47_spill] sm:$0xff] %v5258_v19  ;;  %v1143_v20 = vadd.f32 %v1015_v24, %v4934_v9  ;;  %v5274_v2 = vadd.f32 %v630_v50, %v7923_v44  ;;  %v1422_v56 = vadd.f32 %v5135_v43, %v1134_v16  ;;  %v5283_v23 = vadd.f32 %v7925_v63, %v1142_v62  ;;  %v7926_v16 = vld [vmem:[#allocation8_spill] sm:$0xff]  ;;  %v7928_v24 = vld [vmem:[#allocation65_spill] sm:$0xff] }
 0x112   :  { %v5286_v15 = vadd.f32 %v7925_v63, %v1144_v33  ;;  %v5289_v35 = vadd.f32 %v7925_v63, %v1141_v49  ;;  %v1426_v9 = vadd.f32 %v5189_v13, %v1138_v17  ;;  %v1424_v50 = vadd.f32 %v5135_v43, %v1136_v38  ;;  %1902 = vperm.xlu0 %3784, %v1760_v51   ;;  %v7930_v49 = vld [vmem:[#allocation62_spill] sm:$0xff] }
 0x113   :  { %7924 = vst [vmem:[#allocation46_spill] sm:$0xff] %v5274_v2  ;;  %v1428_v14 = vadd.f32 %v5189_v13, %v1140_v55  ;;  %v1425_v18 = vadd.f32 %v5189_v13, %v1137_v1  ;;  %v5297_v25 = vpop.permute.xlu0 %534  ;;  %v1421_v11 = vadd.f32 %v5135_v43, %v1133_v58  ;;  %v1423_v26 = vadd.f32 %v5135_v43, %v1135_v48  ;;  %v7932_v55 = vld [vmem:[#allocation64_spill] sm:$0xff]  ;;  %v77_v48 = vld [vmem:[%s7606_s2 + $0xb0] sm:$0xff] }
 0x114   :  { %3772 = vset.pattern.permute.xlu1 %v7801_v28  ;;  %7927 = vst [vmem:[#allocation48_spill] sm:$0xff] %v5297_v25  ;;  %v5303_v46 = vadd.f32 %v632_v40, %v7928_v24  ;;  %v1427_v38 = vadd.f32 %v5189_v13, %v1139_v5  ;;  %v5307_v62 = vadd.f32 %v7925_v63, %v1143_v20  ;;  %v1550_v43 = vmax.f32 %v1422_v56, 0.0  ;;  %v867_v5 = vpop.permute.xlu1 %866 }
 0x115   :  { %930 = vperm.xlu1 %3772, %v7926_v16   ;;  %v5311_v17 = vadd.f32 %v5187_v4, %v7930_v49  ;;  %v5315_v1 = vadd.f32 %v5205_v6, %v7932_v55  ;;  %v1762_v4 = vld [vmem:[%s7608_s4 + $0xe8] sm:$0xff]  ;;  %v1554_v20 = vmax.f32 %v1426_v9, 0.0  ;;  %v1552_v44 = vmax.f32 %v1424_v50, 0.0 }
 0x116   :  { %7929 = vst [vmem:[#allocation51_spill] sm:$0xff] %v5303_v46  ;;  %v1556_v6 = vmax.f32 %v1428_v14, 0.0  ;;  %v1553_v51 = vmax.f32 %v1425_v18, 0.0  ;;  %v5327_v63 = vmul.f32 %v7899_v12, %v863_v3  ;;  %v5330_v56 = vmul.f32 %v7896_v47, %v863_v3  ;;  %1912 = vperm.xlu0 %3784, %v1762_v4   ;;  %v78_v18 = vld [vmem:[%s7606_s2 + $0xb8] sm:$0xff] }
 0x117   :  { %7931 = vst [vmem:[#allocation53_spill] sm:$0xff] %v5311_v17  ;;  %7933 = vst [vmem:[#allocation50_spill] sm:$0xff] %v5315_v1  ;;  %v1549_v16 = vmax.f32 %v1421_v11, 0.0  ;;  %v1551_v24 = vmax.f32 %v1423_v26, 0.0  ;;  %v5334_v49 = vmul.f32 %v7900_v57, %v863_v3  ;;  %v1028_v55 = vmul.f32 %v7897_v41, %v863_v3  ;;  %v839_v50 = vpop.permute.xlu0 %838  ;;  %v1764_v4 = vld [vmem:[%s7608_s4 + $0xf8] sm:$0xff]  ;;  %v7943_v17 = vld [vmem:[#allocation91_spill] sm:$0xff] }
 0x118   :  { %v1030_v9 = vmul.f32 %v7896_v47, %v867_v5  ;;  %v1555_v14 = vmax.f32 %v1427_v38, 0.0  ;;  %v1002_v58 = vmul.f32 %v7896_v47, %v839_v50  ;;  %v1004_v11 = vmul.f32 %v7897_v41, %v839_v50  ;;  %v5355_v33 = vpop.permute.xlu1 %1285 }
 0x119   :  { %3773 = vset.pattern.permute.xlu1 %v7792_v10  ;;  %v1001_v26 = vmul.f32 %v7899_v12, %v839_v50  ;;  %v1003_v13 = vmul.f32 %v7900_v57, %v839_v50  ;;  %v1032_v3 = vmul.f32 %v7897_v41, %v867_v5  ;;  %v5346_v40 = vpack.c.bf16 %v1554_v20, %v1550_v43 }
 0x11a   :  { %1365 = vperm.xlu1 %3773, %v77_v48   ;;  %v5348_v48 = vpack.c.bf16 %v1556_v6, %v1552_v44  ;;  %v5350_v38 = vpack.c.bf16 %v1553_v51, %v1549_v16  ;;  %v1130_v29 = vadd.f32 %v1002_v58, %v7934_v54  ;;  %v1132_v25 = vadd.f32 %v1004_v11, %v7935_v59  ;;  %v7938_v51 = vld [vmem:[#allocation90_spill] sm:$0xff]  ;;  %v7941_v11 = vld [vmem:[#allocation67_spill] sm:$0xff] }
 0x11b   :  { %v1129_v50 = vadd.f32 %v1001_v26, %v7936_v53  ;;  %v1131_v19 = vadd.f32 %v1003_v13, %v7937_v7  ;;  %v1029_v43 = vmul.f32 %v7899_v12, %v867_v5  ;;  %v1031_v20 = vmul.f32 %v7900_v57, %v867_v5  ;;  %v855_v44 = vpop.permute.xlu0 %854  ;;  %1922 = vperm.xlu0 %3784, %v1764_v4   ;;  %v7939_v7 = vld [vmem:[#allocation97_spill] sm:$0xff] }
 0x11c   :  { %v5363_v6 = vpack.c.bf16 %v1555_v14, %v1551_v24  ;;  %v1158_v16 = vadd.f32 %v1030_v9, %v7938_v51  ;;  %v1017_v60 = vmul.f32 %v7899_v12, %v855_v44  ;;  %v1018_v54 = vmul.f32 %v7896_v47, %v855_v44  ;;  %v5374_v14 = vpop.permute.xlu1 %1290  ;;  %v7940_v9 = vld [vmem:[#allocation61_spill] sm:$0xff]  ;;  %v7942_v51 = vld [vmem:[#allocation43_spill] sm:$0xff] }
 0x11d   :  { %v1019_v59 = vmul.f32 %v7900_v57, %v855_v44  ;;  %v1020_v53 = vmul.f32 %v7897_v41, %v855_v44  ;;  %v1418_v13 = vadd.f32 %v7939_v7, %v1130_v29  ;;  %v1420_v58 = vadd.f32 %v7939_v7, %v1132_v25 }
 0x11e   :  { %1370 = vperm.xlu1 %3773, %v78_v18   ;;  %v1417_v5 = vadd.f32 %v7939_v7, %v1129_v50  ;;  %v1419_v24 = vadd.f32 %v7939_v7, %v1131_v19  ;;  %v1146_v18 = vadd.f32 %v1018_v54, %v7940_v9  ;;  %v1145_v1 = vadd.f32 %v1017_v60, %v7942_v51  ;;  %v4041_v54 = vld [vmem:[%s7605_s1 + $0xd8] sm:$0xff] }
 0x11f   :  { %v1148_v26 = vadd.f32 %v1020_v53, %v7941_v11  ;;  %v1160_v46 = vadd.f32 %v1032_v3, %v7943_v17  ;;  %v859_v4 = vpop.permute.xlu0 %858  ;;  %v1546_v29 = vmax.f32 %v1418_v13, 0.0  ;;  %v1548_v44 = vmax.f32 %v1420_v58, 0.0  ;;  %v7944_v53 = vld [vmem:[#allocation55_spill] sm:$0xff]  ;;  %v7945_v7 = vld [vmem:[#allocation92_spill] sm:$0xff] }
 0x120   :  { %v1545_v25 = vmax.f32 %v1417_v5, 0.0  ;;  %v1547_v2 = vmax.f32 %v1419_v24, 0.0  ;;  %v1022_v50 = vmul.f32 %v7896_v47, %v859_v4  ;;  %v1024_v19 = vmul.f32 %v7897_v41, %v859_v4 }
 0x121   :  { %v1147_v60 = vadd.f32 %v1019_v59, %v7944_v53  ;;  %v1157_v17 = vadd.f32 %v1029_v43, %v7945_v7  ;;  %v7946_v3 = vmax.f32 %v5224_v42, 0.0  ;;  %v7947_v13 = vmax.f32 %v5227_v34, 0.0  ;;  %v879_v42 = vpop.permute.xlu1 %878 }
 0x122   :  { %3774 = vset.pattern.permute.xlu1 %v7790_v32  ;;  %v7948_v5 = vmax.f32 %v5236_v22, 0.0  ;;  %v7949_v11 = vmax.f32 %v5239_v52, 0.0  ;;  %v1434_v61 = vadd.f32 %v5279_v31, %v1146_v18  ;;  %v1154_v59 = vadd.f32 %v5330_v56, %v7950_v0  ;;  %v7951_v52 = vld [vmem:[#allocation85_spill] sm:$0xff]  ;;  %v7953_v56 = vld [vmem:[#allocation94_spill] sm:$0xff] }
 0x123   :  { %522 = vperm.xlu1 %3774, %v4041_v54   ;;  %v3608_v9 = vpack.c.bf16 %v1546_v29, %v7946_v3  ;;  %v3672_v58 = vpack.c.bf16 %v1548_v44, %v7947_v13  ;;  %v1436_v54 = vadd.f32 %v5279_v31, %v1148_v26  ;;  %v1156_v43 = vadd.f32 %v1028_v55, %v5151_v45  ;;  %v5401_v34 = vpop.permute.xlu0 %870  ;;  %v7952_v44 = vld [vmem:[#allocation86_spill] sm:$0xff] }
 0x124   :  { %v3610_v24 = vpack.c.bf16 %v1545_v25, %v7948_v5  ;;  %v3674_v51 = vpack.c.bf16 %v1547_v2, %v7949_v11  ;;  %v1433_v22 = vadd.f32 %v5279_v31, %v1145_v1  ;;  %v1559_v29 = vmax.f32 %v5307_v62, 0.0  ;;  %v7954_v1 = vld [vmem:[#allocation27_spill] sm:$0xff]  ;;  %v79_v5 = vld [vmem:[%s7606_s2 + $0xc0] sm:$0xff] }
 0x125   :  { %3609 = vmatprep.subr.bf16.mxu0 %v3608_v9  ;;  %3673 = vmatprep.subr.bf16.mxu1 %v3672_v58  ;;  %v1150_v2 = vadd.f32 %v1022_v50, %v7951_v52  ;;  %v1152_v18 = vadd.f32 %v1024_v19, %v7952_v44  ;;  %v1435_v26 = vadd.f32 %v5279_v31, %v1147_v60  ;;  %v7955_v9 = vmax.f32 %v5283_v23, 0.0  ;;  %v7959_v52 = vld [vmem:[#allocation89_spill] sm:$0xff] }
 0x126   :  { %3611 = vmatpush1.bf16.msra.mxu0 %v3610_v24  ;;  %v1153_v0 = vadd.f32 %v5327_v63, %v5154_v30  ;;  %v1155_v45 = vadd.f32 %v5334_v49, %v5157_v36  ;;  %v1159_v55 = vadd.f32 %v1031_v20, %v7953_v56  ;;  %v1021_v25 = vmul.f32 %v7899_v12, %v859_v4 }
 0x127   :  { %3675 = vmatpush1.bf16.msra.mxu1 %v3674_v51  ;;  %v5415_v62 = vadd.f32 %v7954_v1, %v1158_v16  ;;  %v5418_v50 = vadd.f32 %v7954_v1, %v1160_v46  ;;  %v5421_v19 = vadd.f32 %v7954_v1, %v1157_v17  ;;  %v1023_v31 = vmul.f32 %v7900_v57, %v859_v4  ;;  %v4042_v46 = vld [vmem:[%s7605_s1 + $0xd0] sm:$0xff]  ;;  %v875_v3 = vpop.permute.xlu0 %874 }
 0x128   :  { %3775 = vset.pattern.permute.xlu1 %v7801_v28  ;;  %3613 = vmatprep.subr.bf16.mxu0 %v5346_v40  ;;  %v1562_v30 = vmax.f32 %v1434_v61, 0.0  ;;  %v1564_v36 = vmax.f32 %v1436_v54, 0.0  ;;  %v1442_v63 = vadd.f32 %v5374_v14, %v1154_v59  ;;  %v1561_v49 = vmax.f32 %v1433_v22, 0.0  ;;  %v7957_v54 = vld [vmem:[#allocation88_spill] sm:$0xff] }
 0x129   :  { %3677 = vmatprep.subr.bf16.mxu1 %v5348_v48  ;;  %938 = vperm.xlu1 %3775, %v4042_v46   ;;  %v1438_v20 = vadd.f32 %v5355_v33, %v1150_v2  ;;  %v1440_v16 = vadd.f32 %v5355_v33, %v1152_v18  ;;  %v1444_v4 = vadd.f32 %v5374_v14, %v1156_v43  ;;  %v5441_v48 = vpop.permute.xlu1 %1300  ;;  %v1563_v53 = vmax.f32 %v1435_v26, 0.0 }
 0x12a   :  { %v5435_v40 = vmul.f32 %v7899_v12, %v879_v42  ;;  %v5438_v61 = vmul.f32 %v7896_v47, %v879_v42  ;;  %3615 = vmatpush1.bf16.msra.mxu0 %v5350_v38  ;;  %v5444_v60 = vadd.f32 %v7954_v1, %v1159_v55  ;;  %v5447_v7 = vmul.f32 %v7900_v57, %v879_v42 }
 0x12b   :  { %v1034_v17 = vmul.f32 %v7896_v47, %v5401_v34  ;;  %3679 = vmatpush1.bf16.msra.mxu1 %v5363_v6  ;;  %v3616_v13 = vpack.c.bf16 %v1562_v30, %v7955_v9  ;;  %v7956_v38 = vmax.f32 %v5286_v15, 0.0  ;;  %v1566_v24 = vmax.f32 %v1438_v20, 0.0 }
 0x12c   :  { %v1570_v11 = vmax.f32 %v1442_v63, 0.0  ;;  %v1568_v51 = vmax.f32 %v1440_v16, 0.0  ;;  %v1149_v59 = vadd.f32 %v1021_v25, %v7957_v54  ;;  %v7958_v43 = vmax.f32 %v5289_v35, 0.0 }
 0x12d   :  { %v3680_v58 = vpack.c.bf16 %v1564_v36, %v7956_v38  ;;  %3617 = vmatprep.subr.bf16.mxu0 %v3616_v13  ;;  %v1572_v22 = vmax.f32 %v1444_v4, 0.0  ;;  %v1441_v23 = vadd.f32 %v5374_v14, %v1153_v0  ;;  %v1151_v15 = vadd.f32 %v1023_v31, %v7959_v52  ;;  %3776 = vset.pattern.permute.xlu1 %v7792_v10  ;;  %v5469_v55 = vpop.permute.xlu1 %882  ;;  %v5482_v31 = vpop.permute.xlu0 %886 }
 0x12e   :  { %v3618_v6 = vpack.c.bf16 %v1561_v49, %v7958_v43  ;;  %v1044_v2 = vmul.f32 %v7897_v41, %v879_v42  ;;  %v1036_v44 = vmul.f32 %v7897_v41, %v5401_v34  ;;  %v3682_v18 = vpack.c.bf16 %v1563_v53, %v1559_v29  ;;  %1375 = vperm.xlu1 %3776, %v79_v5  }
 0x12f   :  { %3681 = vmatprep.subr.bf16.mxu1 %v3680_v58  ;;  %v1443_v26 = vadd.f32 %v5374_v14, %v1155_v45  ;;  %v3620_v56 = vpack.c.bf16 %v1570_v11, %v1566_v24  ;;  %v3684_v35 = vpack.c.bf16 %v1572_v22, %v1568_v51  ;;  %v1437_v0 = vadd.f32 %v5355_v33, %v1149_v59  ;;  %v80_v45 = vld [vmem:[%s7606_s2 + $0xc8] sm:$0xff]  ;;  %v7960_v51 = vld [vmem:[#allocation95_spill] sm:$0xff] }
 0x130   :  { %3619 = vmatpush1.bf16.msra.mxu0 %v3618_v6  ;;  %v1574_v25 = vmax.f32 %v5415_v62, 0.0  ;;  %v1033_v42 = vmul.f32 %v7899_v12, %v5401_v34  ;;  %v1035_v1 = vmul.f32 %v7900_v57, %v5401_v34  ;;  %v1037_v29 = vmul.f32 %v7899_v12, %v875_v3  ;;  %3683 = vmatpush1.bf16.msra.mxu1 %v3682_v18  ;;  %v4043_v6 = vld [vmem:[%s7605_s1 + $0xe8] sm:$0xff] }
 0x131   :  { %v1038_v14 = vmul.f32 %v7896_v47, %v875_v3  ;;  %3621 = vmatprep.subr.bf16.mxu0 %v3620_v56  ;;  %3685 = vmatprep.subr.bf16.mxu1 %v3684_v35  ;;  %v1565_v62 = vmax.f32 %v1437_v0, 0.0  ;;  %v1569_v30 = vmax.f32 %v1441_v23, 0.0  ;;  %v1439_v36 = vadd.f32 %v5355_v33, %v1151_v15  ;;  %v1306_v33 = vpop.permute.xlu1 %1305  ;;  %v7961_v23 = vld [vmem:[#allocation96_spill] sm:$0xff]  ;;  %v7963_v35 = vld [vmem:[#allocation5_spill] sm:$0xff] }
 0x132   :  { %v1162_v63 = vadd.f32 %v1034_v17, %v5160_v8  ;;  %v1039_v34 = vmul.f32 %v7900_v57, %v875_v3  ;;  %v1040_v46 = vmul.f32 %v7897_v41, %v875_v3  ;;  %v1571_v49 = vmax.f32 %v1443_v26, 0.0  ;;  %1380 = vperm.xlu1 %3776, %v80_v45   ;;  %v7962_v15 = vld [vmem:[#allocation80_spill] sm:$0xff] }
 0x133   :  { %v1576_v20 = vmax.f32 %v5418_v50, 0.0  ;;  %v3622_v16 = vpack.c.bf16 %v1569_v30, %v1565_v62  ;;  %v1567_v4 = vmax.f32 %v1439_v36, 0.0  ;;  %v1164_v9 = vadd.f32 %v1036_v44, %v5163_v37 }
 0x134   :  { %v1450_v53 = vadd.f32 %v5441_v48, %v1162_v63  ;;  %v5493_v13 = vmul.f32 %v7899_v12, %v5482_v31  ;;  %v5497_v8 = vmul.f32 %v7896_v47, %v5482_v31  ;;  %v1161_v17 = vadd.f32 %v1033_v42, %v5166_v21 }
 0x135   :  { %v1163_v50 = vadd.f32 %v1035_v1, %v5169_v39  ;;  %v5503_v3 = vmul.f32 %v7897_v41, %v5482_v31  ;;  %3623 = vmatpush1.bf16.msra.mxu0 %v3622_v16  ;;  %v3686_v38 = vpack.c.bf16 %v1571_v49, %v1567_v4  ;;  %v1452_v58 = vadd.f32 %v5441_v48, %v1164_v9  ;;  %v1311_v22 = vpop.permute.xlu1 %1310  ;;  %v7966_v4 = vld [vmem:[#allocation54_spill] sm:$0xff] }
 0x136   :  { %v1578_v37 = vmax.f32 %v1450_v53, 0.0  ;;  %v1046_v5 = vmul.f32 %v7896_v47, %v5469_v55  ;;  %v1573_v24 = vmax.f32 %v5421_v19, 0.0  ;;  %v1575_v11 = vmax.f32 %v5444_v60, 0.0  ;;  %3777 = vset.pattern.permute.xlu1 %v7790_v32 }
 0x137   :  { %v1166_v21 = vadd.f32 %v1038_v14, %v7960_v51  ;;  %3687 = vmatpush1.bf16.msra.mxu1 %v3686_v38  ;;  %v1580_v54 = vmax.f32 %v1452_v58, 0.0  ;;  %v1449_v59 = vadd.f32 %v5441_v48, %v1161_v17  ;;  %v1451_v43 = vadd.f32 %v5441_v48, %v1163_v50  ;;  %530 = vperm.xlu1 %3777, %v4043_v6   ;;  %v4044_v17 = vld [vmem:[%s7605_s1 + $0xe0] sm:$0xff]  ;;  %v7968_v51 = vld [vmem:[#allocation46_spill] sm:$0xff] }
 0x138   :  { %v3624_v39 = vpack.c.bf16 %v1578_v37, %v1574_v25  ;;  %v1170_v19 = vadd.f32 %v5438_v61, %v5172_v27  ;;  %v1168_v52 = vadd.f32 %v1040_v46, %v7961_v23  ;;  %v1172_v44 = vadd.f32 %v1044_v2, %v7962_v15  ;;  %v7964_v61 = vld [vmem:[#allocation38_spill] sm:$0xff]  ;;  %v7967_v38 = vld [vmem:[#allocation37_spill] sm:$0xff] }
 0x139   :  { %v1454_v60 = vadd.f32 %v1306_v33, %v1166_v21  ;;  %v3688_v18 = vpack.c.bf16 %v1580_v54, %v1576_v20  ;;  %v1577_v26 = vmax.f32 %v1449_v59, 0.0  ;;  %v1579_v56 = vmax.f32 %v1451_v43, 0.0  ;;  %v5529_v63 = vpop.permute.xlu1 %894  ;;  %v7965_v20 = vld [vmem:[#allocation60_spill] sm:$0xff]  ;;  %v7970_v54 = vld [vmem:[#allocation45_spill] sm:$0xff] }
 0x13a   :  { %3625 = vmatprep.subr.bf16.mxu0 %v3624_v39  ;;  %v1165_v48 = vadd.f32 %v1037_v29, %v7963_v35  ;;  %v1045_v0 = vmul.f32 %v7899_v12, %v5469_v55  ;;  %v1458_v25 = vadd.f32 %v1311_v22, %v1170_v19  ;;  %v1456_v42 = vadd.f32 %v1306_v33, %v1168_v52  ;;  %v7969_v21 = vld [vmem:[#allocation28_spill] sm:$0xff]  ;;  %v7972_v19 = vld [vmem:[#allocation66_spill] sm:$0xff] }
 0x13b   :  { %v1460_v1 = vadd.f32 %v1311_v22, %v1172_v44  ;;  %3689 = vmatprep.subr.bf16.mxu1 %v3688_v18  ;;  %v3626_v14 = vpack.c.bf16 %v1577_v26, %v1573_v24  ;;  %v3690_v27 = vpack.c.bf16 %v1579_v56, %v1575_v11  ;;  %v1169_v45 = vadd.f32 %v5435_v40, %v7964_v61 }
 0x13c   :  { %v1453_v62 = vadd.f32 %v1306_v33, %v1165_v48  ;;  %v1048_v2 = vmul.f32 %v7897_v41, %v5469_v55  ;;  %3778 = vset.pattern.permute.xlu1 %v7801_v28  ;;  %v1582_v30 = vmax.f32 %v1454_v60, 0.0  ;;  %v1586_v29 = vmax.f32 %v1458_v25, 0.0 }
 0x13d   :  { %v1588_v36 = vmax.f32 %v1460_v1, 0.0  ;;  %3627 = vmatpush1.bf16.msra.mxu0 %v3626_v14  ;;  %3691 = vmatpush1.bf16.msra.mxu1 %v3690_v27  ;;  %v1584_v46 = vmax.f32 %v1456_v42, 0.0  ;;  %v1457_v49 = vadd.f32 %v1311_v22, %v1169_v45  ;;  %v1167_v16 = vadd.f32 %v1039_v34, %v7965_v20  ;;  %v891_v42 = vpop.permute.xlu0 %890  ;;  %v7976_v45 = vld [vmem:[#allocation87_spill] sm:$0xff] }
 0x13e   :  { %v1174_v53 = vadd.f32 %v1046_v5, %v7966_v4  ;;  %v1051_v40 = vmul.f32 %v7900_v57, %v5482_v31  ;;  %v1047_v9 = vmul.f32 %v7900_v57, %v5469_v55  ;;  %946 = vperm.xlu1 %3778, %v4044_v17   ;;  %v1581_v50 = vmax.f32 %v1453_v62, 0.0  ;;  %v81_v31 = vld [vmem:[%s7606_s2 + $0xd0] sm:$0xff] }
 0x13f   :  { %v1171_v37 = vadd.f32 %v5447_v7, %v7967_v38  ;;  %v3628_v58 = vpack.c.bf16 %v1586_v29, %v1582_v30  ;;  %v3692_v24 = vpack.c.bf16 %v1588_v36, %v1584_v46  ;;  %v1585_v34 = vmax.f32 %v1457_v49, 0.0  ;;  %v7971_v7 = vld [vmem:[#allocation51_spill] sm:$0xff]  ;;  %v7978_v30 = vld [vmem:[#allocation34_spill] sm:$0xff]  ;;  %v7979_v38 = vld [vmem:[#allocation36_spill] sm:$0xff] }
 0x140   :  { %v1455_v11 = vadd.f32 %v1306_v33, %v1167_v16  ;;  %v1178_v55 = vadd.f32 %v5497_v8, %v7968_v51  ;;  %v1462_v39 = vadd.f32 %v7969_v21, %v1174_v53  ;;  %v1176_v59 = vadd.f32 %v1048_v2, %v7970_v54  ;;  %v7973_v8 = vld [vmem:[#allocation53_spill] sm:$0xff]  ;;  %v7977_v62 = vld [vmem:[#allocation35_spill] sm:$0xff]  ;;  %v7981_v51 = vld [vmem:[#allocation42_spill] sm:$0xff] }
 0x141   :  { %v1459_v5 = vadd.f32 %v1311_v22, %v1171_v37  ;;  %3629 = vmatprep.subr.bf16.mxu0 %v3628_v58  ;;  %3693 = vmatprep.subr.bf16.mxu1 %v3692_v24  ;;  %v3630_v43 = vpack.c.bf16 %v1585_v34, %v1581_v50  ;;  %v1180_v6 = vadd.f32 %v5503_v3, %v7971_v7  ;;  %v1321_v22 = vpop.permute.xlu1 %1320  ;;  %v82_v3 = vld [vmem:[%s7606_s2 + $0xd8] sm:$0xff] }
 0x142   :  { %v1173_v33 = vadd.f32 %v1045_v0, %v7972_v19  ;;  %3779 = vset.pattern.permute.xlu1 %v7792_v10  ;;  %v1583_v60 = vmax.f32 %v1455_v11, 0.0  ;;  %v1464_v52 = vadd.f32 %v7969_v21, %v1176_v59  ;;  %v1177_v15 = vadd.f32 %v5493_v13, %v7973_v8  ;;  %v7974_v0 = vld [vmem:[#allocation71_spill] sm:$0xff]  ;;  %v7975_v13 = vld [vmem:[#allocation50_spill] sm:$0xff] }
 0x143   :  { %v1587_v23 = vmax.f32 %v1459_v5, 0.0  ;;  %1385 = vperm.xlu1 %3779, %v81_v31   ;;  %3631 = vmatpush1.bf16.msra.mxu0 %v3630_v43  ;;  %v1466_v44 = vadd.f32 %v1321_v22, %v1178_v55  ;;  %v1468_v18 = vadd.f32 %v1321_v22, %v1180_v6  ;;  %v1590_v35 = vmax.f32 %v1462_v39, 0.0  ;;  %v7980_v5 = vld [vmem:[#allocation76_spill] sm:$0xff]  ;;  %v7983_v39 = vld [vmem:[#allocation69_spill] sm:$0xff] }
 0x144   :  { %v1461_v26 = vadd.f32 %v7969_v21, %v1173_v33  ;;  %v1465_v48 = vadd.f32 %v1321_v22, %v1177_v15  ;;  %v1175_v25 = vadd.f32 %v1047_v9, %v7974_v0  ;;  %v1592_v14 = vmax.f32 %v1464_v52, 0.0  ;;  %v4045_v6 = vld [vmem:[%s7605_s1 + $0xf8] sm:$0xff]  ;;  %v7984_v33 = vld [vmem:[#allocation6_spill] sm:$0xff]  ;;  %v7986_v15 = vld [vmem:[#allocation73_spill] sm:$0xff] }
 0x145   :  { %v3694_v56 = vpack.c.bf16 %v1587_v23, %v1583_v60  ;;  %v1594_v1 = vmax.f32 %v1466_v44, 0.0  ;;  %v1596_v27 = vmax.f32 %v1468_v18, 0.0  ;;  %v1179_v61 = vadd.f32 %v1051_v40, %v7975_v13  ;;  %v5567_v49 = vpop.permute.xlu1 %898  ;;  %v7985_v23 = vld [vmem:[#allocation68_spill] sm:$0xff] }
 0x146   :  { %v638_v2 = vmul.f32 %v7977_v62, %v7976_v45  ;;  %v639_v29 = vmul.f32 %v7978_v30, %v7976_v45  ;;  %v1593_v36 = vmax.f32 %v1465_v48, 0.0  ;;  %v1463_v46 = vadd.f32 %v7969_v21, %v1175_v25  ;;  %v7982_v21 = vld [vmem:[#allocation77_spill] sm:$0xff] }
 0x147   :  { %3695 = vmatpush1.bf16.msra.mxu1 %v3694_v56  ;;  %1390 = vperm.xlu1 %3779, %v82_v3   ;;  %v3632_v20 = vpack.c.bf16 %v1594_v1, %v1590_v35  ;;  %v3696_v16 = vpack.c.bf16 %v1596_v27, %v1592_v14  ;;  %v1589_v4 = vmax.f32 %v1461_v26, 0.0  ;;  %v1467_v53 = vadd.f32 %v1321_v22, %v1179_v61  ;;  %v7989_v26 = vld [vmem:[#allocation47_spill] sm:$0xff]  ;;  %v7990_v3 = vld [vmem:[#allocation74_spill] sm:$0xff] }
 0x148   :  { %v1053_v9 = vmul.f32 %v7899_v12, %v891_v42  ;;  %v1054_v40 = vmul.f32 %v7896_v47, %v891_v42  ;;  %v1055_v17 = vmul.f32 %v7900_v57, %v891_v42  ;;  %v1056_v50 = vmul.f32 %v7897_v41, %v891_v42 }
 0x149   :  { %v640_v37 = vmul.f32 %v7979_v38, %v7976_v45  ;;  %3633 = vmatprep.subr.bf16.mxu0 %v3632_v20  ;;  %3697 = vmatprep.subr.bf16.mxu1 %v3696_v16  ;;  %v3634_v58 = vpack.c.bf16 %v1593_v36, %v1589_v4  ;;  %v1591_v24 = vmax.f32 %v1463_v46, 0.0  ;;  %v1595_v34 = vmax.f32 %v1467_v53, 0.0  ;;  %v1326_v19 = vpop.permute.xlu1 %1325  ;;  %v4046_v45 = vld [vmem:[%s7605_s1 + $0xf0] sm:$0xff] }
 0x14a   :  { %v1057_v11 = vmul.f32 %v7899_v12, %v5529_v63  ;;  %v1058_v31 = vmul.f32 %v7896_v47, %v5529_v63  ;;  %v761_v55 = vadd.f32 %v7981_v51, %v7980_v5  ;;  %v763_v54 = vadd.f32 %v7983_v39, %v7982_v21  ;;  %v7992_v5 = vld [vmem:[#allocation29_spill] sm:$0xff]  ;;  %v7993_v21 = vld [vmem:[#allocation30_spill] sm:$0xff] }
 0x14b   :  { %v1059_v59 = vmul.f32 %v7900_v57, %v5529_v63  ;;  %v1060_v43 = vmul.f32 %v7897_v41, %v5529_v63  ;;  %3781 = vset.pattern.permute.xlu1 %v7790_v32  ;;  %3635 = vmatpush1.bf16.msra.mxu0 %v3634_v58  ;;  %v3698_v7 = vpack.c.bf16 %v1595_v34, %v1591_v24  ;;  %v7987_v63 = vld [vmem:[#allocation75_spill] sm:$0xff]  ;;  %v7988_v32 = vld [vmem:[#allocation72_spill] sm:$0xff] }
 0x14c   :  { %538 = vperm.xlu1 %3781, %v4045_v6   ;;  %v1182_v60 = vadd.f32 %v1054_v40, %v7984_v33  ;;  %v1184_v22 = vadd.f32 %v1056_v50, %v7985_v23  ;;  %v1181_v52 = vadd.f32 %v1053_v9, %v761_v55  ;;  %v1183_v8 = vadd.f32 %v1055_v17, %v763_v54  ;;  %v83_v9 = vld [vmem:[%s7606_s2 + $0xe0] sm:$0xff]  ;;  %v84_v55 = vld [vmem:[%s7606_s2 + $0xe8] sm:$0xff] }
 0x14d   :  { %3699 = vmatpush1.bf16.msra.mxu1 %v3698_v7  ;;  %v766_v44 = vadd.f32 %v638_v2, %v7986_v15  ;;  %v768_v18 = vadd.f32 %v640_v37, %v7987_v63  ;;  %v765_v56 = vadd.f32 %v7989_v26, %v7988_v32  ;;  %v767_v35 = vadd.f32 %v639_v29, %v7990_v3  ;;  %v1331_v61 = vpop.permute.xlu1 %1330  ;;  %v7996_v7 = vld [vmem:[#allocation70_spill] sm:$0xff]  ;;  %v7997_v6 = vld [vmem:[#allocation33_spill] sm:$0xff] }
 0x14e   :  { %v1470_v48 = vadd.f32 %v1326_v19, %v1182_v60  ;;  %v1472_v0 = vadd.f32 %v1326_v19, %v1184_v22  ;;  %v1469_v25 = vadd.f32 %v1326_v19, %v1181_v52  ;;  %v1471_v42 = vadd.f32 %v1326_v19, %v1183_v8  ;;  %v7998_v22 = vld [vmem:[#allocation9_spill] sm:$0xff] }
 0x14f   :  { %v1186_v1 = vadd.f32 %v1058_v31, %v766_v44  ;;  %v1188_v14 = vadd.f32 %v1060_v43, %v768_v18  ;;  %v1185_v27 = vadd.f32 %v1057_v11, %v765_v56  ;;  %v1187_v13 = vadd.f32 %v1059_v59, %v767_v35  ;;  %v7991_v31 = vld [vmem:[#allocation10_spill] sm:$0xff]  ;;  %v7995_v59 = vld [vmem:[#allocation32_spill] sm:$0xff]  ;;  %v903_v18 = vpop.permute.xlu0 %902 }
 0x150   :  { %3782 = vset.pattern.permute.xlu1 %v7801_v28  ;;  %v1598_v20 = vmax.f32 %v1470_v48, 0.0  ;;  %v1600_v16 = vmax.f32 %v1472_v0, 0.0  ;;  %v1597_v4 = vmax.f32 %v1469_v25, 0.0  ;;  %v1599_v53 = vmax.f32 %v1471_v42, 0.0  ;;  %v86_v35 = vld [vmem:[%s7606_s2 + $0xf8] sm:$0xff]  ;;  %v7999_v48 = vld [vmem:[#allocation93_spill] sm:$0xff] }
 0x151   :  { %954 = vperm.xlu1 %3782, %v4046_v45   ;;  %v1474_v2 = vadd.f32 %v1331_v61, %v1186_v1  ;;  %v1476_v36 = vadd.f32 %v1331_v61, %v1188_v14  ;;  %v1473_v46 = vadd.f32 %v1331_v61, %v1185_v27  ;;  %v1475_v29 = vadd.f32 %v1331_v61, %v1187_v13  ;;  %v5606_v37 = vpop.permute.xlu1 %490 }
 0x152   :  { %v349_v51 = vmul.f32 %v7992_v5, %v7991_v31  ;;  %v350_v39 = vmul.f32 %v7993_v21, %v7991_v31  ;;  %v352_v43 = vmul.f32 %v7995_v59, %v7991_v31  ;;  %v641_v19 = vmul.f32 %v7997_v6, %v7996_v7 }
 0x153   :  { %v1602_v40 = vmax.f32 %v1474_v2, 0.0  ;;  %v1604_v28 = vmax.f32 %v1476_v36, 0.0  ;;  %v1601_v17 = vmax.f32 %v1473_v46, 0.0  ;;  %v1603_v50 = vmax.f32 %v1475_v29, 0.0  ;;  %v1733_v46 = vld [vmem:[%s7608_s4] sm:$0xff] }
 0x154   :  { %v642_v33 = vmul.f32 %v7977_v62, %v7996_v7  ;;  %v643_v60 = vmul.f32 %v7978_v30, %v7996_v7  ;;  %v644_v23 = vmul.f32 %v7979_v38, %v7996_v7  ;;  %v353_v52 = vmul.f32 %v7992_v5, %v7998_v22 }
 0x155   :  { %3783 = vset.pattern.permute.xlu1 %v7792_v10  ;;  %v3636_v58 = vpack.c.bf16 %v1602_v40, %v1598_v20  ;;  %v3700_v24 = vpack.c.bf16 %v1604_v28, %v1600_v16  ;;  %v3638_v34 = vpack.c.bf16 %v1601_v17, %v1597_v4  ;;  %v3702_v11 = vpack.c.bf16 %v1603_v50, %v1599_v53  ;;  %v7994_v10 = vld [vmem:[#allocation31_spill] sm:$0xff]  ;;  %v5635_v63 = vpop.permute.xlu1 %906 }
 0x156   :  { %1395 = vperm.xlu1 %3783, %v83_v9   ;;  %v351_v54 = vmul.f32 %v7994_v10, %v7991_v31  ;;  %v354_v8 = vmul.f32 %v7993_v21, %v7998_v22  ;;  %v355_v15 = vmul.f32 %v7994_v10, %v7998_v22  ;;  %v356_v44 = vmul.f32 %v7995_v59, %v7998_v22 }
 0x157   :  { %3637 = vmatprep.subr.bf16.mxu0 %v3636_v58  ;;  %3701 = vmatprep.subr.bf16.mxu1 %v3700_v24  ;;  %v1061_v32 = vmul.f32 %v7899_v12, %v5567_v49  ;;  %v1062_v26 = vmul.f32 %v7896_v47, %v5567_v49  ;;  %v1063_v56 = vmul.f32 %v7900_v57, %v5567_v49 }
 0x158   :  { %3639 = vmatpush1.bf16.msra.mxu0 %v3638_v34  ;;  %3703 = vmatpush1.bf16.msra.mxu1 %v3702_v11  ;;  %v1064_v3 = vmul.f32 %v7897_v41, %v5567_v49  ;;  %v645_v0 = vmul.f32 %v7997_v6, %v7999_v48  ;;  %v646_v25 = vmul.f32 %v7977_v62, %v7999_v48 }
 0x159   :  { %v647_v42 = vmul.f32 %v7978_v30, %v7999_v48  ;;  %v648_v1 = vmul.f32 %v7979_v38, %v7999_v48  ;;  %v770_v14 = vadd.f32 %v642_v33, %v350_v39  ;;  %v772_v27 = vadd.f32 %v644_v23, %v352_v43  ;;  %v1336_v29 = vpop.permute.xlu1 %1335  ;;  %v1735_v39 = vld [vmem:[%s7608_s4 + $0x10] sm:$0xff] }
 0x15a   :  { %1400 = vperm.xlu1 %3783, %v84_v55   ;;  %v769_v13 = vadd.f32 %v641_v19, %v349_v51  ;;  %v771_v49 = vadd.f32 %v643_v60, %v351_v54  ;;  %v1065_v61 = vmul.f32 %v7899_v12, %v903_v18  ;;  %v1066_v45 = vmul.f32 %v7896_v47, %v903_v18 }
 0x15b   :  { %v1067_v2 = vmul.f32 %v7900_v57, %v903_v18  ;;  %v1068_v36 = vmul.f32 %v7897_v41, %v903_v18  ;;  %v1190_v20 = vadd.f32 %v1062_v26, %v770_v14  ;;  %v1192_v16 = vadd.f32 %v1064_v3, %v772_v27  ;;  %v1737_v26 = vld [vmem:[%s7608_s4 + $0x20] sm:$0xff] }
 0x15c   :  { %v1189_v4 = vadd.f32 %v1061_v32, %v769_v13  ;;  %v1191_v53 = vadd.f32 %v1063_v56, %v771_v49  ;;  %v774_v9 = vadd.f32 %v646_v25, %v354_v8  ;;  %v776_v40 = vadd.f32 %v648_v1, %v356_v44  ;;  %v1670_v32 = vld [vmem:[%s7607_s3 + $0x8] sm:$0xff]  ;;  %v8000_v25 = vld [vmem:[#allocation12_spill] sm:$0xff]  ;;  %v8001_v13 = vld [vmem:[#allocation41_spill] sm:$0xff] }
 0x15d   :  { %v773_v28 = vadd.f32 %v645_v0, %v353_v52  ;;  %v775_v17 = vadd.f32 %v647_v42, %v355_v15  ;;  %v1478_v50 = vadd.f32 %v1336_v29, %v1190_v20  ;;  %v1480_v58 = vadd.f32 %v1336_v29, %v1192_v16  ;;  %v1341_v54 = vpop.permute.xlu1 %1340  ;;  %1989 = vmatprep.mubr.f32.mxu0 %v1670_v32 }
 0x15e   :  { %1410 = vperm.xlu1 %3783, %v86_v35   ;;  %v1477_v24 = vadd.f32 %v1336_v29, %v1189_v4  ;;  %v1479_v34 = vadd.f32 %v1336_v29, %v1191_v53  ;;  %v1194_v11 = vadd.f32 %v1066_v45, %v774_v9  ;;  %v1196_v31 = vadd.f32 %v1068_v36, %v776_v40  ;;  %v1739_v36 = vld [vmem:[%s7608_s4 + $0x30] sm:$0xff] }
 0x15f   :  { %v1193_v51 = vadd.f32 %v1065_v61, %v773_v28  ;;  %v1195_v55 = vadd.f32 %v1067_v2, %v775_v17  ;;  %v1606_v60 = vmax.f32 %v1478_v50, 0.0  ;;  %v1608_v23 = vmax.f32 %v1480_v58, 0.0  ;;  %2246 = vmatprep.mubr.f32.mxu1 %v1670_v32  ;;  %v911_v17 = vpop.permute.xlu0 %910 }
 0x160   :  { %v1482_v43 = vadd.f32 %v1341_v54, %v1194_v11  ;;  %v1484_v7 = vadd.f32 %v1341_v54, %v1196_v31  ;;  %v1605_v22 = vmax.f32 %v1477_v24, 0.0  ;;  %v1607_v52 = vmax.f32 %v1479_v34, 0.0 }
 0x161   :  { %v1481_v19 = vadd.f32 %v1341_v54, %v1193_v51  ;;  %v1483_v33 = vadd.f32 %v1341_v54, %v1195_v55  ;;  %v357_v42 = vmul.f32 %v7992_v5, %v8000_v25  ;;  %v358_v1 = vmul.f32 %v7993_v21, %v8000_v25 }
 0x162   :  { %1767 = vperm.xlu1 %3783, %v1733_v46   ;;  %v1610_v8 = vmax.f32 %v1482_v43, 0.0  ;;  %v1612_v15 = vmax.f32 %v1484_v7, 0.0  ;;  %v5672_v56 = vpop.permute.xlu1 %498  ;;  %v359_v14 = vmul.f32 %v7994_v10, %v8000_v25  ;;  %v360_v27 = vmul.f32 %v7995_v59, %v8000_v25  ;;  %v8002_v46 = vld [vmem:[#allocation11_spill] sm:$0xff] }
 0x163   :  { %v1609_v44 = vmax.f32 %v1481_v19, 0.0  ;;  %v1611_v18 = vmax.f32 %v1483_v33, 0.0  ;;  %v649_v49 = vmul.f32 %v7997_v6, %v8001_v13  ;;  %v650_v61 = vmul.f32 %v7977_v62, %v8001_v13 }
 0x164   :  { %v3640_v3 = vpack.c.bf16 %v1610_v8, %v1606_v60  ;;  %v3704_v35 = vpack.c.bf16 %v1612_v15, %v1608_v23  ;;  %v651_v45 = vmul.f32 %v7978_v30, %v8001_v13  ;;  %v652_v2 = vmul.f32 %v7979_v38, %v8001_v13 }
 0x165   :  { %v3642_v48 = vpack.c.bf16 %v1609_v44, %v1605_v22  ;;  %v3706_v0 = vpack.c.bf16 %v1611_v18, %v1607_v52  ;;  %v361_v29 = vmul.f32 %v7992_v5, %v8002_v46  ;;  %v362_v20 = vmul.f32 %v7993_v21, %v8002_v46  ;;  %v1743_v18 = vld [vmem:[%s7608_s4 + $0x50] sm:$0xff] }
 0x166   :  { %1777 = vperm.xlu1 %3783, %v1735_v39   ;;  %3641 = vmatprep.subr.bf16.mxu0 %v3640_v3  ;;  %v363_v16 = vmul.f32 %v7994_v10, %v8002_v46  ;;  %v364_v4 = vmul.f32 %v7995_v59, %v8002_v46  ;;  %v653_v53 = vmul.f32 %v7997_v6, %v5606_v37 }
 0x167   :  { %3705 = vmatprep.subr.bf16.mxu1 %v3704_v35  ;;  %3643 = vmatpush1.bf16.msra.mxu0 %v3642_v48  ;;  %v654_v9 = vmul.f32 %v7977_v62, %v5606_v37  ;;  %v655_v40 = vmul.f32 %v7978_v30, %v5606_v37  ;;  %v656_v28 = vmul.f32 %v7979_v38, %v5606_v37  ;;  %v5709_v50 = vpop.permute.xlu1 %914  ;;  %v1741_v37 = vld [vmem:[%s7608_s4 + $0x40] sm:$0xff] }
 0x168   :  { %3707 = vmatpush1.bf16.msra.mxu1 %v3706_v0  ;;  %v1069_v58 = vmul.f32 %v7899_v12, %v5635_v63  ;;  %v1070_v24 = vmul.f32 %v7896_v47, %v5635_v63  ;;  %v1071_v34 = vmul.f32 %v7900_v57, %v5635_v63  ;;  %v1072_v11 = vmul.f32 %v7897_v41, %v5635_v63 }
 0x169   :  { %v778_v31 = vadd.f32 %v650_v61, %v358_v1  ;;  %v780_v51 = vadd.f32 %v652_v2, %v360_v27  ;;  %v777_v55 = vadd.f32 %v649_v49, %v357_v42  ;;  %v779_v39 = vadd.f32 %v651_v45, %v359_v14  ;;  %v1745_v14 = vld [vmem:[%s7608_s4 + $0x60] sm:$0xff] }
 0x16a   :  { %1787 = vperm.xlu1 %3783, %v1737_v26   ;;  %v1073_v54 = vmul.f32 %v7899_v12, %v911_v17  ;;  %v1074_v43 = vmul.f32 %v7896_v47, %v911_v17  ;;  %v1075_v7 = vmul.f32 %v7900_v57, %v911_v17  ;;  %v1076_v19 = vmul.f32 %v7897_v41, %v911_v17 }
 0x16b   :  { %v782_v33 = vadd.f32 %v654_v9, %v362_v20  ;;  %v784_v60 = vadd.f32 %v656_v28, %v364_v4  ;;  %v781_v63 = vadd.f32 %v653_v53, %v361_v29  ;;  %v783_v23 = vadd.f32 %v655_v40, %v363_v16  ;;  %v1747_v53 = vld [vmem:[%s7608_s4 + $0x70] sm:$0xff] }
 0x16c   :  { %v1198_v52 = vadd.f32 %v1070_v24, %v778_v31  ;;  %v1200_v8 = vadd.f32 %v1072_v11, %v780_v51  ;;  %v1197_v15 = vadd.f32 %v1069_v58, %v777_v55  ;;  %v1199_v44 = vadd.f32 %v1071_v34, %v779_v39  ;;  %v8003_v24 = vld [vmem:[#allocation14_spill] sm:$0xff]  ;;  %v8004_v51 = vld [vmem:[#allocation44_spill] sm:$0xff] }
 0x16d   :  { %v1346_v22 = vpop.permute.xlu1 %1345  ;;  %v1202_v48 = vadd.f32 %v1074_v43, %v782_v33  ;;  %v1204_v0 = vadd.f32 %v1076_v19, %v784_v60  ;;  %v1201_v25 = vadd.f32 %v1073_v54, %v781_v63  ;;  %v1203_v42 = vadd.f32 %v1075_v7, %v783_v23  ;;  %v8005_v7 = vld [vmem:[#allocation13_spill] sm:$0xff] }
 0x16e   :  { %1797 = vperm.xlu1 %3783, %v1739_v36   ;;  %v1486_v32 = vadd.f32 %v1346_v22, %v1198_v52  ;;  %v1488_v26 = vadd.f32 %v1346_v22, %v1200_v8  ;;  %v1485_v3 = vadd.f32 %v1346_v22, %v1197_v15  ;;  %v1487_v35 = vadd.f32 %v1346_v22, %v1199_v44  ;;  %v1749_v23 = vld [vmem:[%s7608_s4 + $0x80] sm:$0xff]  ;;  %v919_v44 = vpop.permute.xlu0 %918 }
 0x16f   :  { %v365_v34 = vmul.f32 %v7992_v5, %v8003_v24  ;;  %v366_v11 = vmul.f32 %v7993_v21, %v8003_v24  ;;  %v368_v31 = vmul.f32 %v7995_v59, %v8003_v24  ;;  %v657_v55 = vmul.f32 %v7997_v6, %v8004_v51 }
 0x170   :  { %v1614_v45 = vmax.f32 %v1486_v32, 0.0  ;;  %v1616_v2 = vmax.f32 %v1488_v26, 0.0  ;;  %v1613_v36 = vmax.f32 %v1485_v3, 0.0  ;;  %v1615_v46 = vmax.f32 %v1487_v35, 0.0 }
 0x171   :  { %v1351_v1 = vpop.permute.xlu1 %1350  ;;  %v658_v39 = vmul.f32 %v7977_v62, %v8004_v51  ;;  %v659_v54 = vmul.f32 %v7978_v30, %v8004_v51  ;;  %v660_v43 = vmul.f32 %v7979_v38, %v8004_v51  ;;  %v369_v19 = vmul.f32 %v7992_v5, %v8005_v7 }
 0x172   :  { %1807 = vperm.xlu1 %3783, %v1741_v37   ;;  %v1490_v27 = vadd.f32 %v1351_v1, %v1202_v48  ;;  %v1492_v13 = vadd.f32 %v1351_v1, %v1204_v0  ;;  %v1489_v49 = vadd.f32 %v1351_v1, %v1201_v25  ;;  %v1491_v61 = vadd.f32 %v1351_v1, %v1203_v42 }
 0x173   :  { %v367_v37 = vmul.f32 %v7994_v10, %v8003_v24  ;;  %v370_v33 = vmul.f32 %v7993_v21, %v8005_v7  ;;  %v371_v60 = vmul.f32 %v7994_v10, %v8005_v7  ;;  %v372_v63 = vmul.f32 %v7995_v59, %v8005_v7 }
 0x174   :  { %v1618_v29 = vmax.f32 %v1490_v27, 0.0  ;;  %v1620_v20 = vmax.f32 %v1492_v13, 0.0  ;;  %v1617_v16 = vmax.f32 %v1489_v49, 0.0  ;;  %v1619_v4 = vmax.f32 %v1491_v61, 0.0  ;;  %v1751_v13 = vld [vmem:[%s7608_s4 + $0x90] sm:$0xff] }
 0x175   :  { %v661_v22 = vmul.f32 %v7997_v6, %v5672_v56  ;;  %v662_v52 = vmul.f32 %v7977_v62, %v5672_v56  ;;  %v663_v8 = vmul.f32 %v7978_v30, %v5672_v56  ;;  %v664_v15 = vmul.f32 %v7979_v38, %v5672_v56 }
 0x176   :  { %1817 = vperm.xlu1 %3783, %v1743_v18   ;;  %v3644_v40 = vpack.c.bf16 %v1618_v29, %v1614_v45  ;;  %v3708_v28 = vpack.c.bf16 %v1620_v20, %v1616_v2  ;;  %v3646_v17 = vpack.c.bf16 %v1617_v16, %v1613_v36  ;;  %v3710_v58 = vpack.c.bf16 %v1619_v4, %v1615_v46  ;;  %v1753_v16 = vld [vmem:[%s7608_s4 + $0xa0] sm:$0xff] }
 0x177   :  { %v5735_v9 = vpop.permute.xlu1 %506  ;;  %v1077_v32 = vmul.f32 %v7899_v12, %v5709_v50  ;;  %v1078_v26 = vmul.f32 %v7896_v47, %v5709_v50  ;;  %v1079_v3 = vmul.f32 %v7900_v57, %v5709_v50  ;;  %v1080_v35 = vmul.f32 %v7897_v41, %v5709_v50 }
 0x178   :  { %3645 = vmatprep.subr.bf16.mxu0 %v3644_v40  ;;  %3709 = vmatprep.subr.bf16.mxu1 %v3708_v28  ;;  %v786_v48 = vadd.f32 %v658_v39, %v366_v11  ;;  %v788_v0 = vadd.f32 %v660_v43, %v368_v31  ;;  %v785_v25 = vadd.f32 %v657_v55, %v365_v34  ;;  %v1755_v39 = vld [vmem:[%s7608_s4 + $0xb0] sm:$0xff] }
 0x179   :  { %3647 = vmatpush1.bf16.msra.mxu0 %v3646_v17  ;;  %3711 = vmatpush1.bf16.msra.mxu1 %v3710_v58  ;;  %v787_v56 = vadd.f32 %v659_v54, %v367_v37  ;;  %v1081_v42 = vmul.f32 %v7899_v12, %v919_v44  ;;  %v1082_v1 = vmul.f32 %v7896_v47, %v919_v44 }
 0x17a   :  { %1827 = vperm.xlu1 %3783, %v1745_v14   ;;  %v1083_v14 = vmul.f32 %v7900_v57, %v919_v44  ;;  %v1084_v27 = vmul.f32 %v7897_v41, %v919_v44  ;;  %v790_v49 = vadd.f32 %v662_v52, %v370_v33  ;;  %v792_v61 = vadd.f32 %v664_v15, %v372_v63 }
 0x17b   :  { %v789_v50 = vadd.f32 %v661_v22, %v369_v19  ;;  %v791_v45 = vadd.f32 %v663_v8, %v371_v60  ;;  %v1206_v36 = vadd.f32 %v1078_v26, %v786_v48  ;;  %v1208_v46 = vadd.f32 %v1080_v35, %v788_v0  ;;  %v1757_v35 = vld [vmem:[%s7608_s4 + $0xc0] sm:$0xff] }
 0x17c   :  { %v1205_v29 = vadd.f32 %v1077_v32, %v785_v25  ;;  %v1207_v20 = vadd.f32 %v1079_v3, %v787_v56  ;;  %v1210_v17 = vadd.f32 %v1082_v1, %v790_v49  ;;  %v1212_v58 = vadd.f32 %v1084_v27, %v792_v61  ;;  %v8006_v32 = vld [vmem:[#allocation16_spill] sm:$0xff]  ;;  %v8007_v25 = vld [vmem:[#allocation78_spill] sm:$0xff]  ;;  %v8008_v27 = vld [vmem:[#allocation15_spill] sm:$0xff] }
 0x17d   :  { %v1209_v24 = vadd.f32 %v1081_v42, %v789_v50  ;;  %v1211_v34 = vadd.f32 %v1083_v14, %v791_v45  ;;  %v373_v26 = vmul.f32 %v7992_v5, %v8006_v32  ;;  %v374_v3 = vmul.f32 %v7993_v21, %v8006_v32 }
 0x17e   :  { %1837 = vperm.xlu1 %3783, %v1747_v53   ;;  %v375_v48 = vmul.f32 %v7994_v10, %v8006_v32  ;;  %v376_v0 = vmul.f32 %v7995_v59, %v8006_v32  ;;  %v665_v56 = vmul.f32 %v7997_v6, %v8007_v25  ;;  %v666_v42 = vmul.f32 %v7977_v62, %v8007_v25 }
 0x17f   :  { %v667_v1 = vmul.f32 %v7978_v30, %v8007_v25  ;;  %v668_v14 = vmul.f32 %v7979_v38, %v8007_v25  ;;  %v378_v49 = vmul.f32 %v7993_v21, %v8008_v27  ;;  %v379_v61 = vmul.f32 %v7994_v10, %v8008_v27 }
 0x180   :  { %v5772_v18 = vpop.permute.xlu1 %922  ;;  %v380_v50 = vmul.f32 %v7995_v59, %v8008_v27  ;;  %v669_v45 = vmul.f32 %v7997_v6, %v5735_v9 }
 0x182   :  { %1847 = vperm.xlu1 %3783, %v1749_v23  }
 0x185   :  { %v1356_v2 = vpop.permute.xlu1 %1355 }
 0x186   :  { %1857 = vperm.xlu1 %3783, %v1751_v13   ;;  %v1494_v4 = vadd.f32 %v1356_v2, %v1206_v36  ;;  %v1496_v53 = vadd.f32 %v1356_v2, %v1208_v46  ;;  %v1493_v40 = vadd.f32 %v1356_v2, %v1205_v29  ;;  %v1495_v28 = vadd.f32 %v1356_v2, %v1207_v20  ;;  %v927_v29 = vpop.permute.xlu0 %926  ;;  %v1759_v20 = vld [vmem:[%s7608_s4 + $0xd0] sm:$0xff] }
 0x187   :  { %v377_v13 = vmul.f32 %v7992_v5, %v8008_v27  ;;  %v670_v2 = vmul.f32 %v7977_v62, %v5735_v9  ;;  %v671_v36 = vmul.f32 %v7978_v30, %v5735_v9  ;;  %v672_v46 = vmul.f32 %v7979_v38, %v5735_v9 }
 0x188   :  { %v1622_v54 = vmax.f32 %v1494_v4, 0.0  ;;  %v1624_v43 = vmax.f32 %v1496_v53, 0.0  ;;  %v1621_v7 = vmax.f32 %v1493_v40, 0.0  ;;  %v1623_v19 = vmax.f32 %v1495_v28, 0.0 }
 0x189   :  { %v1085_v4 = vmul.f32 %v7899_v12, %v5772_v18  ;;  %v1086_v53 = vmul.f32 %v7896_v47, %v5772_v18  ;;  %v1087_v40 = vmul.f32 %v7900_v57, %v5772_v18  ;;  %v1088_v28 = vmul.f32 %v7897_v41, %v5772_v18 }
 0x18a   :  { %v1361_v11 = vpop.permute.xlu1 %1360  ;;  %1867 = vperm.xlu1 %3783, %v1753_v16   ;;  %v794_v9 = vadd.f32 %v666_v42, %v374_v3  ;;  %v797_v18 = vadd.f32 %v669_v45, %v377_v13 }
 0x18b   :  { %v1498_v37 = vadd.f32 %v1361_v11, %v1210_v17  ;;  %v1500_v31 = vadd.f32 %v1361_v11, %v1212_v58  ;;  %v1497_v51 = vadd.f32 %v1361_v11, %v1209_v24  ;;  %v1499_v55 = vadd.f32 %v1361_v11, %v1211_v34 }
 0x18c   :  { %v796_v17 = vadd.f32 %v668_v14, %v376_v0  ;;  %v793_v58 = vadd.f32 %v665_v56, %v373_v26  ;;  %v795_v24 = vadd.f32 %v667_v1, %v375_v48  ;;  %v1089_v34 = vmul.f32 %v7899_v12, %v927_v29 }
 0x18d   :  { %v1626_v33 = vmax.f32 %v1498_v37, 0.0  ;;  %v1628_v60 = vmax.f32 %v1500_v31, 0.0  ;;  %v1625_v63 = vmax.f32 %v1497_v51, 0.0  ;;  %v1627_v23 = vmax.f32 %v1499_v55, 0.0  ;;  %v1761_v51 = vld [vmem:[%s7608_s4 + $0xe0] sm:$0xff] }
 0x18e   :  { %1877 = vperm.xlu1 %3783, %v1755_v39   ;;  %v1090_v11 = vmul.f32 %v7896_v47, %v927_v29  ;;  %v1091_v37 = vmul.f32 %v7900_v57, %v927_v29  ;;  %v1092_v31 = vmul.f32 %v7897_v41, %v927_v29  ;;  %v798_v55 = vadd.f32 %v670_v2, %v378_v49 }
 0x18f   :  { %v5795_v22 = vpop.permute.xlu1 %514  ;;  %v3648_v52 = vpack.c.bf16 %v1626_v33, %v1622_v54  ;;  %v3712_v8 = vpack.c.bf16 %v1628_v60, %v1624_v43  ;;  %v3650_v15 = vpack.c.bf16 %v1625_v63, %v1621_v7  ;;  %v3714_v44 = vpack.c.bf16 %v1627_v23, %v1623_v19 }
 0x190   :  { %v800_v39 = vadd.f32 %v672_v46, %v380_v50  ;;  %v799_v54 = vadd.f32 %v671_v36, %v379_v61  ;;  %v1214_v7 = vadd.f32 %v1086_v53, %v794_v9  ;;  %v1216_v19 = vadd.f32 %v1088_v28, %v796_v17  ;;  %v8010_v28 = vld [vmem:[#allocation18_spill] sm:$0xff] }
 0x191   :  { %3649 = vmatprep.subr.bf16.mxu0 %v3648_v52  ;;  %3713 = vmatprep.subr.bf16.mxu1 %v3712_v8  ;;  %v1213_v33 = vadd.f32 %v1085_v4, %v793_v58  ;;  %v1215_v60 = vadd.f32 %v1087_v40, %v795_v24  ;;  %v1217_v26 = vadd.f32 %v1089_v34, %v797_v18  ;;  %v8011_v34 = vld [vmem:[#allocation40_spill] sm:$0xff] }
 0x192   :  { %3651 = vmatpush1.bf16.msra.mxu0 %v3650_v15  ;;  %3715 = vmatpush1.bf16.msra.mxu1 %v3714_v44  ;;  %v1763_v15 = vld [vmem:[%s7608_s4 + $0xf0] sm:$0xff]  ;;  %v1218_v44 = vadd.f32 %v1090_v11, %v798_v55  ;;  %v1220_v32 = vadd.f32 %v1092_v31, %v800_v39  ;;  %v1219_v3 = vadd.f32 %v1091_v37, %v799_v54 }
 0x193   :  { %1887 = vperm.xlu1 %3783, %v1757_v35   ;;  %v381_v9 = vmul.f32 %v7992_v5, %v8010_v28  ;;  %v382_v17 = vmul.f32 %v7993_v21, %v8010_v28  ;;  %v383_v58 = vmul.f32 %v7994_v10, %v8010_v28  ;;  %v384_v24 = vmul.f32 %v7995_v59, %v8010_v28  ;;  %v8012_v39 = vld [vmem:[#allocation19_spill] sm:$0xff] }
 0x194   :  { %v5835_v16 = vpop.permute.xlu1 %930  ;;  %v673_v11 = vmul.f32 %v7997_v6, %v8011_v34  ;;  %v674_v37 = vmul.f32 %v7977_v62, %v8011_v34  ;;  %v675_v31 = vmul.f32 %v7978_v30, %v8011_v34  ;;  %v5883_v18 = vmul.f32 %v7992_v5, %v8012_v39 }
 0x195   :  { %v5887_v54 = vmul.f32 %v7993_v21, %v8012_v39 }
 0x197   :  { %1897 = vperm.xlu1 %3783, %v1759_v20   ;;  %v8009_v20 = vld [vmem:[#allocation17_spill] sm:$0xff] }
 0x198   :  { %v385_v4 = vmul.f32 %v7992_v5, %v8009_v20  ;;  %v386_v53 = vmul.f32 %v7993_v21, %v8009_v20  ;;  %v387_v40 = vmul.f32 %v7994_v10, %v8009_v20  ;;  %v388_v55 = vmul.f32 %v7995_v59, %v8009_v20 }
 0x199   :  { %v1366_v43 = vpop.permute.xlu1 %1365 }
 0x19a   :  { %v1502_v63 = vadd.f32 %v1366_v43, %v1214_v7  ;;  %v1504_v23 = vadd.f32 %v1366_v43, %v1216_v19  ;;  %v1501_v52 = vadd.f32 %v1366_v43, %v1213_v33  ;;  %v1503_v8 = vadd.f32 %v1366_v43, %v1215_v60 }
 0x19b   :  { %1907 = vperm.xlu1 %3783, %v1761_v51   ;;  %v676_v51 = vmul.f32 %v7979_v38, %v8011_v34  ;;  %v5891_v43 = vmul.f32 %v7994_v10, %v8012_v39  ;;  %v677_v19 = vmul.f32 %v7997_v6, %v5795_v22  ;;  %v678_v33 = vmul.f32 %v7977_v62, %v5795_v22  ;;  %v8014_v34 = vld [vmem:[#allocation21_spill] sm:$0xff] }
 0x19c   :  { %v1630_v42 = vmax.f32 %v1502_v63, 0.0  ;;  %v1632_v1 = vmax.f32 %v1504_v23, 0.0  ;;  %v1629_v14 = vmax.f32 %v1501_v52, 0.0  ;;  %v1631_v27 = vmax.f32 %v1503_v8, 0.0 }
 0x19d   :  { %v1371_v35 = vpop.permute.xlu1 %1370  ;;  %v679_v60 = vmul.f32 %v7978_v30, %v5795_v22  ;;  %v680_v63 = vmul.f32 %v7979_v38, %v5795_v22  ;;  %v1093_v23 = vmul.f32 %v7899_v12, %v5835_v16  ;;  %v1094_v52 = vmul.f32 %v7896_v47, %v5835_v16 }
 0x19e   :  { %v1506_v48 = vadd.f32 %v1371_v35, %v1218_v44  ;;  %v1508_v0 = vadd.f32 %v1371_v35, %v1220_v32  ;;  %v1505_v25 = vadd.f32 %v1371_v35, %v1217_v26  ;;  %v1507_v56 = vadd.f32 %v1371_v35, %v1219_v3  ;;  %v935_v44 = vpop.permute.xlu0 %934 }
 0x19f   :  { %1917 = vperm.xlu1 %3783, %v1763_v15   ;;  %v1095_v8 = vmul.f32 %v7900_v57, %v5835_v16  ;;  %v1096_v15 = vmul.f32 %v7897_v41, %v5835_v16  ;;  %v802_v32 = vadd.f32 %v674_v37, %v382_v17  ;;  %v804_v26 = vadd.f32 %v676_v51, %v384_v24 }
 0x1a0   :  { %v1634_v13 = vmax.f32 %v1506_v48, 0.0  ;;  %v1636_v49 = vmax.f32 %v1508_v0, 0.0  ;;  %v1633_v61 = vmax.f32 %v1505_v25, 0.0  ;;  %v1635_v50 = vmax.f32 %v1507_v56, 0.0 }
 0x1a1   :  { %v801_v3 = vadd.f32 %v673_v11, %v381_v9  ;;  %v803_v35 = vadd.f32 %v675_v31, %v383_v58  ;;  %v1097_v48 = vmul.f32 %v7899_v12, %v935_v44  ;;  %v1098_v22 = vmul.f32 %v7896_v47, %v935_v44 }
 0x1a2   :  { %v3652_v45 = vpack.c.bf16 %v1634_v13, %v1630_v42  ;;  %v3716_v2 = vpack.c.bf16 %v1636_v49, %v1632_v1  ;;  %v3654_v36 = vpack.c.bf16 %v1633_v61, %v1629_v14  ;;  %v3718_v46 = vpack.c.bf16 %v1635_v50, %v1631_v27  ;;  %v5855_v29 = vpop.permute.xlu1 %522 }
 0x1a3   :  { %v1099_v0 = vmul.f32 %v7900_v57, %v935_v44  ;;  %v1100_v25 = vmul.f32 %v7897_v41, %v935_v44  ;;  %v806_v56 = vadd.f32 %v678_v33, %v386_v53  ;;  %v808_v42 = vadd.f32 %v680_v63, %v388_v55 }
 0x1a4   :  { %3653 = vmatprep.subr.bf16.mxu0 %v3652_v45  ;;  %3717 = vmatprep.subr.bf16.mxu1 %v3716_v2  ;;  %v805_v1 = vadd.f32 %v677_v19, %v385_v4  ;;  %v807_v14 = vadd.f32 %v679_v60, %v387_v40  ;;  %v1222_v13 = vadd.f32 %v1094_v52, %v802_v32  ;;  %v8013_v45 = vld [vmem:[#allocation20_spill] sm:$0xff] }
 0x1a5   :  { %3655 = vmatpush1.bf16.msra.mxu0 %v3654_v36  ;;  %3719 = vmatpush1.bf16.msra.mxu1 %v3718_v46  ;;  %v1224_v16 = vadd.f32 %v1096_v15, %v804_v26  ;;  %v1221_v49 = vadd.f32 %v1093_v23, %v801_v3  ;;  %v1223_v61 = vadd.f32 %v1095_v8, %v803_v35  ;;  %v8015_v3 = vld [vmem:[#allocation22_spill] sm:$0xff] }
 0x1a6   :  { %v5917_v50 = vmul.f32 %v7995_v59, %v8012_v39  ;;  %v5921_v2 = vmul.f32 %v7992_v5, %v8013_v45  ;;  %v390_v36 = vmul.f32 %v7993_v21, %v8013_v45  ;;  %v5927_v46 = vmul.f32 %v7994_v10, %v8013_v45 }
 0x1a7   :  { %v1226_v28 = vadd.f32 %v1098_v22, %v806_v56  ;;  %v1228_v9 = vadd.f32 %v1100_v25, %v808_v42  ;;  %v1225_v17 = vadd.f32 %v1097_v48, %v805_v1  ;;  %v1227_v58 = vadd.f32 %v1099_v0, %v807_v14 }
 0x1a8   :  { %v5893_v7 = vpop.permute.xlu1 %938  ;;  %v392_v24 = vmul.f32 %v7995_v59, %v8013_v45  ;;  %v5933_v11 = vmul.f32 %v7992_v5, %v8014_v34  ;;  %v5937_v37 = vmul.f32 %v7993_v21, %v8014_v34  ;;  %v5941_v31 = vmul.f32 %v7994_v10, %v8014_v34 }
 0x1a9   :  { %v5945_v26 = vmul.f32 %v7995_v59, %v8014_v34  ;;  %v397_v35 = vmul.f32 %v7992_v5, %v8015_v3  ;;  %v398_v48 = vmul.f32 %v7993_v21, %v8015_v3  ;;  %v5953_v22 = vmul.f32 %v7994_v10, %v8015_v3 }
 0x1aa   :  { %v400_v14 = vmul.f32 %v7995_v59, %v8015_v3  ;;  %v8020_v3 = vld [vmem:[#allocation48_spill] sm:$0xff] }
 0x1ad   :  { %v1376_v27 = vpop.permute.xlu1 %1375 }
 0x1ae   :  { %v1510_v20 = vadd.f32 %v1376_v27, %v1222_v13  ;;  %v1512_v4 = vadd.f32 %v1376_v27, %v1224_v16  ;;  %v1509_v53 = vadd.f32 %v1376_v27, %v1221_v49  ;;  %v1511_v40 = vadd.f32 %v1376_v27, %v1223_v61  ;;  %v8016_v27 = vld [vmem:[#allocation23_spill] sm:$0xff] }
 0x1af   :  { %v5961_v13 = vmul.f32 %v7992_v5, %v8016_v27  ;;  %v5965_v16 = vmul.f32 %v7993_v21, %v8016_v27  ;;  %v8017_v49 = vld [vmem:[#allocation39_spill] sm:$0xff]  ;;  %v5971_v45 = vmul.f32 %v7994_v10, %v8016_v27 }
 0x1b0   :  { %v1638_v60 = vmax.f32 %v1510_v20, 0.0  ;;  %v1640_v63 = vmax.f32 %v1512_v4, 0.0  ;;  %v1637_v23 = vmax.f32 %v1509_v53, 0.0  ;;  %v1639_v52 = vmax.f32 %v1511_v40, 0.0  ;;  %v8018_v4 = vld [vmem:[#allocation24_spill] sm:$0xff] }
 0x1b1   :  { %v1381_v51 = vpop.permute.xlu1 %1380  ;;  %v682_v61 = vmul.f32 %v7977_v62, %v8017_v49  ;;  %v5975_v20 = vmul.f32 %v7995_v59, %v8016_v27  ;;  %v5979_v53 = vmul.f32 %v7992_v5, %v8018_v4  ;;  %v406_v40 = vmul.f32 %v7993_v21, %v8018_v4  ;;  %v8019_v21 = vld [vmem:[#allocation49_spill] sm:$0xff]  ;;  %v943_v27 = vpop.permute.xlu0 %942 }
 0x1b2   :  { %v1514_v55 = vadd.f32 %v1381_v51, %v1226_v28  ;;  %v1516_v39 = vadd.f32 %v1381_v51, %v1228_v9  ;;  %v1513_v19 = vadd.f32 %v1381_v51, %v1225_v17  ;;  %v1515_v33 = vadd.f32 %v1381_v51, %v1227_v58 }
 0x1b3   :  { %v5985_v28 = vmul.f32 %v7994_v10, %v8018_v4  ;;  %v5989_v9 = vmul.f32 %v7995_v59, %v8018_v4  ;;  %v681_v17 = vmul.f32 %v7997_v6, %v8017_v49  ;;  %v683_v5 = vmul.f32 %v7978_v30, %v8017_v49 }
 0x1b4   :  { %v1642_v8 = vmax.f32 %v1514_v55, 0.0  ;;  %v1644_v15 = vmax.f32 %v1516_v39, 0.0  ;;  %v1641_v44 = vmax.f32 %v1513_v19, 0.0  ;;  %v1643_v32 = vmax.f32 %v1515_v33, 0.0 }
 0x1b5   :  { %v684_v58 = vmul.f32 %v7979_v38, %v8017_v49  ;;  %v690_v34 = vmul.f32 %v7977_v62, %v8019_v21  ;;  %v689_v10 = vmul.f32 %v7997_v6, %v8019_v21  ;;  %v691_v59 = vmul.f32 %v7978_v30, %v8019_v21 }
 0x1b6   :  { %v5955_v0 = vpop.permute.xlu1 %530  ;;  %v3656_v25 = vpack.c.bf16 %v1642_v8, %v1638_v60  ;;  %v3720_v56 = vpack.c.bf16 %v1644_v15, %v1640_v63  ;;  %v3658_v42 = vpack.c.bf16 %v1641_v44, %v1637_v23  ;;  %v3722_v1 = vpack.c.bf16 %v1643_v32, %v1639_v52 }
 0x1b7   :  { %v692_v51 = vmul.f32 %v7979_v38, %v8019_v21  ;;  %v810_v55 = vadd.f32 %v682_v61, %v390_v36  ;;  %v685_v39 = vmul.f32 %v7997_v6, %v5855_v29  ;;  %v686_v19 = vmul.f32 %v7977_v62, %v5855_v29 }
 0x1b8   :  { %3657 = vmatprep.subr.bf16.mxu0 %v3656_v25  ;;  %3721 = vmatprep.subr.bf16.mxu1 %v3720_v56  ;;  %v687_v33 = vmul.f32 %v7978_v30, %v5855_v29  ;;  %v688_v60 = vmul.f32 %v7979_v38, %v5855_v29  ;;  %v1101_v23 = vmul.f32 %v7899_v12, %v5893_v7 }
 0x1b9   :  { %3659 = vmatpush1.bf16.msra.mxu0 %v3658_v42  ;;  %3723 = vmatpush1.bf16.msra.mxu1 %v3722_v1  ;;  %v1102_v36 = vmul.f32 %v7896_v47, %v5893_v7  ;;  %v1103_v52 = vmul.f32 %v7900_v57, %v5893_v7  ;;  %v1104_v8 = vmul.f32 %v7897_v41, %v5893_v7 }
 0x1ba   :  { %v812_v15 = vadd.f32 %v684_v58, %v392_v24  ;;  %v809_v44 = vadd.f32 %v681_v17, %v5921_v2  ;;  %v811_v32 = vadd.f32 %v683_v5, %v5927_v46  ;;  %v6025_v29 = vadd.f32 %v690_v34, %v398_v48 }
 0x1bb   :  { %v697_v25 = vmul.f32 %v7997_v6, %v8020_v3  ;;  %v698_v56 = vmul.f32 %v7977_v62, %v8020_v3  ;;  %v6031_v42 = vadd.f32 %v692_v51, %v400_v14  ;;  %v6033_v1 = vadd.f32 %v689_v10, %v397_v35 }
 0x1bc   :  { %v814_v7 = vadd.f32 %v686_v19, %v5887_v54  ;;  %v816_v24 = vadd.f32 %v688_v60, %v5917_v50  ;;  %v813_v2 = vadd.f32 %v685_v39, %v5883_v18  ;;  %v815_v46 = vadd.f32 %v687_v33, %v5891_v43 }
 0x1bd   :  { %v6013_v63 = vpop.permute.xlu1 %946  ;;  %v1230_v49 = vadd.f32 %v1102_v36, %v810_v55  ;;  %v1232_v61 = vadd.f32 %v1104_v8, %v812_v15  ;;  %v1229_v4 = vadd.f32 %v1101_v23, %v809_v44  ;;  %v1231_v17 = vadd.f32 %v1103_v52, %v811_v32  ;;  %v951_v23 = vpop.permute.xlu0 %950 }
 0x1be   :  { %v1105_v5 = vmul.f32 %v7899_v12, %v943_v27  ;;  %v1106_v14 = vmul.f32 %v7896_v47, %v943_v27  ;;  %v1107_v35 = vmul.f32 %v7900_v57, %v943_v27  ;;  %v1108_v58 = vmul.f32 %v7897_v41, %v943_v27 }
 0x1bf   :  { %v699_v55 = vmul.f32 %v7978_v30, %v8020_v3  ;;  %v700_v39 = vmul.f32 %v7979_v38, %v8020_v3  ;;  %v6048_v33 = vadd.f32 %v691_v59, %v5953_v22  ;;  %v826_v60 = vadd.f32 %v698_v56, %v406_v40 }
 0x1c0   :  { %v1234_v18 = vadd.f32 %v1106_v14, %v814_v7  ;;  %v1236_v10 = vadd.f32 %v1108_v58, %v816_v24  ;;  %v1233_v43 = vadd.f32 %v1105_v5, %v813_v2  ;;  %v1235_v51 = vadd.f32 %v1107_v35, %v815_v46 }
 0x1c1   :  { %v693_v3 = vmul.f32 %v7997_v6, %v5955_v0  ;;  %v694_v22 = vmul.f32 %v7977_v62, %v5955_v0  ;;  %v696_v40 = vmul.f32 %v7979_v38, %v5955_v0  ;;  %v828_v59 = vadd.f32 %v700_v39, %v5989_v9 }
 0x1c2   :  { %v1386_v48 = vpop.permute.xlu1 %1385  ;;  %v1113_v5 = vmul.f32 %v7899_v12, %v951_v23  ;;  %v1114_v14 = vmul.f32 %v7896_v47, %v951_v23  ;;  %v825_v35 = vadd.f32 %v697_v25, %v5979_v53  ;;  %v827_v58 = vadd.f32 %v699_v55, %v5985_v28 }
 0x1c3   :  { %v1518_v54 = vadd.f32 %v1386_v48, %v1230_v49  ;;  %v1520_v21 = vadd.f32 %v1386_v48, %v1232_v61  ;;  %v1517_v50 = vadd.f32 %v1386_v48, %v1229_v4  ;;  %v1519_v34 = vadd.f32 %v1386_v48, %v1231_v17 }
 0x1c4   :  { %v695_v9 = vmul.f32 %v7978_v30, %v5955_v0  ;;  %v822_v28 = vadd.f32 %v694_v22, %v5937_v37  ;;  %v824_v25 = vadd.f32 %v696_v40, %v5945_v26 }
 0x1c5   :  { %v1646_v44 = vmax.f32 %v1518_v54, 0.0  ;;  %v1648_v32 = vmax.f32 %v1520_v21, 0.0  ;;  %v1645_v27 = vmax.f32 %v1517_v50, 0.0  ;;  %v1647_v7 = vmax.f32 %v1519_v34, 0.0  ;;  %v959_v50 = vpop.permute.xlu0 %958 }
 0x1c6   :  { %v1391_v19 = vpop.permute.xlu1 %1390  ;;  %v1115_v54 = vmul.f32 %v7900_v57, %v951_v23  ;;  %v1116_v21 = vmul.f32 %v7897_v41, %v951_v23  ;;  %v1121_v34 = vmul.f32 %v7899_v12, %v959_v50  ;;  %v1124_v53 = vmul.f32 %v7897_v41, %v959_v50 }
 0x1c7   :  { %v1522_v36 = vadd.f32 %v1391_v19, %v1234_v18  ;;  %v1524_v52 = vadd.f32 %v1391_v19, %v1236_v10  ;;  %v1521_v8 = vadd.f32 %v1391_v19, %v1233_v43  ;;  %v1523_v15 = vadd.f32 %v1391_v19, %v1235_v51 }
 0x1c8   :  { %v1122_v18 = vmul.f32 %v7896_v47, %v959_v50  ;;  %v1123_v10 = vmul.f32 %v7900_v57, %v959_v50  ;;  %v821_v43 = vadd.f32 %v693_v3, %v5933_v11  ;;  %v823_v37 = vadd.f32 %v695_v9, %v5941_v31 }
 0x1c9   :  { %v1650_v24 = vmax.f32 %v1522_v36, 0.0  ;;  %v1652_v2 = vmax.f32 %v1524_v52, 0.0  ;;  %v1649_v46 = vmax.f32 %v1521_v8, 0.0  ;;  %v1651_v48 = vmax.f32 %v1523_v15, 0.0 }
 0x1ca   :  { %v1109_v11 = vmul.f32 %v7899_v12, %v6013_v63 }
 0x1cb   :  { %v539_v56 = vpop.permute.xlu1 %538  ;;  %v3660_v49 = vpack.c.bf16 %v1650_v24, %v1646_v44  ;;  %v3724_v61 = vpack.c.bf16 %v1652_v2, %v1648_v32  ;;  %v3662_v4 = vpack.c.bf16 %v1649_v46, %v1645_v27  ;;  %v3726_v17 = vpack.c.bf16 %v1651_v48, %v1647_v7  ;;  %v1406_v46 = vpop.permute.xlu0 %1405 }
 0x1cc   :  { %v701_v0 = vmul.f32 %v7997_v6, %v539_v56  ;;  %v702_v51 = vmul.f32 %v7977_v62, %v539_v56  ;;  %v703_v55 = vmul.f32 %v7978_v30, %v539_v56  ;;  %v704_v39 = vmul.f32 %v7979_v38, %v539_v56 }
 0x1cd   :  { %3661 = vmatprep.subr.bf16.mxu0 %v3660_v49  ;;  %3725 = vmatprep.subr.bf16.mxu1 %v3724_v61  ;;  %v1110_v6 = vmul.f32 %v7896_v47, %v6013_v63  ;;  %v1111_v62 = vmul.f32 %v7900_v57, %v6013_v63  ;;  %v1112_v30 = vmul.f32 %v7897_v41, %v6013_v63 }
 0x1ce   :  { %3663 = vmatpush1.bf16.msra.mxu0 %v3662_v4  ;;  %3727 = vmatpush1.bf16.msra.mxu1 %v3726_v17  ;;  %v829_v44 = vadd.f32 %v701_v0, %v5961_v13  ;;  %v830_v31 = vadd.f32 %v702_v51, %v5965_v16  ;;  %v832_v32 = vadd.f32 %v704_v39, %v5975_v20 }
 0x1cf   :  { %v1242_v27 = vadd.f32 %v1114_v14, %v822_v28  ;;  %v1244_v7 = vadd.f32 %v1116_v21, %v824_v25  ;;  %v1241_v24 = vadd.f32 %v1113_v5, %v821_v43  ;;  %v1243_v2 = vadd.f32 %v1115_v54, %v823_v37 }
 0x1d0   :  { %v955_v19 = vpop.permute.xlu1 %954  ;;  %v1237_v63 = vadd.f32 %v1109_v11, %v6033_v1  ;;  %v1239_v13 = vadd.f32 %v1111_v62, %v6048_v33  ;;  %v1249_v3 = vadd.f32 %v1121_v34, %v829_v44  ;;  %v1250_v20 = vadd.f32 %v1122_v18, %v830_v31  ;;  %v1674_v44 = vld [vmem:[%s7607_s3 + $0x28] sm:$0xff]  ;;  %v1673_v31 = vld [vmem:[%s7607_s3 + $0x20] sm:$0xff] }
 0x1d1   :  { %v1117_v23 = vmul.f32 %v7899_v12, %v955_v19  ;;  %v1118_v36 = vmul.f32 %v7896_v47, %v955_v19  ;;  %v1120_v52 = vmul.f32 %v7897_v41, %v955_v19  ;;  %v1119_v38 = vmul.f32 %v7900_v57, %v955_v19 }
 0x1d2   :  { %v831_v12 = vadd.f32 %v703_v55, %v5971_v45  ;;  %v1238_v41 = vadd.f32 %v1110_v6, %v6025_v29  ;;  %v1240_v57 = vadd.f32 %v1112_v30, %v6031_v42  ;;  %v1252_v40 = vadd.f32 %v1124_v53, %v832_v32  ;;  %v1675_v32 = vld [vmem:[%s7607_s3 + $0x30] sm:$0xff] }
 0x1d3   :  { %v1246_v26 = vadd.f32 %v1118_v36, %v826_v60  ;;  %v1248_v8 = vadd.f32 %v1120_v52, %v828_v59  ;;  %v1245_v15 = vadd.f32 %v1117_v23, %v825_v35  ;;  %v1247_v45 = vadd.f32 %v1119_v38, %v827_v58 }
 0x1d4   :  { %v1251_v22 = vadd.f32 %v1123_v10, %v831_v12  ;;  %v1676_v12 = vld [vmem:[%s7607_s3 + $0x38] sm:$0xff] }
 0x1d5   :  { %v1396_v47 = vpop.permute.xlu1 %1395  ;;  %v1534_v60 = vadd.f32 %v1406_v46, %v1246_v26  ;;  %v1536_v16 = vadd.f32 %v1406_v46, %v1248_v8  ;;  %v1533_v48 = vadd.f32 %v1406_v46, %v1245_v15  ;;  %v1535_v35 = vadd.f32 %v1406_v46, %v1247_v45  ;;  %v1669_v26 = vld [vmem:[%s7607_s3] sm:$0xff]  ;;  %v1672_v8 = vld [vmem:[%s7607_s3 + $0x18] sm:$0xff]  ;;  %v1671_v15 = vld [vmem:[%s7607_s3 + $0x10] sm:$0xff] }
 0x1d6   :  { %v1526_v56 = vadd.f32 %v1396_v47, %v1238_v41  ;;  %v1528_v49 = vadd.f32 %v1396_v47, %v1240_v57  ;;  %v1525_v61 = vadd.f32 %v1396_v47, %v1237_v63  ;;  %v1527_v4 = vadd.f32 %v1396_v47, %v1239_v13  ;;  %v1678_v47 = vld [vmem:[%s7607_s3 + $0x48] sm:$0xff]  ;;  %v1681_v46 = vld [vmem:[%s7607_s3 + $0x60] sm:$0xff]  ;;  %v1684_v41 = vld [vmem:[%s7607_s3 + $0x78] sm:$0xff] }
 0x1d7   :  { %v1662_v1 = vmax.f32 %v1534_v60, 0.0  ;;  %v1664_v14 = vmax.f32 %v1536_v16, 0.0  ;;  %v1661_v33 = vmax.f32 %v1533_v48, 0.0  ;;  %v1663_v11 = vmax.f32 %v1535_v35, 0.0  ;;  %v1683_v57 = vld [vmem:[%s7607_s3 + $0x70] sm:$0xff]  ;;  %v1686_v63 = vld [vmem:[%s7607_s3 + $0x88] sm:$0xff] }
 0x1d8   :  { %v1654_v34 = vmax.f32 %v1526_v56, 0.0  ;;  %v1656_v18 = vmax.f32 %v1528_v49, 0.0  ;;  %v1653_v10 = vmax.f32 %v1525_v61, 0.0  ;;  %v1655_v53 = vmax.f32 %v1527_v4, 0.0  ;;  %v1685_v13 = vld [vmem:[%s7607_s3 + $0x80] sm:$0xff]  ;;  %v1688_v60 = vld [vmem:[%s7607_s3 + $0x98] sm:$0xff] }
 0x1d9   :  { %v1401_v59 = vpop.permute.xlu1 %1400  ;;  %v1687_v16 = vld [vmem:[%s7607_s3 + $0x90] sm:$0xff]  ;;  %v1690_v48 = vld [vmem:[%s7607_s3 + $0xa8] sm:$0xff]  ;;  %v1689_v45 = vld [vmem:[%s7607_s3 + $0xa0] sm:$0xff] }
 0x1da   :  { %v1530_v29 = vadd.f32 %v1401_v59, %v1242_v27  ;;  %v1532_v17 = vadd.f32 %v1401_v59, %v1244_v7  ;;  %v1529_v42 = vadd.f32 %v1401_v59, %v1241_v24  ;;  %v1531_v5 = vadd.f32 %v1401_v59, %v1243_v2  ;;  %v1677_v27 = vld [vmem:[%s7607_s3 + $0x40] sm:$0xff]  ;;  %v1680_v7 = vld [vmem:[%s7607_s3 + $0x58] sm:$0xff]  ;;  %v1679_v24 = vld [vmem:[%s7607_s3 + $0x50] sm:$0xff] }
 0x1db   :  { %v1682_v2 = vld [vmem:[%s7607_s3 + $0x68] sm:$0xff]  ;;  %v1696_v59 = vld [vmem:[%s7607_s3 + $0xd8] sm:$0xff]  ;;  %v1695_v56 = vld [vmem:[%s7607_s3 + $0xd0] sm:$0xff] }
 0x1dc   :  { %v1658_v54 = vmax.f32 %v1530_v29, 0.0  ;;  %v1660_v21 = vmax.f32 %v1532_v17, 0.0  ;;  %v1657_v58 = vmax.f32 %v1529_v42, 0.0  ;;  %v1659_v50 = vmax.f32 %v1531_v5, 0.0  ;;  %v1698_v49 = vld [vmem:[%s7607_s3 + $0xe8] sm:$0xff]  ;;  %v1697_v61 = vld [vmem:[%s7607_s3 + $0xe0] sm:$0xff] }
 0x1dd   :  { %v1411_v9 = vpop.permute.xlu1 %1410  ;;  %v1700_v4 = vld [vmem:[%s7607_s3 + $0xf8] sm:$0xff]  ;;  %v1699_v29 = vld [vmem:[%s7607_s3 + $0xf0] sm:$0xff]  ;;  %v1702_v17 = vld [vmem:[%s7607_s3 + $0x108] sm:$0xff] }
 0x1de   :  { %v1537_v28 = vadd.f32 %v1411_v9, %v1249_v3  ;;  %v1538_v25 = vadd.f32 %v1411_v9, %v1250_v20  ;;  %v1539_v43 = vadd.f32 %v1411_v9, %v1251_v22  ;;  %v1540_v0 = vadd.f32 %v1411_v9, %v1252_v40  ;;  %v1692_v3 = vld [vmem:[%s7607_s3 + $0xb8] sm:$0xff]  ;;  %v1691_v20 = vld [vmem:[%s7607_s3 + $0xb0] sm:$0xff]  ;;  %v1694_v22 = vld [vmem:[%s7607_s3 + $0xc8] sm:$0xff] }
 0x1df   :  { %v3664_v51 = vpack.c.bf16 %v1658_v54, %v1654_v34  ;;  %v3728_v55 = vpack.c.bf16 %v1660_v21, %v1656_v18  ;;  %v3666_v39 = vpack.c.bf16 %v1657_v58, %v1653_v10  ;;  %v3730_v19 = vpack.c.bf16 %v1659_v50, %v1655_v53  ;;  %v1693_v40 = vld [vmem:[%s7607_s3 + $0xc0] sm:$0xff]  ;;  %v1704_v5 = vld [vmem:[%s7607_s3 + $0x118] sm:$0xff]  ;;  %v1707_v54 = vld [vmem:[%s7607_s3 + $0x130] sm:$0xff] }
 0x1e0   :  { %v1666_v23 = vmax.f32 %v1538_v25, 0.0  ;;  %v1668_v36 = vmax.f32 %v1540_v0, 0.0  ;;  %v1665_v52 = vmax.f32 %v1537_v28, 0.0  ;;  %v1667_v37 = vmax.f32 %v1539_v43, 0.0  ;;  %v1701_v42 = vld [vmem:[%s7607_s3 + $0x100] sm:$0xff]  ;;  %v1708_v35 = vld [vmem:[%s7607_s3 + $0x138] sm:$0xff] }
 0x1e1   :  { %3665 = vmatprep.subr.bf16.mxu0 %v3664_v51  ;;  %3729 = vmatprep.subr.bf16.mxu1 %v3728_v55  ;;  %v1710_v21 = vld [vmem:[%s7607_s3 + $0x148] sm:$0xff]  ;;  %v1709_v58 = vld [vmem:[%s7607_s3 + $0x140] sm:$0xff]  ;;  %v1712_v50 = vld [vmem:[%s7607_s3 + $0x158] sm:$0xff] }
 0x1e2   :  { %3667 = vmatpush1.bf16.msra.mxu0 %v3666_v39  ;;  %3731 = vmatpush1.bf16.msra.mxu1 %v3730_v19  ;;  %v3668_v6 = vpack.c.bf16 %v1666_v23, %v1662_v1  ;;  %v3732_v62 = vpack.c.bf16 %v1668_v36, %v1664_v14  ;;  %v3670_v30 = vpack.c.bf16 %v1665_v52, %v1661_v33  ;;  %v1703_v1 = vld [vmem:[%s7607_s3 + $0x110] sm:$0xff]  ;;  %v1706_v14 = vld [vmem:[%s7607_s3 + $0x128] sm:$0xff]  ;;  %v1705_v33 = vld [vmem:[%s7607_s3 + $0x120] sm:$0xff] }
 0x1e3   :  { %v3734_v38 = vpack.c.bf16 %v1667_v37, %v1663_v11  ;;  %v1711_v9 = vld [vmem:[%s7607_s3 + $0x150] sm:$0xff]  ;;  %v1714_v34 = vld [vmem:[%s7607_s3 + $0x168] sm:$0xff]  ;;  %v1713_v18 = vld [vmem:[%s7607_s3 + $0x160] sm:$0xff] }
 0x1e4   :  { %3669 = vmatprep.subr.bf16.mxu0 %v3668_v6  ;;  %3733 = vmatprep.subr.bf16.mxu1 %v3732_v62  ;;  %v1716_v10 = vld [vmem:[%s7607_s3 + $0x178] sm:$0xff]  ;;  %v1715_v53 = vld [vmem:[%s7607_s3 + $0x170] sm:$0xff]  ;;  %v1718_v28 = vld [vmem:[%s7607_s3 + $0x188] sm:$0xff] }
 0x1e5   :  { %v1717_v25 = vld [vmem:[%s7607_s3 + $0x180] sm:$0xff]  ;;  %v1720_v43 = vld [vmem:[%s7607_s3 + $0x198] sm:$0xff]  ;;  %v1719_v0 = vld [vmem:[%s7607_s3 + $0x190] sm:$0xff] }
 0x1e6   :  { %3671 = vmatpush1.bf16.msra.mxu0 %v3670_v30  ;;  %3735 = vmatpush1.bf16.msra.mxu1 %v3734_v38  ;;  %v1722_v51 = vld [vmem:[%s7607_s3 + $0x1a8] sm:$0xff]  ;;  %v1721_v55 = vld [vmem:[%s7607_s3 + $0x1a0] sm:$0xff]  ;;  %v1724_v39 = vld [vmem:[%s7607_s3 + $0x1b8] sm:$0xff]  ;;  %v1768_v38 = vpop.permute.xlu1 %1767 }
 0x1e7   :  { %v1723_v19 = vld [vmem:[%s7607_s3 + $0x1b0] sm:$0xff]  ;;  %v1726_v23 = vld [vmem:[%s7607_s3 + $0x1c8] sm:$0xff]  ;;  %v1725_v36 = vld [vmem:[%s7607_s3 + $0x1c0] sm:$0xff] }
 0x1e8   :  { %v1728_v52 = vld [vmem:[%s7607_s3 + $0x1d8] sm:$0xff]  ;;  %v1727_v37 = vld [vmem:[%s7607_s3 + $0x1d0] sm:$0xff]  ;;  %v1730_v11 = vld [vmem:[%s7607_s3 + $0x1e8] sm:$0xff] }
 0x1e9   :  { %1990 = vmatmul.mubr.f32.vlgmr.msra.gmra.mrb[0].mxu0 %v1669_v26  ;;  %2247 = vmatmul.mubr.f32.vlgmr.msra.gmra.mrb[0].mxu1 %v1669_v26  ;;  %v1729_v6 = vld [vmem:[%s7607_s3 + $0x1e0] sm:$0xff]  ;;  %v1732_v62 = vld [vmem:[%s7607_s3 + $0x1f8] sm:$0xff]  ;;  %v1731_v30 = vld [vmem:[%s7607_s3 + $0x1f0] sm:$0xff]  ;;  %s4074_s3 = smov [#allocation2]  }
 0x1ea   :  { %1995 = vmatprep.mubr.f32.mxu0 %v1672_v8  ;;  %2252 = vmatprep.mubr.f32.mxu1 %v1672_v8  ;;  %s3597_s28 = sshll.u32 %s4074_s3, 4  ;;  %s3598_s28 = int_to_ptr.vmem [resolvable:$true] %s3597_s28 }
 0x1eb   :  { %s4047_s29 = scalar_lea.vmem %s3598_s28, 16384  ;;  %p4052_p1 = scmp.lt.s32.totalorder %s3598_s28, %s3598_s28 }
 0x1ec   :  { %p4048_p0 = scmp.ne.s32.totalorder %s3598_s28, %s4047_s29  ;;  %p4053_p2 = scmp.lt.s32.totalorder %s4047_s29, %s4047_s29 }
 0x1ed   :  { %1996 = vmatmul.mubr.f32.gmra.mrb[2].mxu0 %v1671_v15  ;;  %2253 = vmatmul.mubr.f32.gmra.mrb[2].mxu1 %v1671_v15 }
 0x1ee   :  { %2001 = vmatprep.mubr.f32.mxu0 %v1674_v44  ;;  %2258 = vmatprep.mubr.f32.mxu1 %v1674_v44  ;;  %p4054_p3 = por %p4053_p2, %p4052_p1 }
 0x1f0   :  { %p4055_p4 = pnand %p4054_p3, %p4048_p0 }
 0x1f1   :  { %2002 = vmatmul.mubr.f32.gmra.mrb[4].mxu0 %v1673_v31  ;;  %2259 = vmatmul.mubr.f32.gmra.mrb[4].mxu1 %v1673_v31 }
 0x1f2   :  { %2007 = vmatprep.mubr.f32.mxu0 %v1676_v12  ;;  %2264 = vmatprep.mubr.f32.mxu1 %v1676_v12 }
 0x1f5   :  { %2008 = vmatmul.mubr.f32.gmra.mrb[6].mxu0 %v1675_v32  ;;  %2265 = vmatmul.mubr.f32.gmra.mrb[6].mxu1 %v1675_v32 }
 0x1f6   :  { %2013 = vmatprep.mubr.f32.mxu0 %v1678_v47  ;;  %2270 = vmatprep.mubr.f32.mxu1 %v1678_v47 }
 0x1f9   :  { %2014 = vmatmul.mubr.f32.gmra.mrb[8].mxu0 %v1677_v27  ;;  %2271 = vmatmul.mubr.f32.gmra.mrb[8].mxu1 %v1677_v27  ;;  %v1773_v27 = vpop.permute.xlu0 %1772 }
 0x1fa   :  { %2019 = vmatprep.mubr.f32.mxu0 %v1680_v7  ;;  %2276 = vmatprep.mubr.f32.mxu1 %v1680_v7 }
 0x1fd   :  { %2020 = vmatmul.mubr.f32.gmra.mrb[10].mxu0 %v1679_v24  ;;  %2277 = vmatmul.mubr.f32.gmra.mrb[10].mxu1 %v1679_v24 }
 0x1fe   :  { %2025 = vmatprep.mubr.f32.mxu0 %v1682_v2  ;;  %2282 = vmatprep.mubr.f32.mxu1 %v1682_v2 }
 0x201   :  { %2026 = vmatmul.mubr.f32.gmra.mrb[12].mxu0 %v1681_v46  ;;  %2283 = vmatmul.mubr.f32.gmra.mrb[12].mxu1 %v1681_v46 }
 0x202   :  { %2031 = vmatprep.mubr.f32.mxu0 %v1684_v41  ;;  %2288 = vmatprep.mubr.f32.mxu1 %v1684_v41 }
 0x205   :  { %2032 = vmatmul.mubr.f32.gmra.mrb[14].mxu0 %v1683_v57  ;;  %2289 = vmatmul.mubr.f32.gmra.mrb[14].mxu1 %v1683_v57 }
 0x206   :  { %2037 = vmatprep.mubr.f32.mxu0 %v1686_v63  ;;  %2294 = vmatprep.mubr.f32.mxu1 %v1686_v63 }
 0x209   :  { %2038 = vmatmul.mubr.f32.gmra.mrb[16].mxu0 %v1685_v13  ;;  %2295 = vmatmul.mubr.f32.gmra.mrb[16].mxu1 %v1685_v13 }
 0x20a   :  { %2043 = vmatprep.mubr.f32.mxu0 %v1688_v60  ;;  %2300 = vmatprep.mubr.f32.mxu1 %v1688_v60 }
 0x20d   :  { %2044 = vmatmul.mubr.f32.gmra.mrb[18].mxu0 %v1687_v16  ;;  %2301 = vmatmul.mubr.f32.gmra.mrb[18].mxu1 %v1687_v16 }
 0x20e   :  { %2049 = vmatprep.mubr.f32.mxu0 %v1690_v48  ;;  %2306 = vmatprep.mubr.f32.mxu1 %v1690_v48 }
 0x211   :  { %2050 = vmatmul.mubr.f32.gmra.mrb[20].mxu0 %v1689_v45  ;;  %2307 = vmatmul.mubr.f32.gmra.mrb[20].mxu1 %v1689_v45 }
 0x212   :  { %2055 = vmatprep.mubr.f32.mxu0 %v1692_v3  ;;  %2312 = vmatprep.mubr.f32.mxu1 %v1692_v3 }
 0x215   :  { %2056 = vmatmul.mubr.f32.gmra.mrb[22].mxu0 %v1691_v20  ;;  %2313 = vmatmul.mubr.f32.gmra.mrb[22].mxu1 %v1691_v20 }
 0x216   :  { %2061 = vmatprep.mubr.f32.mxu0 %v1694_v22  ;;  %2318 = vmatprep.mubr.f32.mxu1 %v1694_v22  ;;  %v1778_v22 = vpop.permute.xlu1 %1777 }
 0x219   :  { %2062 = vmatmul.mubr.f32.gmra.mrb[24].mxu0 %v1693_v40  ;;  %2319 = vmatmul.mubr.f32.gmra.mrb[24].mxu1 %v1693_v40 }
 0x21a   :  { %2067 = vmatprep.mubr.f32.mxu0 %v1696_v59  ;;  %2324 = vmatprep.mubr.f32.mxu1 %v1696_v59 }
 0x21d   :  { %2068 = vmatmul.mubr.f32.gmra.mrb[26].mxu0 %v1695_v56  ;;  %2325 = vmatmul.mubr.f32.gmra.mrb[26].mxu1 %v1695_v56 }
 0x21e   :  { %2073 = vmatprep.mubr.f32.mxu0 %v1698_v49  ;;  %2330 = vmatprep.mubr.f32.mxu1 %v1698_v49 }
 0x221   :  { %2074 = vmatmul.mubr.f32.gmra.mrb[28].mxu0 %v1697_v61  ;;  %2331 = vmatmul.mubr.f32.gmra.mrb[28].mxu1 %v1697_v61 }
 0x222   :  { %2079 = vmatprep.mubr.f32.mxu0 %v1700_v4  ;;  %2336 = vmatprep.mubr.f32.mxu1 %v1700_v4 }
 0x225   :  { %2080 = vmatmul.mubr.f32.gmra.mrb[30].mxu0 %v1699_v29  ;;  %2337 = vmatmul.mubr.f32.gmra.mrb[30].mxu1 %v1699_v29 }
 0x226   :  { %2085 = vmatprep.mubr.f32.mxu0 %v1702_v17  ;;  %2342 = vmatprep.mubr.f32.mxu1 %v1702_v17 }
 0x229   :  { %2086 = vmatmul.mubr.f32.gmra.mrb[32].mxu0 %v1701_v42  ;;  %2343 = vmatmul.mubr.f32.gmra.mrb[32].mxu1 %v1701_v42 }
 0x22a   :  { %2091 = vmatprep.mubr.f32.mxu0 %v1704_v5  ;;  %2348 = vmatprep.mubr.f32.mxu1 %v1704_v5 }
 0x22d   :  { %2092 = vmatmul.mubr.f32.gmra.mrb[34].mxu0 %v1703_v1  ;;  %2349 = vmatmul.mubr.f32.gmra.mrb[34].mxu1 %v1703_v1 }
 0x22e   :  { %2097 = vmatprep.mubr.f32.mxu0 %v1706_v14  ;;  %2354 = vmatprep.mubr.f32.mxu1 %v1706_v14 }
 0x231   :  { %2098 = vmatmul.mubr.f32.gmra.mrb[36].mxu0 %v1705_v33  ;;  %2355 = vmatmul.mubr.f32.gmra.mrb[36].mxu1 %v1705_v33 }
 0x232   :  { %2103 = vmatprep.mubr.f32.mxu0 %v1708_v35  ;;  %2360 = vmatprep.mubr.f32.mxu1 %v1708_v35 }
 0x235   :  { %2104 = vmatmul.mubr.f32.gmra.mrb[38].mxu0 %v1707_v54  ;;  %2361 = vmatmul.mubr.f32.gmra.mrb[38].mxu1 %v1707_v54  ;;  %v1783_v54 = vpop.permute.xlu0 %1782 }
 0x236   :  { %2109 = vmatprep.mubr.f32.mxu0 %v1710_v21  ;;  %2366 = vmatprep.mubr.f32.mxu1 %v1710_v21 }
 0x239   :  { %2110 = vmatmul.mubr.f32.gmra.mrb[40].mxu0 %v1709_v58  ;;  %2367 = vmatmul.mubr.f32.gmra.mrb[40].mxu1 %v1709_v58 }
 0x23a   :  { %2115 = vmatprep.mubr.f32.mxu0 %v1712_v50  ;;  %2372 = vmatprep.mubr.f32.mxu1 %v1712_v50 }
 0x23d   :  { %2116 = vmatmul.mubr.f32.gmra.mrb[42].mxu0 %v1711_v9  ;;  %2373 = vmatmul.mubr.f32.gmra.mrb[42].mxu1 %v1711_v9 }
 0x23e   :  { %2121 = vmatprep.mubr.f32.mxu0 %v1714_v34  ;;  %2378 = vmatprep.mubr.f32.mxu1 %v1714_v34 }
 0x241   :  { %2122 = vmatmul.mubr.f32.gmra.mrb[44].mxu0 %v1713_v18  ;;  %2379 = vmatmul.mubr.f32.gmra.mrb[44].mxu1 %v1713_v18 }
 0x242   :  { %2127 = vmatprep.mubr.f32.mxu0 %v1716_v10  ;;  %2384 = vmatprep.mubr.f32.mxu1 %v1716_v10 }
 0x245   :  { %2128 = vmatmul.mubr.f32.gmra.mrb[46].mxu0 %v1715_v53  ;;  %2385 = vmatmul.mubr.f32.gmra.mrb[46].mxu1 %v1715_v53 }
 0x246   :  { %2133 = vmatprep.mubr.f32.mxu0 %v1718_v28  ;;  %2390 = vmatprep.mubr.f32.mxu1 %v1718_v28 }
 0x249   :  { %2134 = vmatmul.mubr.f32.gmra.mrb[48].mxu0 %v1717_v25  ;;  %2391 = vmatmul.mubr.f32.gmra.mrb[48].mxu1 %v1717_v25 }
 0x24a   :  { %2139 = vmatprep.mubr.f32.mxu0 %v1720_v43  ;;  %2396 = vmatprep.mubr.f32.mxu1 %v1720_v43 }
 0x24d   :  { %2140 = vmatmul.mubr.f32.gmra.mrb[50].mxu0 %v1719_v0  ;;  %2397 = vmatmul.mubr.f32.gmra.mrb[50].mxu1 %v1719_v0 }
 0x24e   :  { %2145 = vmatprep.mubr.f32.mxu0 %v1722_v51  ;;  %2402 = vmatprep.mubr.f32.mxu1 %v1722_v51 }
 0x251   :  { %2146 = vmatmul.mubr.f32.gmra.mrb[52].mxu0 %v1721_v55  ;;  %2403 = vmatmul.mubr.f32.gmra.mrb[52].mxu1 %v1721_v55  ;;  %v1788_v55 = vpop.permute.xlu1 %1787 }
 0x252   :  { %2151 = vmatprep.mubr.f32.mxu0 %v1724_v39  ;;  %2408 = vmatprep.mubr.f32.mxu1 %v1724_v39 }
 0x255   :  { %2152 = vmatmul.mubr.f32.gmra.mrb[54].mxu0 %v1723_v19  ;;  %2409 = vmatmul.mubr.f32.gmra.mrb[54].mxu1 %v1723_v19 }
 0x256   :  { %2157 = vmatprep.mubr.f32.mxu0 %v1726_v23  ;;  %2414 = vmatprep.mubr.f32.mxu1 %v1726_v23 }
 0x259   :  { %2158 = vmatmul.mubr.f32.gmra.mrb[56].mxu0 %v1725_v36  ;;  %2415 = vmatmul.mubr.f32.gmra.mrb[56].mxu1 %v1725_v36 }
 0x25a   :  { %2163 = vmatprep.mubr.f32.mxu0 %v1728_v52  ;;  %2420 = vmatprep.mubr.f32.mxu1 %v1728_v52 }
 0x25d   :  { %2164 = vmatmul.mubr.f32.gmra.mrb[58].mxu0 %v1727_v37  ;;  %2421 = vmatmul.mubr.f32.gmra.mrb[58].mxu1 %v1727_v37 }
 0x25e   :  { %2169 = vmatprep.mubr.f32.mxu0 %v1730_v11  ;;  %2426 = vmatprep.mubr.f32.mxu1 %v1730_v11 }
 0x261   :  { %2170 = vmatmul.mubr.f32.gmra.mrb[60].mxu0 %v1729_v6  ;;  %2427 = vmatmul.mubr.f32.gmra.mrb[60].mxu1 %v1729_v6 }
 0x262   :  { %2175 = vmatprep.mubr.f32.mxu0 %v1732_v62  ;;  %2432 = vmatprep.mubr.f32.mxu1 %v1732_v62 }
 0x265   :  { %2176 = vmatmul.mubr.f32.gmra.mrb[62].mxu0 %v1731_v30  ;;  %2433 = vmatmul.mubr.f32.gmra.mrb[62].mxu1 %v1731_v30 }
 0x2bc   :  { %v1991_v26 = vpop.f32.mrb[0].mxu0  ;;  %v2248_v8 = vpop.f32.mrb[0].mxu1 }
 0x2bd   :  { %v6286_v15 = vadd.f32 %v1991_v26, %v1768_v38  ;;  %v6288_v44 = vadd.f32 %v2248_v8, %v1768_v38  ;;  %v1993_v31 = vpop.f32.mrb[1].mxu0  ;;  %v2250_v12 = vpop.f32.mrb[1].mxu1 }
 0x2be   :  { %v6290_v32 = vadd.f32 %v1993_v31, %v1768_v38  ;;  %v6292_v47 = vadd.f32 %v2250_v12, %v1768_v38  ;;  %v1793_v12 = vpop.permute.xlu0 %1792 }
 0x2bf   :  { %v2439_v7 = vmul.f32 %v6286_v15, %v6286_v15  ;;  %v3015_v24 = vmul.f32 %v6288_v44, %v6288_v44 }
 0x2c0   :  { %v2440_v2 = vmul.f32 %v6290_v32, %v6290_v32  ;;  %v3016_v46 = vmul.f32 %v6292_v47, %v6292_v47  ;;  %v1997_v41 = vpop.f32.mrb[2].mxu0  ;;  %v2254_v57 = vpop.f32.mrb[2].mxu1 }
 0x2c1   :  { %v6302_v63 = vadd.f32 %v1997_v41, %v1773_v27  ;;  %v6304_v13 = vadd.f32 %v2254_v57, %v1773_v27  ;;  %v1999_v60 = vpop.f32.mrb[3].mxu0  ;;  %v2256_v16 = vpop.f32.mrb[3].mxu1 }
 0x2c2   :  { %v6306_v48 = vadd.f32 %v1999_v60, %v1773_v27  ;;  %v6308_v45 = vadd.f32 %v2256_v16, %v1773_v27  ;;  %v3079_v3 = vadd.f32 %v3016_v46, %v3015_v24  ;;  %v2503_v20 = vadd.f32 %v2440_v2, %v2439_v7 }
 0x2c3   :  { %v2441_v40 = vmul.f32 %v6302_v63, %v6302_v63  ;;  %v3017_v59 = vmul.f32 %v6304_v13, %v6304_v13 }
 0x2c4   :  { %v2442_v56 = vmul.f32 %v6306_v48, %v6306_v48  ;;  %v3018_v49 = vmul.f32 %v6308_v45, %v6308_v45  ;;  %v2260_v61 = vpop.f32.mrb[4].mxu1  ;;  %3080 = vadd.xlane.f32.xlu0 %v3079_v3  ;;  %v2003_v4 = vpop.f32.mrb[4].mxu0  ;;  %2504 = vadd.xlane.f32.xlu1 %v2503_v20 }
 0x2c5   :  { %v6318_v29 = vadd.f32 %v2260_v61, %v1778_v22  ;;  %v6320_v17 = vadd.f32 %v2003_v4, %v1778_v22  ;;  %v2005_v42 = vpop.f32.mrb[5].mxu0  ;;  %v2262_v5 = vpop.f32.mrb[5].mxu1 }
 0x2c6   :  { %v6322_v1 = vadd.f32 %v2005_v42, %v1778_v22  ;;  %v6324_v14 = vadd.f32 %v2262_v5, %v1778_v22  ;;  %v2506_v33 = vadd.f32 %v2442_v56, %v2441_v40  ;;  %v3082_v35 = vadd.f32 %v3018_v49, %v3017_v59  ;;  %v1798_v56 = vpop.permute.xlu1 %1797 }
 0x2c7   :  { %v2443_v21 = vmul.f32 %v6320_v17, %v6320_v17  ;;  %v3019_v34 = vmul.f32 %v6318_v29, %v6318_v29 }
 0x2c8   :  { %v2444_v58 = vmul.f32 %v6322_v1, %v6322_v1  ;;  %v2009_v50 = vpop.f32.mrb[6].mxu0  ;;  %v2266_v9 = vpop.f32.mrb[6].mxu1  ;;  %2507 = vadd.xlane.f32.xlu0 %v2506_v33  ;;  %3083 = vadd.xlane.f32.xlu1 %v3082_v35  ;;  %v3020_v25 = vmul.f32 %v6324_v14, %v6324_v14 }
 0x2c9   :  { %v6332_v18 = vadd.f32 %v2009_v50, %v1783_v54  ;;  %v6334_v10 = vadd.f32 %v2266_v9, %v1783_v54  ;;  %v2011_v53 = vpop.f32.mrb[7].mxu0  ;;  %v2268_v28 = vpop.f32.mrb[7].mxu1 }
 0x2ca   :  { %v6338_v43 = vadd.f32 %v2011_v53, %v1783_v54  ;;  %v6340_v0 = vadd.f32 %v2268_v28, %v1783_v54  ;;  %v2509_v51 = vadd.f32 %v2444_v58, %v2443_v21  ;;  %v3085_v8 = vadd.f32 %v3020_v25, %v3019_v34  ;;  %v1803_v28 = vpop.permute.xlu0 %1802 }
 0x2cb   :  { %v2445_v39 = vmul.f32 %v6332_v18, %v6332_v18  ;;  %v3021_v52 = vmul.f32 %v6334_v10, %v6334_v10 }
 0x2cc   :  { %v2446_v19 = vmul.f32 %v6338_v43, %v6338_v43  ;;  %v2015_v23 = vpop.f32.mrb[8].mxu0  ;;  %v2272_v36 = vpop.f32.mrb[8].mxu1  ;;  %2510 = vadd.xlane.f32.xlu0 %v2509_v51  ;;  %v3022_v37 = vmul.f32 %v6340_v0, %v6340_v0 }
 0x2cd   :  { %v6350_v11 = vadd.f32 %v2015_v23, %v1788_v55  ;;  %v6352_v6 = vadd.f32 %v2272_v36, %v1788_v55  ;;  %v2017_v62 = vpop.f32.mrb[9].mxu0  ;;  %v2274_v30 = vpop.f32.mrb[9].mxu1 }
 0x2ce   :  { %v6354_v38 = vadd.f32 %v2017_v62, %v1788_v55  ;;  %v6356_v26 = vadd.f32 %v2274_v30, %v1788_v55  ;;  %v2512_v31 = vadd.f32 %v2446_v19, %v2445_v39  ;;  %v3088_v3 = vadd.f32 %v3022_v37, %v3021_v52 }
 0x2cf   :  { %v2447_v27 = vmul.f32 %v6350_v11, %v6350_v11  ;;  %v3023_v46 = vmul.f32 %v6352_v6, %v6352_v6 }
 0x2d0   :  { %v2448_v7 = vmul.f32 %v6354_v38, %v6354_v38  ;;  %v2021_v24 = vpop.f32.mrb[10].mxu0  ;;  %v2278_v2 = vpop.f32.mrb[10].mxu1  ;;  %3086 = vadd.xlane.f32.xlu0 %v3085_v8  ;;  %2513 = vadd.xlane.f32.xlu1 %v2512_v31  ;;  %v3024_v20 = vmul.f32 %v6356_v26, %v6356_v26 }
 0x2d1   :  { %v6364_v41 = vadd.f32 %v2021_v24, %v1793_v12  ;;  %v6366_v57 = vadd.f32 %v2278_v2, %v1793_v12  ;;  %v2023_v60 = vpop.f32.mrb[11].mxu0  ;;  %v2280_v16 = vpop.f32.mrb[11].mxu1 }
 0x2d2   :  { %v6370_v22 = vadd.f32 %v2023_v60, %v1793_v12  ;;  %v6372_v40 = vadd.f32 %v2280_v16, %v1793_v12  ;;  %v2515_v59 = vadd.f32 %v2448_v7, %v2447_v27  ;;  %v3091_v34 = vadd.f32 %v3024_v20, %v3023_v46  ;;  %v1808_v27 = vpop.permute.xlu1 %1807 }
 0x2d3   :  { %v2449_v49 = vmul.f32 %v6364_v41, %v6364_v41  ;;  %v3025_v5 = vmul.f32 %v6366_v57, %v6366_v57 }
 0x2d4   :  { %v2450_v61 = vmul.f32 %v6370_v22, %v6370_v22  ;;  %v2027_v4 = vpop.f32.mrb[12].mxu0  ;;  %v2284_v42 = vpop.f32.mrb[12].mxu1  ;;  %2516 = vadd.xlane.f32.xlu0 %v2515_v59  ;;  %3089 = vadd.xlane.f32.xlu1 %v3088_v3  ;;  %v3026_v33 = vmul.f32 %v6372_v40, %v6372_v40 }
 0x2d5   :  { %v6382_v35 = vadd.f32 %v2027_v4, %v1798_v56  ;;  %v6384_v54 = vadd.f32 %v2284_v42, %v1798_v56  ;;  %v2029_v21 = vpop.f32.mrb[13].mxu0  ;;  %v2286_v58 = vpop.f32.mrb[13].mxu1 }
 0x2d6   :  { %v6386_v50 = vadd.f32 %v2029_v21, %v1798_v56  ;;  %v6388_v9 = vadd.f32 %v2286_v58, %v1798_v56  ;;  %v2518_v53 = vadd.f32 %v2450_v61, %v2449_v49  ;;  %v3094_v62 = vadd.f32 %v3026_v33, %v3025_v5  ;;  %v1813_v5 = vpop.permute.xlu0 %1812 }
 0x2d7   :  { %v2451_v25 = vmul.f32 %v6382_v35, %v6382_v35  ;;  %v3027_v19 = vmul.f32 %v6384_v54, %v6384_v54 }
 0x2d8   :  { %v2452_v51 = vmul.f32 %v6386_v50, %v6386_v50  ;;  %v2033_v55 = vpop.f32.mrb[14].mxu0  ;;  %v2290_v39 = vpop.f32.mrb[14].mxu1  ;;  %3092 = vadd.xlane.f32.xlu0 %v3091_v34  ;;  %2519 = vadd.xlane.f32.xlu1 %v2518_v53  ;;  %v3028_v30 = vmul.f32 %v6388_v9, %v6388_v9 }
 0x2d9   :  { %v6396_v23 = vadd.f32 %v2033_v55, %v1803_v28  ;;  %v6398_v36 = vadd.f32 %v2290_v39, %v1803_v28  ;;  %v2035_v52 = vpop.f32.mrb[15].mxu0  ;;  %v2292_v37 = vpop.f32.mrb[15].mxu1 }
 0x2da   :  { %v6402_v8 = vadd.f32 %v2035_v52, %v1803_v28  ;;  %v6404_v31 = vadd.f32 %v2292_v37, %v1803_v28  ;;  %v2521_v12 = vadd.f32 %v2452_v51, %v2451_v25  ;;  %v3097_v4 = vadd.f32 %v3028_v30, %v3027_v19  ;;  %v1818_v30 = vpop.permute.xlu1 %1817 }
 0x2db   :  { %v2453_v7 = vmul.f32 %v6396_v23, %v6396_v23  ;;  %v3029_v60 = vmul.f32 %v6398_v36, %v6398_v36 }
 0x2dc   :  { %v2454_v24 = vmul.f32 %v6402_v8, %v6402_v8  ;;  %v2039_v2 = vpop.f32.mrb[16].mxu0  ;;  %v2296_v46 = vpop.f32.mrb[16].mxu1  ;;  %2522 = vadd.xlane.f32.xlu0 %v2521_v12  ;;  %3095 = vadd.xlane.f32.xlu1 %v3094_v62  ;;  %v3030_v16 = vmul.f32 %v6404_v31, %v6404_v31 }
 0x2dd   :  { %v6414_v3 = vadd.f32 %v2039_v2, %v1808_v27  ;;  %v6416_v20 = vadd.f32 %v2296_v46, %v1808_v27  ;;  %v2041_v59 = vpop.f32.mrb[17].mxu0  ;;  %v2298_v56 = vpop.f32.mrb[17].mxu1 }
 0x2de   :  { %v6418_v49 = vadd.f32 %v2041_v59, %v1808_v27  ;;  %v6420_v61 = vadd.f32 %v2298_v56, %v1808_v27  ;;  %v2524_v42 = vadd.f32 %v2454_v24, %v2453_v7  ;;  %v3100_v39 = vadd.f32 %v3030_v16, %v3029_v60 }
 0x2df   :  { %v2455_v33 = vmul.f32 %v6414_v3, %v6414_v3  ;;  %v3031_v53 = vmul.f32 %v6416_v20, %v6416_v20 }
 0x2e0   :  { %v2456_v21 = vmul.f32 %v6418_v49, %v6418_v49  ;;  %v2045_v58 = vpop.f32.mrb[18].mxu0  ;;  %v2302_v34 = vpop.f32.mrb[18].mxu1  ;;  %3098 = vadd.xlane.f32.xlu0 %v3097_v4  ;;  %2525 = vadd.xlane.f32.xlu1 %v2524_v42  ;;  %v3032_v19 = vmul.f32 %v6420_v61, %v6420_v61 }
 0x2e1   :  { %v6428_v28 = vadd.f32 %v2045_v58, %v1813_v5  ;;  %v6430_v25 = vadd.f32 %v2302_v34, %v1813_v5  ;;  %v2047_v51 = vpop.f32.mrb[19].mxu0  ;;  %v2304_v55 = vpop.f32.mrb[19].mxu1 }
 0x2e2   :  { %v6434_v52 = vadd.f32 %v2047_v51, %v1813_v5  ;;  %v6436_v37 = vadd.f32 %v2304_v55, %v1813_v5  ;;  %v2527_v62 = vadd.f32 %v2456_v21, %v2455_v33  ;;  %v3103_v5 = vadd.f32 %v3032_v19, %v3031_v53  ;;  %v1823_v21 = vpop.permute.xlu0 %1822 }
 0x2e3   :  { %8021 = vst [vmem:[#allocation52_spill] sm:$0xff] %v6430_v25  ;;  %v2457_v12 = vmul.f32 %v6428_v28, %v6428_v28  ;;  %v3033_v2 = vmul.f32 %v6430_v25, %v6430_v25 }
 0x2e4   :  { %8022 = vst [vmem:[#allocation57_spill] sm:$0xff] %v6436_v37  ;;  %v2458_v27 = vmul.f32 %v6434_v52, %v6434_v52  ;;  %v2051_v7 = vpop.f32.mrb[20].mxu0  ;;  %v2308_v24 = vpop.f32.mrb[20].mxu1  ;;  %2528 = vadd.xlane.f32.xlu0 %v2527_v62  ;;  %3101 = vadd.xlane.f32.xlu1 %v3100_v39  ;;  %v3034_v46 = vmul.f32 %v6436_v37, %v6436_v37 }
 0x2e5   :  { %v6446_v60 = vadd.f32 %v2051_v7, %v1818_v30  ;;  %v6448_v16 = vadd.f32 %v2308_v24, %v1818_v30  ;;  %v2053_v59 = vpop.f32.mrb[21].mxu0  ;;  %v2310_v56 = vpop.f32.mrb[21].mxu1 }
 0x2e6   :  { %v6450_v4 = vadd.f32 %v2053_v59, %v1818_v30  ;;  %v6452_v42 = vadd.f32 %v2310_v56, %v1818_v30  ;;  %v2530_v33 = vadd.f32 %v2458_v27, %v2457_v12  ;;  %v3106_v12 = vadd.f32 %v3034_v46, %v3033_v2  ;;  %v1828_v56 = vpop.permute.xlu1 %1827 }
 0x2e7   :  { %8023 = vst [vmem:[#allocation59_spill] sm:$0xff] %v6448_v16  ;;  %v2459_v58 = vmul.f32 %v6446_v60, %v6446_v60  ;;  %v3035_v39 = vmul.f32 %v6448_v16, %v6448_v16 }
 0x2e8   :  { %8024 = vst [vmem:[#allocation56_spill] sm:$0xff] %v6452_v42  ;;  %v2460_v34 = vmul.f32 %v6450_v4, %v6450_v4  ;;  %v2057_v51 = vpop.f32.mrb[22].mxu0  ;;  %v2314_v55 = vpop.f32.mrb[22].mxu1  ;;  %3104 = vadd.xlane.f32.xlu0 %v3103_v5  ;;  %2531 = vadd.xlane.f32.xlu1 %v2530_v33  ;;  %v3036_v27 = vmul.f32 %v6452_v42, %v6452_v42 }
 0x2e9   :  { %v6460_v62 = vadd.f32 %v2057_v51, %v1823_v21  ;;  %v6462_v30 = vadd.f32 %v2314_v55, %v1823_v21  ;;  %v2059_v53 = vpop.f32.mrb[23].mxu0  ;;  %v2316_v19 = vpop.f32.mrb[23].mxu1 }
 0x2ea   :  { %v6466_v7 = vadd.f32 %v2059_v53, %v1823_v21  ;;  %v6468_v24 = vadd.f32 %v2316_v19, %v1823_v21  ;;  %v2533_v59 = vadd.f32 %v2460_v34, %v2459_v58 }
 0x2eb   :  { %8025 = vst [vmem:[#allocation58_spill] sm:$0xff] %v6460_v62  ;;  %8026 = vst [vmem:[#allocation25_spill] sm:$0xff] %v6462_v30  ;;  %v2461_v5 = vmul.f32 %v6460_v62, %v6460_v62  ;;  %v3037_v2 = vmul.f32 %v6462_v30, %v6462_v30 }
 0x2ec   :  { %8027 = vst [vmem:[#allocation7_spill] sm:$0xff] %v6466_v7  ;;  %8028 = vst [vmem:[#allocation63_spill] sm:$0xff] %v6468_v24  ;;  %v2462_v33 = vmul.f32 %v6466_v7, %v6466_v7  ;;  %v2063_v51 = vpop.f32.mrb[24].mxu0  ;;  %v2320_v55 = vpop.f32.mrb[24].mxu1  ;;  %2534 = vadd.xlane.f32.xlu0 %v2533_v59  ;;  %3107 = vadd.xlane.f32.xlu1 %v3106_v12  ;;  %v3038_v46 = vmul.f32 %v6468_v24, %v6468_v24 }
 0x2ed   :  { %v6478_v21 = vadd.f32 %v2063_v51, %v1828_v56  ;;  %v6480_v58 = vadd.f32 %v2320_v55, %v1828_v56  ;;  %v2065_v34 = vpop.f32.mrb[25].mxu0  ;;  %v2322_v53 = vpop.f32.mrb[25].mxu1  ;;  %v3109_v7 = vadd.f32 %v3036_v27, %v3035_v39 }
 0x2ee   :  { %v6482_v19 = vadd.f32 %v2065_v34, %v1828_v56  ;;  %v6484_v62 = vadd.f32 %v2322_v53, %v1828_v56  ;;  %v2536_v42 = vadd.f32 %v2462_v33, %v2461_v5  ;;  %v1833_v59 = vpop.permute.xlu0 %1832  ;;  %v3112_v5 = vadd.f32 %v3038_v46, %v3037_v2 }
 0x2ef   :  { %8029 = vst [vmem:[#allocation26_spill] sm:$0xff] %v6478_v21  ;;  %8030 = vst [vmem:[#allocation8_spill] sm:$0xff] %v6480_v58  ;;  %v2463_v12 = vmul.f32 %v6478_v21, %v6478_v21  ;;  %v3039_v55 = vmul.f32 %v6480_v58, %v6480_v58 }
 0x2f0   :  { %8031 = vst [vmem:[#allocation65_spill] sm:$0xff] %v6482_v19  ;;  %8032 = vst [vmem:[#allocation62_spill] sm:$0xff] %v6484_v62  ;;  %v2464_v30 = vmul.f32 %v6482_v19, %v6482_v19  ;;  %v2069_v24 = vpop.f32.mrb[26].mxu0  ;;  %v2326_v51 = vpop.f32.mrb[26].mxu1  ;;  %3110 = vadd.xlane.f32.xlu0 %v3109_v7  ;;  %2537 = vadd.xlane.f32.xlu1 %v2536_v42  ;;  %v3040_v33 = vmul.f32 %v6484_v62, %v6484_v62 }
 0x2f1   :  { %v6492_v34 = vadd.f32 %v2069_v24, %v1833_v59  ;;  %v6494_v56 = vadd.f32 %v2326_v51, %v1833_v59  ;;  %v2071_v39 = vpop.f32.mrb[27].mxu0  ;;  %v2328_v27 = vpop.f32.mrb[27].mxu1 }
 0x2f2   :  { %v6498_v53 = vadd.f32 %v2071_v39, %v1833_v59  ;;  %v6500_v19 = vadd.f32 %v2328_v27, %v1833_v59  ;;  %v2539_v21 = vadd.f32 %v2464_v30, %v2463_v12  ;;  %v1838_v7 = vpop.permute.xlu1 %1837 }
 0x2f3   :  { %8033 = vst [vmem:[#allocation64_spill] sm:$0xff] %v6492_v34  ;;  %8034 = vst [vmem:[#allocation81_spill] sm:$0xff] %v6494_v56  ;;  %v2465_v42 = vmul.f32 %v6492_v34, %v6492_v34  ;;  %v3041_v2 = vmul.f32 %v6494_v56, %v6494_v56 }
 0x2f4   :  { %8035 = vst [vmem:[#allocation82_spill] sm:$0xff] %v6498_v53  ;;  %8036 = vst [vmem:[#allocation83_spill] sm:$0xff] %v6500_v19  ;;  %v2466_v24 = vmul.f32 %v6498_v53, %v6498_v53  ;;  %v2075_v51 = vpop.f32.mrb[28].mxu0  ;;  %v2332_v58 = vpop.f32.mrb[28].mxu1  ;;  %2540 = vadd.xlane.f32.xlu0 %v2539_v21  ;;  %3113 = vadd.xlane.f32.xlu1 %v3112_v5  ;;  %v3042_v46 = vmul.f32 %v6500_v19, %v6500_v19 }
 0x2f5   :  { %v6510_v59 = vadd.f32 %v2075_v51, %v1838_v7  ;;  %v6512_v30 = vadd.f32 %v2332_v58, %v1838_v7  ;;  %v2077_v12 = vpop.f32.mrb[29].mxu0  ;;  %v2334_v39 = vpop.f32.mrb[29].mxu1  ;;  %v3115_v53 = vadd.f32 %v3040_v33, %v3039_v55 }
 0x2f6   :  { %v6514_v27 = vadd.f32 %v2077_v12, %v1838_v7  ;;  %v6516_v34 = vadd.f32 %v2334_v39, %v1838_v7  ;;  %v2542_v62 = vadd.f32 %v2466_v24, %v2465_v42  ;;  %v1843_v21 = vpop.permute.xlu0 %1842  ;;  %v3118_v42 = vadd.f32 %v3042_v46, %v3041_v2 }
 0x2f7   :  { %8037 = vst [vmem:[#allocation84_spill] sm:$0xff] %v6510_v59  ;;  %8038 = vst [vmem:[#allocation90_spill] sm:$0xff] %v6512_v30  ;;  %v2467_v5 = vmul.f32 %v6510_v59, %v6510_v59  ;;  %v3043_v58 = vmul.f32 %v6512_v30, %v6512_v30 }
 0x2f8   :  { %8039 = vst [vmem:[#allocation97_spill] sm:$0xff] %v6514_v27  ;;  %8040 = vst [vmem:[#allocation61_spill] sm:$0xff] %v6516_v34  ;;  %v2468_v56 = vmul.f32 %v6514_v27, %v6514_v27  ;;  %v2081_v19 = vpop.f32.mrb[30].mxu0  ;;  %v2338_v51 = vpop.f32.mrb[30].mxu1  ;;  %3116 = vadd.xlane.f32.xlu0 %v3115_v53  ;;  %2543 = vadd.xlane.f32.xlu1 %v2542_v62  ;;  %v3044_v24 = vmul.f32 %v6516_v34, %v6516_v34 }
 0x2f9   :  { %v6524_v12 = vadd.f32 %v2081_v19, %v1843_v21  ;;  %v6526_v7 = vadd.f32 %v2338_v51, %v1843_v21  ;;  %v2083_v55 = vpop.f32.mrb[31].mxu0  ;;  %v2340_v33 = vpop.f32.mrb[31].mxu1 }
 0x2fa   :  { %v6530_v39 = vadd.f32 %v2083_v55, %v1843_v21  ;;  %v6532_v27 = vadd.f32 %v2340_v33, %v1843_v21  ;;  %v2545_v59 = vadd.f32 %v2468_v56, %v2467_v5  ;;  %v1848_v53 = vpop.permute.xlu1 %1847 }
 0x2fb   :  { %8041 = vst [vmem:[#allocation67_spill] sm:$0xff] %v6524_v12  ;;  %8042 = vst [vmem:[#allocation43_spill] sm:$0xff] %v6526_v7  ;;  %v2469_v62 = vmul.f32 %v6524_v12, %v6524_v12  ;;  %v3045_v2 = vmul.f32 %v6526_v7, %v6526_v7 }
 0x2fc   :  { %8043 = vst [vmem:[#allocation91_spill] sm:$0xff] %v6530_v39  ;;  %8044 = vst [vmem:[#allocation55_spill] sm:$0xff] %v6532_v27  ;;  %v2470_v19 = vmul.f32 %v6530_v39, %v6530_v39  ;;  %v2087_v51 = vpop.f32.mrb[32].mxu0  ;;  %v2344_v30 = vpop.f32.mrb[32].mxu1  ;;  %2546 = vadd.xlane.f32.xlu0 %v2545_v59  ;;  %3119 = vadd.xlane.f32.xlu1 %v3118_v42  ;;  %v3046_v46 = vmul.f32 %v6532_v27, %v6532_v27 }
 0x2fd   :  { %v6542_v21 = vadd.f32 %v2087_v51, %v1848_v53  ;;  %v6544_v56 = vadd.f32 %v2344_v30, %v1848_v53  ;;  %v2089_v5 = vpop.f32.mrb[33].mxu0  ;;  %v2346_v55 = vpop.f32.mrb[33].mxu1  ;;  %v3121_v39 = vadd.f32 %v3044_v24, %v3043_v58 }
 0x2fe   :  { %v6546_v33 = vadd.f32 %v2089_v5, %v1848_v53  ;;  %v6548_v12 = vadd.f32 %v2346_v55, %v1848_v53  ;;  %v2548_v34 = vadd.f32 %v2470_v19, %v2469_v62  ;;  %v1853_v59 = vpop.permute.xlu0 %1852  ;;  %v3124_v62 = vadd.f32 %v3046_v46, %v3045_v2 }
 0x2ff   :  { %8045 = vst [vmem:[#allocation92_spill] sm:$0xff] %v6542_v21  ;;  %8046 = vst [vmem:[#allocation79_spill] sm:$0xff] %v6544_v56  ;;  %v2471_v42 = vmul.f32 %v6542_v21, %v6542_v21  ;;  %v3047_v30 = vmul.f32 %v6544_v56, %v6544_v56 }
 0x300   :  { %8047 = vst [vmem:[#allocation85_spill] sm:$0xff] %v6546_v33  ;;  %8048 = vst [vmem:[#allocation86_spill] sm:$0xff] %v6548_v12  ;;  %v2472_v7 = vmul.f32 %v6546_v33, %v6546_v33  ;;  %v2093_v27 = vpop.f32.mrb[34].mxu0  ;;  %v2350_v51 = vpop.f32.mrb[34].mxu1  ;;  %3122 = vadd.xlane.f32.xlu0 %v3121_v39  ;;  %2549 = vadd.xlane.f32.xlu1 %v2548_v34  ;;  %v3048_v19 = vmul.f32 %v6548_v12, %v6548_v12 }
 0x301   :  { %v6556_v5 = vadd.f32 %v2093_v27, %v1853_v59  ;;  %v6558_v53 = vadd.f32 %v2350_v51, %v1853_v59  ;;  %v2095_v58 = vpop.f32.mrb[35].mxu0  ;;  %v2352_v24 = vpop.f32.mrb[35].mxu1 }
 0x302   :  { %v6562_v55 = vadd.f32 %v2095_v58, %v1853_v59  ;;  %v6564_v33 = vadd.f32 %v2352_v24, %v1853_v59  ;;  %v2551_v21 = vadd.f32 %v2472_v7, %v2471_v42  ;;  %v1858_v39 = vpop.permute.xlu1 %1857 }
 0x303   :  { %8049 = vst [vmem:[#allocation94_spill] sm:$0xff] %v6556_v5  ;;  %8050 = vst [vmem:[#allocation27_spill] sm:$0xff] %v6558_v53  ;;  %v2473_v34 = vmul.f32 %v6556_v5, %v6556_v5  ;;  %v3049_v2 = vmul.f32 %v6558_v53, %v6558_v53 }
 0x304   :  { %8051 = vst [vmem:[#allocation88_spill] sm:$0xff] %v6562_v55  ;;  %8052 = vst [vmem:[#allocation89_spill] sm:$0xff] %v6564_v33  ;;  %v2474_v27 = vmul.f32 %v6562_v55, %v6562_v55  ;;  %v2099_v51 = vpop.f32.mrb[36].mxu0  ;;  %v2356_v56 = vpop.f32.mrb[36].mxu1  ;;  %2552 = vadd.xlane.f32.xlu0 %v2551_v21  ;;  %3125 = vadd.xlane.f32.xlu1 %v3124_v62  ;;  %v3050_v46 = vmul.f32 %v6564_v33, %v6564_v33 }
 0x305   :  { %v6574_v59 = vadd.f32 %v2099_v51, %v1858_v39  ;;  %v6576_v7 = vadd.f32 %v2356_v56, %v1858_v39  ;;  %v2101_v42 = vpop.f32.mrb[37].mxu0  ;;  %v2358_v58 = vpop.f32.mrb[37].mxu1  ;;  %v3127_v55 = vadd.f32 %v3048_v19, %v3047_v30 }
 0x306   :  { %v6578_v24 = vadd.f32 %v2101_v42, %v1858_v39  ;;  %v6580_v5 = vadd.f32 %v2358_v58, %v1858_v39  ;;  %v2554_v12 = vadd.f32 %v2474_v27, %v2473_v34  ;;  %v1863_v21 = vpop.permute.xlu0 %1862  ;;  %v3130_v34 = vadd.f32 %v3050_v46, %v3049_v2 }
 0x307   :  { %8053 = vst [vmem:[#allocation95_spill] sm:$0xff] %v6574_v59  ;;  %8054 = vst [vmem:[#allocation96_spill] sm:$0xff] %v6576_v7  ;;  %v2475_v62 = vmul.f32 %v6574_v59, %v6574_v59  ;;  %v3051_v56 = vmul.f32 %v6576_v7, %v6576_v7 }
 0x308   :  { %8055 = vst [vmem:[#allocation80_spill] sm:$0xff] %v6578_v24  ;;  %8056 = vst [vmem:[#allocation5_spill] sm:$0xff] %v6580_v5  ;;  %v2476_v53 = vmul.f32 %v6578_v24, %v6578_v24  ;;  %v2105_v33 = vpop.f32.mrb[38].mxu0  ;;  %v2362_v51 = vpop.f32.mrb[38].mxu1  ;;  %3128 = vadd.xlane.f32.xlu0 %v3127_v55  ;;  %2555 = vadd.xlane.f32.xlu1 %v2554_v12  ;;  %v3052_v27 = vmul.f32 %v6580_v5, %v6580_v5 }
 0x309   :  { %v6588_v42 = vadd.f32 %v2105_v33, %v1863_v21  ;;  %v6590_v39 = vadd.f32 %v2362_v51, %v1863_v21  ;;  %v2107_v30 = vpop.f32.mrb[39].mxu0  ;;  %v2364_v19 = vpop.f32.mrb[39].mxu1 }
 0x30a   :  { %v6594_v58 = vadd.f32 %v2107_v30, %v1863_v21  ;;  %v6596_v24 = vadd.f32 %v2364_v19, %v1863_v21  ;;  %v2557_v59 = vadd.f32 %v2476_v53, %v2475_v62  ;;  %v1868_v55 = vpop.permute.xlu1 %1867 }
 0x30b   :  { %8057 = vst [vmem:[#allocation38_spill] sm:$0xff] %v6588_v42  ;;  %8058 = vst [vmem:[#allocation60_spill] sm:$0xff] %v6590_v39  ;;  %v2477_v12 = vmul.f32 %v6588_v42, %v6588_v42  ;;  %v3053_v2 = vmul.f32 %v6590_v39, %v6590_v39 }
 0x30c   :  { %8059 = vst [vmem:[#allocation54_spill] sm:$0xff] %v6594_v58  ;;  %8060 = vst [vmem:[#allocation37_spill] sm:$0xff] %v6596_v24  ;;  %v2478_v33 = vmul.f32 %v6594_v58, %v6594_v58  ;;  %v2111_v51 = vpop.f32.mrb[40].mxu0  ;;  %v2368_v7 = vpop.f32.mrb[40].mxu1  ;;  %2558 = vadd.xlane.f32.xlu0 %v2557_v59  ;;  %3131 = vadd.xlane.f32.xlu1 %v3130_v34  ;;  %v3054_v46 = vmul.f32 %v6596_v24, %v6596_v24 }
 0x30d   :  { %v6606_v21 = vadd.f32 %v2111_v51, %v1868_v55  ;;  %v6608_v53 = vadd.f32 %v2368_v7, %v1868_v55  ;;  %v2113_v62 = vpop.f32.mrb[41].mxu0  ;;  %v2370_v30 = vpop.f32.mrb[41].mxu1  ;;  %v3133_v58 = vadd.f32 %v3052_v27, %v3051_v56 }
 0x30e   :  { %v6610_v19 = vadd.f32 %v2113_v62, %v1868_v55  ;;  %v6612_v42 = vadd.f32 %v2370_v30, %v1868_v55  ;;  %v2560_v5 = vadd.f32 %v2478_v33, %v2477_v12  ;;  %v1873_v59 = vpop.permute.xlu0 %1872  ;;  %v3136_v12 = vadd.f32 %v3054_v46, %v3053_v2 }
 0x30f   :  { %8061 = vst [vmem:[#allocation46_spill] sm:$0xff] %v6606_v21  ;;  %8062 = vst [vmem:[#allocation28_spill] sm:$0xff] %v6608_v53  ;;  %v2479_v34 = vmul.f32 %v6606_v21, %v6606_v21  ;;  %v3055_v7 = vmul.f32 %v6608_v53, %v6608_v53 }
 0x310   :  { %8063 = vst [vmem:[#allocation45_spill] sm:$0xff] %v6610_v19  ;;  %8064 = vst [vmem:[#allocation51_spill] sm:$0xff] %v6612_v42  ;;  %v2480_v39 = vmul.f32 %v6610_v19, %v6610_v19  ;;  %v2117_v24 = vpop.f32.mrb[42].mxu0  ;;  %v2374_v51 = vpop.f32.mrb[42].mxu1  ;;  %3134 = vadd.xlane.f32.xlu0 %v3133_v58  ;;  %2561 = vadd.xlane.f32.xlu1 %v2560_v5  ;;  %v3056_v33 = vmul.f32 %v6612_v42, %v6612_v42 }
 0x311   :  { %v6620_v62 = vadd.f32 %v2117_v24, %v1873_v59  ;;  %v6622_v55 = vadd.f32 %v2374_v51, %v1873_v59  ;;  %v2119_v56 = vpop.f32.mrb[43].mxu0  ;;  %v2376_v27 = vpop.f32.mrb[43].mxu1 }
 0x312   :  { %v6626_v30 = vadd.f32 %v2119_v56, %v1873_v59  ;;  %v6628_v19 = vadd.f32 %v2376_v27, %v1873_v59  ;;  %v2563_v21 = vadd.f32 %v2480_v39, %v2479_v34  ;;  %v1878_v58 = vpop.permute.xlu1 %1877 }
 0x313   :  { %8065 = vst [vmem:[#allocation66_spill] sm:$0xff] %v6620_v62  ;;  %8066 = vst [vmem:[#allocation53_spill] sm:$0xff] %v6622_v55  ;;  %v2481_v5 = vmul.f32 %v6620_v62, %v6620_v62  ;;  %v3057_v2 = vmul.f32 %v6622_v55, %v6622_v55 }
 0x314   :  { %8067 = vst [vmem:[#allocation71_spill] sm:$0xff] %v6626_v30  ;;  %8068 = vst [vmem:[#allocation50_spill] sm:$0xff] %v6628_v19  ;;  %v2482_v24 = vmul.f32 %v6626_v30, %v6626_v30  ;;  %v2123_v51 = vpop.f32.mrb[44].mxu0  ;;  %v2380_v53 = vpop.f32.mrb[44].mxu1  ;;  %2564 = vadd.xlane.f32.xlu0 %v2563_v21  ;;  %3137 = vadd.xlane.f32.xlu1 %v3136_v12  ;;  %v3058_v46 = vmul.f32 %v6628_v19, %v6628_v19 }
 0x315   :  { %v6638_v59 = vadd.f32 %v2123_v51, %v1878_v58  ;;  %v6640_v39 = vadd.f32 %v2380_v53, %v1878_v58  ;;  %v2125_v34 = vpop.f32.mrb[45].mxu0  ;;  %v2382_v56 = vpop.f32.mrb[45].mxu1  ;;  %v3139_v30 = vadd.f32 %v3056_v33, %v3055_v7 }
 0x316   :  { %v6642_v27 = vadd.f32 %v2125_v34, %v1878_v58  ;;  %v6644_v62 = vadd.f32 %v2382_v56, %v1878_v58  ;;  %v2566_v42 = vadd.f32 %v2482_v24, %v2481_v5  ;;  %v1883_v21 = vpop.permute.xlu0 %1882  ;;  %v3142_v5 = vadd.f32 %v3058_v46, %v3057_v2 }
 0x317   :  { %8069 = vst [vmem:[#allocation87_spill] sm:$0xff] %v6638_v59  ;;  %8070 = vst [vmem:[#allocation35_spill] sm:$0xff] %v6640_v39  ;;  %v2483_v12 = vmul.f32 %v6638_v59, %v6638_v59  ;;  %v3059_v53 = vmul.f32 %v6640_v39, %v6640_v39 }
 0x318   :  { %8071 = vst [vmem:[#allocation34_spill] sm:$0xff] %v6642_v27  ;;  %8072 = vst [vmem:[#allocation36_spill] sm:$0xff] %v6644_v62  ;;  %v2484_v55 = vmul.f32 %v6642_v27, %v6642_v27  ;;  %v2129_v19 = vpop.f32.mrb[46].mxu0  ;;  %v2386_v51 = vpop.f32.mrb[46].mxu1  ;;  %3140 = vadd.xlane.f32.xlu0 %v3139_v30  ;;  %2567 = vadd.xlane.f32.xlu1 %v2566_v42  ;;  %v3060_v24 = vmul.f32 %v6644_v62, %v6644_v62 }
 0x319   :  { %v6652_v34 = vadd.f32 %v2129_v19, %v1883_v21  ;;  %v6654_v58 = vadd.f32 %v2386_v51, %v1883_v21  ;;  %v2131_v7 = vpop.f32.mrb[47].mxu0  ;;  %v2388_v33 = vpop.f32.mrb[47].mxu1 }
 0x31a   :  { %v6658_v56 = vadd.f32 %v2131_v7, %v1883_v21  ;;  %v6660_v27 = vadd.f32 %v2388_v33, %v1883_v21  ;;  %v2569_v59 = vadd.f32 %v2484_v55, %v2483_v12  ;;  %v1888_v30 = vpop.permute.xlu1 %1887 }
 0x31b   :  { %8073 = vst [vmem:[#allocation76_spill] sm:$0xff] %v6652_v34  ;;  %8074 = vst [vmem:[#allocation42_spill] sm:$0xff] %v6654_v58  ;;  %v2485_v42 = vmul.f32 %v6652_v34, %v6652_v34  ;;  %v3061_v2 = vmul.f32 %v6654_v58, %v6654_v58 }
 0x31c   :  { %8075 = vst [vmem:[#allocation77_spill] sm:$0xff] %v6658_v56  ;;  %8076 = vst [vmem:[#allocation69_spill] sm:$0xff] %v6660_v27  ;;  %v2486_v19 = vmul.f32 %v6658_v56, %v6658_v56  ;;  %v2135_v51 = vpop.f32.mrb[48].mxu0  ;;  %v2392_v39 = vpop.f32.mrb[48].mxu1  ;;  %2570 = vadd.xlane.f32.xlu0 %v2569_v59  ;;  %3143 = vadd.xlane.f32.xlu1 %v3142_v5  ;;  %v3062_v46 = vmul.f32 %v6660_v27, %v6660_v27 }
 0x31d   :  { %v6670_v21 = vadd.f32 %v2135_v51, %v1888_v30  ;;  %v6672_v55 = vadd.f32 %v2392_v39, %v1888_v30  ;;  %v2137_v12 = vpop.f32.mrb[49].mxu0  ;;  %v2394_v7 = vpop.f32.mrb[49].mxu1  ;;  %v3145_v56 = vadd.f32 %v3060_v24, %v3059_v53 }
 0x31e   :  { %v6674_v33 = vadd.f32 %v2137_v12, %v1888_v30  ;;  %v6676_v34 = vadd.f32 %v2394_v7, %v1888_v30  ;;  %v2572_v62 = vadd.f32 %v2486_v19, %v2485_v42  ;;  %v1893_v59 = vpop.permute.xlu0 %1892  ;;  %v3148_v42 = vadd.f32 %v3062_v46, %v3061_v2 }
 0x31f   :  { %8077 = vst [vmem:[#allocation6_spill] sm:$0xff] %v6670_v21  ;;  %8078 = vst [vmem:[#allocation68_spill] sm:$0xff] %v6672_v55  ;;  %v2487_v5 = vmul.f32 %v6670_v21, %v6670_v21  ;;  %v3063_v39 = vmul.f32 %v6672_v55, %v6672_v55 }
 0x320   :  { %8079 = vst [vmem:[#allocation73_spill] sm:$0xff] %v6674_v33  ;;  %8080 = vst [vmem:[#allocation75_spill] sm:$0xff] %v6676_v34  ;;  %v2488_v58 = vmul.f32 %v6674_v33, %v6674_v33  ;;  %v2141_v27 = vpop.f32.mrb[50].mxu0  ;;  %v2398_v51 = vpop.f32.mrb[50].mxu1  ;;  %3146 = vadd.xlane.f32.xlu0 %v3145_v56  ;;  %2573 = vadd.xlane.f32.xlu1 %v2572_v62  ;;  %v3064_v19 = vmul.f32 %v6676_v34, %v6676_v34 }
 0x321   :  { %v6684_v12 = vadd.f32 %v2141_v27, %v1893_v59  ;;  %v6686_v30 = vadd.f32 %v2398_v51, %v1893_v59  ;;  %v2143_v53 = vpop.f32.mrb[51].mxu0  ;;  %v2400_v24 = vpop.f32.mrb[51].mxu1 }
 0x322   :  { %v6690_v7 = vadd.f32 %v2143_v53, %v1893_v59  ;;  %v6692_v33 = vadd.f32 %v2400_v24, %v1893_v59  ;;  %v2575_v21 = vadd.f32 %v2488_v58, %v2487_v5  ;;  %v1898_v56 = vpop.permute.xlu1 %1897 }
 0x323   :  { %8081 = vst [vmem:[#allocation72_spill] sm:$0xff] %v6684_v12  ;;  %8082 = vst [vmem:[#allocation47_spill] sm:$0xff] %v6686_v30  ;;  %v2489_v62 = vmul.f32 %v6684_v12, %v6684_v12  ;;  %v3065_v2 = vmul.f32 %v6686_v30, %v6686_v30 }
 0x324   :  { %8083 = vst [vmem:[#allocation74_spill] sm:$0xff] %v6690_v7  ;;  %8084 = vst [vmem:[#allocation10_spill] sm:$0xff] %v6692_v33  ;;  %v2490_v27 = vmul.f32 %v6690_v7, %v6690_v7  ;;  %v2147_v51 = vpop.f32.mrb[52].mxu0  ;;  %v2404_v55 = vpop.f32.mrb[52].mxu1  ;;  %2576 = vadd.xlane.f32.xlu0 %v2575_v21  ;;  %3149 = vadd.xlane.f32.xlu1 %v3148_v42  ;;  %v3066_v46 = vmul.f32 %v6692_v33, %v6692_v33 }
 0x325   :  { %v6702_v59 = vadd.f32 %v2147_v51, %v1898_v56  ;;  %v6704_v58 = vadd.f32 %v2404_v55, %v1898_v56  ;;  %v2149_v5 = vpop.f32.mrb[53].mxu0  ;;  %v2406_v53 = vpop.f32.mrb[53].mxu1  ;;  %v3151_v7 = vadd.f32 %v3064_v19, %v3063_v39 }
 0x326   :  { %v6706_v24 = vadd.f32 %v2149_v5, %v1898_v56  ;;  %v6708_v12 = vadd.f32 %v2406_v53, %v1898_v56  ;;  %v2578_v34 = vadd.f32 %v2490_v27, %v2489_v62  ;;  %v1903_v21 = vpop.permute.xlu0 %1902  ;;  %v3154_v62 = vadd.f32 %v3066_v46, %v3065_v2 }
 0x327   :  { %8085 = vst [vmem:[#allocation29_spill] sm:$0xff] %v6702_v59  ;;  %8086 = vst [vmem:[#allocation30_spill] sm:$0xff] %v6704_v58  ;;  %v2491_v42 = vmul.f32 %v6702_v59, %v6702_v59  ;;  %v3067_v55 = vmul.f32 %v6704_v58, %v6704_v58 }
 0x328   :  { %8087 = vst [vmem:[#allocation31_spill] sm:$0xff] %v6706_v24  ;;  %8088 = vst [vmem:[#allocation32_spill] sm:$0xff] %v6708_v12  ;;  %v2492_v30 = vmul.f32 %v6706_v24, %v6706_v24  ;;  %v2153_v33 = vpop.f32.mrb[54].mxu0  ;;  %v2410_v51 = vpop.f32.mrb[54].mxu1  ;;  %3152 = vadd.xlane.f32.xlu0 %v3151_v7  ;;  %2579 = vadd.xlane.f32.xlu1 %v2578_v34  ;;  %v3068_v27 = vmul.f32 %v6708_v12, %v6708_v12 }
 0x329   :  { %v6716_v5 = vadd.f32 %v2153_v33, %v1903_v21  ;;  %v6718_v56 = vadd.f32 %v2410_v51, %v1903_v21  ;;  %v2155_v39 = vpop.f32.mrb[55].mxu0  ;;  %v2412_v19 = vpop.f32.mrb[55].mxu1 }
 0x32a   :  { %v6722_v53 = vadd.f32 %v2155_v39, %v1903_v21  ;;  %v6724_v24 = vadd.f32 %v2412_v19, %v1903_v21  ;;  %v2581_v59 = vadd.f32 %v2492_v30, %v2491_v42  ;;  %v1908_v7 = vpop.permute.xlu1 %1907 }
 0x32b   :  { %8089 = vst [vmem:[#allocation70_spill] sm:$0xff] %v6716_v5  ;;  %8090 = vst [vmem:[#allocation33_spill] sm:$0xff] %v6718_v56  ;;  %v2493_v34 = vmul.f32 %v6716_v5, %v6716_v5  ;;  %v3069_v2 = vmul.f32 %v6718_v56, %v6718_v56 }
 0x32c   :  { %8091 = vst [vmem:[#allocation9_spill] sm:$0xff] %v6722_v53  ;;  %8092 = vst [vmem:[#allocation93_spill] sm:$0xff] %v6724_v24  ;;  %v2494_v33 = vmul.f32 %v6722_v53, %v6722_v53  ;;  %v2159_v51 = vpop.f32.mrb[56].mxu0  ;;  %v2416_v58 = vpop.f32.mrb[56].mxu1  ;;  %2582 = vadd.xlane.f32.xlu0 %v2581_v59  ;;  %3155 = vadd.xlane.f32.xlu1 %v3154_v62  ;;  %v3070_v46 = vmul.f32 %v6724_v24, %v6724_v24 }
 0x32d   :  { %v6734_v21 = vadd.f32 %v2159_v51, %v1908_v7  ;;  %v6736_v30 = vadd.f32 %v2416_v58, %v1908_v7  ;;  %v2161_v42 = vpop.f32.mrb[57].mxu0  ;;  %v2418_v39 = vpop.f32.mrb[57].mxu1  ;;  %v3157_v53 = vadd.f32 %v3068_v27, %v3067_v55 }
 0x32e   :  { %v6738_v19 = vadd.f32 %v2161_v42, %v1908_v7  ;;  %v6740_v5 = vadd.f32 %v2418_v39, %v1908_v7  ;;  %v2584_v12 = vadd.f32 %v2494_v33, %v2493_v34  ;;  %v1913_v59 = vpop.permute.xlu0 %1912  ;;  %v3160_v34 = vadd.f32 %v3070_v46, %v3069_v2 }
 0x32f   :  { %8093 = vst [vmem:[#allocation12_spill] sm:$0xff] %v6734_v21  ;;  %8094 = vst [vmem:[#allocation41_spill] sm:$0xff] %v6736_v30  ;;  %v2495_v62 = vmul.f32 %v6734_v21, %v6734_v21  ;;  %v3071_v58 = vmul.f32 %v6736_v30, %v6736_v30 }
 0x330   :  { %8095 = vst [vmem:[#allocation11_spill] sm:$0xff] %v6738_v19  ;;  %8096 = vst [vmem:[#allocation14_spill] sm:$0xff] %v6740_v5  ;;  %v2496_v56 = vmul.f32 %v6738_v19, %v6738_v19  ;;  %v2165_v24 = vpop.f32.mrb[58].mxu0  ;;  %v2422_v51 = vpop.f32.mrb[58].mxu1  ;;  %3158 = vadd.xlane.f32.xlu0 %v3157_v53  ;;  %2585 = vadd.xlane.f32.xlu1 %v2584_v12  ;;  %v3072_v33 = vmul.f32 %v6740_v5, %v6740_v5 }
 0x331   :  { %v6748_v42 = vadd.f32 %v2165_v24, %v1913_v59  ;;  %v6750_v7 = vadd.f32 %v2422_v51, %v1913_v59  ;;  %v2167_v55 = vpop.f32.mrb[59].mxu0  ;;  %v2424_v27 = vpop.f32.mrb[59].mxu1 }
 0x332   :  { %v6754_v39 = vadd.f32 %v2167_v55, %v1913_v59  ;;  %v6756_v19 = vadd.f32 %v2424_v27, %v1913_v59  ;;  %v2587_v21 = vadd.f32 %v2496_v56, %v2495_v62  ;;  %v1918_v53 = vpop.permute.xlu1 %1917 }
 0x333   :  { %8097 = vst [vmem:[#allocation44_spill] sm:$0xff] %v6748_v42  ;;  %8098 = vst [vmem:[#allocation13_spill] sm:$0xff] %v6750_v7  ;;  %v2497_v12 = vmul.f32 %v6748_v42, %v6748_v42  ;;  %v3073_v2 = vmul.f32 %v6750_v7, %v6750_v7 }
 0x334   :  { %8099 = vst [vmem:[#allocation16_spill] sm:$0xff] %v6754_v39  ;;  %8100 = vst [vmem:[#allocation78_spill] sm:$0xff] %v6756_v19  ;;  %v2498_v24 = vmul.f32 %v6754_v39, %v6754_v39  ;;  %v2171_v51 = vpop.f32.mrb[60].mxu0  ;;  %v2428_v30 = vpop.f32.mrb[60].mxu1  ;;  %2588 = vadd.xlane.f32.xlu0 %v2587_v21  ;;  %3161 = vadd.xlane.f32.xlu1 %v3160_v34  ;;  %v3074_v46 = vmul.f32 %v6756_v19, %v6756_v19 }
 0x335   :  { %v6766_v59 = vadd.f32 %v2171_v51, %v1918_v53  ;;  %v6768_v56 = vadd.f32 %v2428_v30, %v1918_v53  ;;  %v2173_v62 = vpop.f32.mrb[61].mxu0  ;;  %v2430_v55 = vpop.f32.mrb[61].mxu1  ;;  %v3163_v39 = vadd.f32 %v3072_v33, %v3071_v58 }
 0x336   :  { %v6770_v27 = vadd.f32 %v2173_v62, %v1918_v53  ;;  %v6772_v42 = vadd.f32 %v2430_v55, %v1918_v53  ;;  %v2590_v5 = vadd.f32 %v2498_v24, %v2497_v12  ;;  %v1923_v21 = vpop.permute.xlu0 %1922  ;;  %v3166_v12 = vadd.f32 %v3074_v46, %v3073_v2 }
 0x337   :  { %8101 = vst [vmem:[#allocation15_spill] sm:$0xff] %v6766_v59  ;;  %8102 = vst [vmem:[#allocation17_spill] sm:$0xff] %v6768_v56  ;;  %v2499_v34 = vmul.f32 %v6766_v59, %v6766_v59  ;;  %v3075_v30 = vmul.f32 %v6768_v56, %v6768_v56 }
 0x338   :  { %8103 = vst [vmem:[#allocation18_spill] sm:$0xff] %v6770_v27  ;;  %8104 = vst [vmem:[#allocation40_spill] sm:$0xff] %v6772_v42  ;;  %v2500_v7 = vmul.f32 %v6770_v27, %v6770_v27  ;;  %v2177_v19 = vpop.f32.mrb[62].mxu0  ;;  %v2434_v51 = vpop.f32.mrb[62].mxu1  ;;  %3164 = vadd.xlane.f32.xlu0 %v3163_v39  ;;  %2591 = vadd.xlane.f32.xlu1 %v2590_v5  ;;  %v3076_v53 = vmul.f32 %v6772_v42, %v6772_v42 }
 0x339   :  { %v6782_v62 = vadd.f32 %v2177_v19, %v1923_v21  ;;  %v2179_v58 = vpop.f32.mrb[63].mxu0  ;;  %v2436_v33 = vpop.f32.mrb[63].mxu1  ;;  %v6784_v24 = vadd.f32 %v2434_v51, %v1923_v21 }
 0x33a   :  { %v6786_v55 = vadd.f32 %v2179_v58, %v1923_v21  ;;  %v6788_v27 = vadd.f32 %v2436_v33, %v1923_v21  ;;  %v2593_v59 = vadd.f32 %v2500_v7, %v2499_v34  ;;  %v3169_v46 = vadd.f32 %v3076_v53, %v3075_v30 }
 0x33b   :  { %8105 = vst [vmem:[#allocation19_spill] sm:$0xff] %v6782_v62  ;;  %8106 = vst [vmem:[#allocation20_spill] sm:$0xff] %v6784_v24  ;;  %v2501_v5 = vmul.f32 %v6782_v62, %v6782_v62  ;;  %v3077_v19 = vmul.f32 %v6784_v24, %v6784_v24 }
 0x33c   :  { %8107 = vst [vmem:[#allocation21_spill] sm:$0xff] %v6786_v55  ;;  %8108 = vst [vmem:[#allocation22_spill] sm:$0xff] %v6788_v27  ;;  %v2502_v39 = vmul.f32 %v6786_v55, %v6786_v55  ;;  %2594 = vadd.xlane.f32.xlu0 %v2593_v59  ;;  %3167 = vadd.xlane.f32.xlu1 %v3166_v12  ;;  %v3078_v2 = vmul.f32 %v6788_v27, %v6788_v27 }
 0x33e   :  { %v2596_v51 = vadd.f32 %v2502_v39, %v2501_v5  ;;  %v3172_v21 = vadd.f32 %v3078_v2, %v3077_v19 }
 0x340   :  { %3170 = vadd.xlane.f32.xlu0 %v3169_v46  ;;  %2597 = vadd.xlane.f32.xlu1 %v2596_v51 }
 0x344   :  { %3173 = vadd.xlane.f32.xlu1 %v3172_v21 }
 0x351   :  { %v3081_v7 = vpop.xlane.xlu0 %3080  ;;  %v2505_v34 = vpop.xlane.xlu1 %2504 }
 0x352   :  { %3785 = vrsqrt.f32 %v3081_v7  ;;  %vm3177_vm0 = vcmp.eq.f32.partialorder %v3081_v7, inf  ;;  %vm3179_vm1 = vcmp.eq.f32.partialorder %v3081_v7, 0.0  ;;  %v3180_v30 = vand.u32 2147483648, %v3081_v7 }
 0x353   :  { %3787 = vrsqrt.f32 %v2505_v34  ;;  %vm2601_vm2 = vcmp.eq.f32.partialorder %v2505_v34, inf  ;;  %vm2603_vm3 = vcmp.eq.f32.partialorder %v2505_v34, 0.0  ;;  %v2604_v39 = vand.u32 2147483648, %v2505_v34 }
 0x355   :  { %v2508_v58 = vpop.xlane.xlu0 %2507  ;;  %v3084_v33 = vpop.xlane.xlu1 %3083 }
 0x356   :  { %3789 = vrsqrt.f32 %v2508_v58  ;;  %vm2608_vm4 = vcmp.eq.f32.partialorder %v2508_v58, inf  ;;  %vm2610_vm5 = vcmp.eq.f32.partialorder %v2508_v58, 0.0  ;;  %v2611_v21 = vand.u32 2147483648, %v2508_v58 }
 0x357   :  { %3791 = vrsqrt.f32 %v3084_v33  ;;  %vm3184_vm6 = vcmp.eq.f32.partialorder %v3084_v33, inf  ;;  %vm3186_vm7 = vcmp.eq.f32.partialorder %v3084_v33, 0.0  ;;  %v3187_v55 = vand.u32 2147483648, %v3084_v33 }
 0x359   :  { %v6798_v59 = vpop.xlane.xlu0 %2510 }
 0x35a   :  { %3793 = vrsqrt.f32 %v6798_v59  ;;  %vm2615_vm8 = vcmp.eq.f32.partialorder %v6798_v59, inf  ;;  %vm2617_vm9 = vcmp.eq.f32.partialorder %v6798_v59, 0.0 }
 0x35c   :  { %v3786_v12 = vpop.eup %3785 }
 0x35d   :  { %v3788_v53 = vpop.eup %3787  ;;  %v3176_v5 = vmul.f32 %v3786_v12, %v3081_v7  ;;  %v6801_v19 = vpop.xlane.xlu0 %3086 }
 0x35e   :  { %v6803_v2 = vpop.xlane.xlu1 %2513  ;;  %v2600_v46 = vmul.f32 %v3788_v53, %v2505_v34  ;;  %3795 = vrsqrt.f32 %v6801_v19  ;;  %vm3191_vm10 = vcmp.eq.f32.partialorder %v6801_v19, inf  ;;  %vm3193_vm11 = vcmp.eq.f32.partialorder %v6801_v19, 0.0 }
 0x35f   :  { %v3178_v51 = vsel %vm3177_vm0, %v3081_v7, %v3176_v5  ;;  %3797 = vrsqrt.f32 %v6803_v2  ;;  %vm2622_vm12 = vcmp.eq.f32.partialorder %v6803_v2, inf  ;;  %vm2624_vm13 = vcmp.eq.f32.partialorder %v6803_v2, 0.0 }
 0x360   :  { %v3790_v27 = vpop.eup %3789  ;;  %v3181_v12 = vsel %vm3179_vm1, %v3180_v30, %v3178_v51  ;;  %v2602_v24 = vsel %vm2601_vm2, %v2505_v34, %v2600_v46  ;;  %v2618_v30 = vand.u32 2147483648, %v6798_v59 }
 0x361   :  { %v3792_v62 = vpop.eup %3791  ;;  %v3399_v42 = vadd.f32 1e-07, %v3181_v12  ;;  %v2605_v56 = vsel %vm2603_vm3, %v2604_v39, %v2602_v24  ;;  %v2607_v53 = vmul.f32 %v3790_v27, %v2508_v58  ;;  %v6810_v16 = vpop.xlane.xlu0 %2516 }
 0x362   :  { %v6812_v5 = vpop.xlane.xlu1 %3089  ;;  %v2823_v37 = vadd.f32 1e-07, %v2605_v56  ;;  %v3183_v25 = vmul.f32 %v3792_v62, %v3084_v33  ;;  %3799 = vrsqrt.f32 %v6810_v16  ;;  %vm2629_vm14 = vcmp.eq.f32.partialorder %v6810_v16, inf }
 0x363   :  { %3801 = vrcp.f32 %v3399_v42  ;;  %v2609_v7 = vsel %vm2608_vm4, %v2508_v58, %v2607_v53  ;;  %vm2631_vm15 = vcmp.eq.f32.partialorder %v6810_v16, 0.0  ;;  %vm3198_vm0 = vcmp.eq.f32.partialorder %v6812_v5, inf }
 0x364   :  { %v3794_v27 = vpop.eup %3793  ;;  %3803 = vrcp.f32 %v2823_v37  ;;  %v2612_v24 = vsel %vm2610_vm5, %v2611_v21, %v2609_v7  ;;  %v3185_v34 = vsel %vm3184_vm6, %v3084_v33, %v3183_v25  ;;  %v3194_v37 = vand.u32 2147483648, %v6801_v19 }
 0x365   :  { %v2824_v56 = vadd.f32 1e-07, %v2612_v24  ;;  %v3188_v62 = vsel %vm3186_vm7, %v3187_v55, %v3185_v34  ;;  %v2614_v39 = vmul.f32 %v3794_v27, %v6798_v59  ;;  %3805 = vrsqrt.f32 %v6812_v5  ;;  %v6825_v42 = vpop.xlane.xlu0 %3092 }
 0x366   :  { %v6827_v46 = vpop.xlane.xlu1 %2519  ;;  %v3400_v51 = vadd.f32 1e-07, %v3188_v62  ;;  %3807 = vrsqrt.f32 %v6825_v42  ;;  %v2625_v55 = vand.u32 2147483648, %v6803_v2  ;;  %v2632_v7 = vand.u32 2147483648, %v6810_v16 }
 0x367   :  { %3809 = vrcp.f32 %v2824_v56  ;;  %v2616_v25 = vsel %vm2615_vm8, %v6798_v59, %v2614_v39  ;;  %vm3200_vm1 = vcmp.eq.f32.partialorder %v6812_v5, 0.0  ;;  %vm3205_vm2 = vcmp.eq.f32.partialorder %v6825_v42, inf }
 0x368   :  { %v3796_v58 = vpop.eup %3795  ;;  %3811 = vrcp.f32 %v3400_v51  ;;  %v2619_v33 = vsel %vm2617_vm9, %v2618_v30, %v2616_v25  ;;  %v3201_v30 = vand.u32 2147483648, %v6812_v5  ;;  %vm3207_vm3 = vcmp.eq.f32.partialorder %v6825_v42, 0.0 }
 0x369   :  { %v3798_v21 = vpop.eup %3797  ;;  %v2825_v12 = vadd.f32 1e-07, %v2619_v33  ;;  %v3190_v53 = vmul.f32 %v3796_v58, %v6801_v19  ;;  %3813 = vrsqrt.f32 %v6827_v46  ;;  %v6844_v27 = vpop.xlane.xlu0 %2522  ;;  %vm2636_vm4 = vcmp.eq.f32.partialorder %v6827_v46, inf }
 0x36a   :  { %v6846_v24 = vpop.xlane.xlu1 %3095  ;;  %v2621_v34 = vmul.f32 %v3798_v21, %v6803_v2  ;;  %3815 = vrsqrt.f32 %v6844_v27  ;;  %v3208_v21 = vand.u32 2147483648, %v6825_v42  ;;  %vm2638_vm5 = vcmp.eq.f32.partialorder %v6827_v46, 0.0 }
 0x36b   :  { %3817 = vrcp.f32 %v2825_v12  ;;  %v3192_v59 = vsel %vm3191_vm10, %v6801_v19, %v3190_v53  ;;  %vm2643_vm6 = vcmp.eq.f32.partialorder %v6844_v27, inf  ;;  %vm2645_vm7 = vcmp.eq.f32.partialorder %v6844_v27, 0.0 }
 0x36c   :  { %v3800_v56 = vpop.eup %3799  ;;  %v3195_v62 = vsel %vm3193_vm11, %v3194_v37, %v3192_v59  ;;  %v2623_v39 = vsel %vm2622_vm12, %v6803_v2, %v2621_v34  ;;  %3819 = vrsqrt.f32 %v6846_v24  ;;  %vm3212_vm8 = vcmp.eq.f32.partialorder %v6846_v24, inf }
 0x36d   :  { %v3802_v51 = vpop.eup %3801  ;;  %v3401_v25 = vadd.f32 1e-07, %v3195_v62  ;;  %v2626_v58 = vsel %vm2624_vm13, %v2625_v55, %v2623_v39  ;;  %v2628_v33 = vmul.f32 %v3800_v56, %v6810_v16  ;;  %v6868_v12 = vpop.xlane.xlu0 %3098  ;;  %vm3214_vm9 = vcmp.eq.f32.partialorder %v6846_v24, 0.0 }
 0x36e   :  { %v6870_v19 = vpop.xlane.xlu1 %2525  ;;  %v3804_v37 = vpop.eup %3803  ;;  %v3463_v53 = vmul.f32 %v3802_v51, %v6288_v44  ;;  %v3464_v34 = vmul.f32 %v3802_v51, %v6292_v47  ;;  %v2826_v59 = vadd.f32 1e-07, %v2626_v58  ;;  %vm3219_vm10 = vcmp.eq.f32.partialorder %v6868_v12, inf }
 0x36f   :  { %v3806_v62 = vpop.eup %3805  ;;  %v2887_v2 = vmul.f32 %v3804_v37, %v6286_v15  ;;  %v2888_v55 = vmul.f32 %v3804_v37, %v6290_v32  ;;  %3821 = vrcp.f32 %v3401_v25  ;;  %v2630_v56 = vsel %vm2629_vm14, %v6810_v16, %v2628_v33 }
 0x370   :  { %v3808_v39 = vpop.eup %3807  ;;  %3528 = vst [vmem:[#allocation2 + $0x200] sm:$0xff] %v3463_v53  ;;  %3529 = vst [vmem:[#allocation2 + $0x208] sm:$0xff] %v3464_v34  ;;  %3823 = vrcp.f32 %v2826_v59  ;;  %v2633_v44 = vsel %vm2631_vm15, %v2632_v7, %v2630_v56  ;;  %v3197_v47 = vmul.f32 %v3806_v62, %v6812_v5  ;;  %v2639_v15 = vand.u32 2147483648, %v6827_v46 }
 0x371   :  { %v3810_v51 = vpop.eup %3809  ;;  %2951 = vst [vmem:[#allocation2] sm:$0xff] %v2887_v2  ;;  %2952 = vst [vmem:[#allocation2 + $0x8] sm:$0xff] %v2888_v55  ;;  %v2827_v32 = vadd.f32 1e-07, %v2633_v44  ;;  %v3204_v25 = vmul.f32 %v3808_v39, %v6825_v42  ;;  %3825 = vrsqrt.f32 %v6868_v12  ;;  %v6888_v58 = vpop.xlane.xlu0 %2528  ;;  %vm3221_vm11 = vcmp.eq.f32.partialorder %v6868_v12, 0.0 }
 0x372   :  { %v6890_v33 = vpop.xlane.xlu1 %3101  ;;  %v3812_v16 = vpop.eup %3811  ;;  %v2889_v7 = vmul.f32 %v3810_v51, %v6302_v63  ;;  %v2890_v37 = vmul.f32 %v3810_v51, %v6306_v48  ;;  %v3199_v53 = vsel %vm3198_vm0, %v6812_v5, %v3197_v47  ;;  %v2646_v5 = vand.u32 2147483648, %v6844_v27 }
 0x373   :  { %v3814_v34 = vpop.eup %3813  ;;  %v3465_v59 = vmul.f32 %v3812_v16, %v6304_v13  ;;  %v3466_v62 = vmul.f32 %v3812_v16, %v6308_v45  ;;  %3827 = vrcp.f32 %v2827_v32  ;;  %v3202_v2 = vsel %vm3200_vm1, %v3201_v30, %v3199_v53 }
 0x374   :  { %v3816_v55 = vpop.eup %3815  ;;  %2953 = vst [vmem:[#allocation2 + $0x10] sm:$0xff] %v2889_v7  ;;  %2954 = vst [vmem:[#allocation2 + $0x18] sm:$0xff] %v2890_v37  ;;  %v3402_v63 = vadd.f32 1e-07, %v3202_v2  ;;  %v3206_v48 = vsel %vm3205_vm2, %v6825_v42, %v3204_v25  ;;  %v2635_v56 = vmul.f32 %v3814_v34, %v6827_v46  ;;  %3829 = vrsqrt.f32 %v6870_v19 }
 0x375   :  { %v3818_v39 = vpop.eup %3817  ;;  %3530 = vst [vmem:[#allocation2 + $0x210] sm:$0xff] %v3465_v59  ;;  %3531 = vst [vmem:[#allocation2 + $0x218] sm:$0xff] %v3466_v62  ;;  %v3209_v13 = vsel %vm3207_vm3, %v3208_v21, %v3206_v48  ;;  %v2642_v45 = vmul.f32 %v3816_v55, %v6844_v27  ;;  %v6912_v30 = vpop.xlane.xlu0 %3104  ;;  %v3215_v7 = vand.u32 2147483648, %v6846_v24  ;;  %vm2650_vm12 = vcmp.eq.f32.partialorder %v6870_v19, inf }
 0x376   :  { %v6914_v44 = vpop.xlane.xlu1 %2531  ;;  %v3820_v47 = vpop.eup %3819  ;;  %v2891_v51 = vmul.f32 %v3818_v39, %v6320_v17  ;;  %v2892_v32 = vmul.f32 %v3818_v39, %v6322_v1  ;;  %3831 = vrcp.f32 %v3402_v63  ;;  %v3403_v25 = vadd.f32 1e-07, %v3209_v13 }
 0x377   :  { %v2637_v42 = vsel %vm2636_vm4, %v6827_v46, %v2635_v56  ;;  %v2644_v21 = vsel %vm2643_vm6, %v6844_v27, %v2642_v45  ;;  %v3211_v16 = vmul.f32 %v3820_v47, %v6846_v24  ;;  %vm2652_vm13 = vcmp.eq.f32.partialorder %v6870_v19, 0.0 }
 0x378   :  { %2955 = vst [vmem:[#allocation2 + $0x20] sm:$0xff] %v2891_v51  ;;  %2956 = vst [vmem:[#allocation2 + $0x28] sm:$0xff] %v2892_v32  ;;  %3833 = vrcp.f32 %v3403_v25  ;;  %v2640_v17 = vsel %vm2638_vm5, %v2639_v15, %v2637_v42  ;;  %v2647_v1 = vsel %vm2645_vm7, %v2646_v5, %v2644_v21  ;;  %v2653_v21 = vand.u32 2147483648, %v6870_v19 }
 0x379   :  { %v3822_v37 = vpop.eup %3821  ;;  %v2828_v53 = vadd.f32 1e-07, %v2640_v17  ;;  %v2829_v34 = vadd.f32 1e-07, %v2647_v1  ;;  %v3213_v59 = vsel %vm3212_vm8, %v6846_v24, %v3211_v16  ;;  %3835 = vrsqrt.f32 %v6888_v58  ;;  %v6935_v62 = vpop.xlane.xlu0 %2534 }
 0x37a   :  { %v6937_v2 = vpop.xlane.xlu1 %3107  ;;  %v3824_v46 = vpop.eup %3823  ;;  %v3467_v15 = vmul.f32 %v3822_v37, %v6318_v29  ;;  %v3468_v27 = vmul.f32 %v3822_v37, %v6324_v14  ;;  %v3216_v55 = vsel %vm3214_vm9, %v3215_v7, %v3213_v59  ;;  %v3222_v14 = vand.u32 2147483648, %v6868_v12 }
 0x37b   :  { %v3826_v63 = vpop.eup %3825  ;;  %v2893_v48 = vmul.f32 %v3824_v46, %v6332_v18  ;;  %v2894_v56 = vmul.f32 %v3824_v46, %v6338_v43  ;;  %3837 = vrcp.f32 %v2828_v53  ;;  %v3404_v39 = vadd.f32 1e-07, %v3216_v55 }
 0x37c   :  { %3532 = vst [vmem:[#allocation2 + $0x220] sm:$0xff] %v3467_v15  ;;  %3533 = vst [vmem:[#allocation2 + $0x228] sm:$0xff] %v3468_v27  ;;  %3839 = vrcp.f32 %v2829_v34  ;;  %v3218_v13 = vmul.f32 %v3826_v63, %v6868_v12  ;;  %vm2657_vm14 = vcmp.eq.f32.partialorder %v6888_v58, inf  ;;  %vm2659_vm15 = vcmp.eq.f32.partialorder %v6888_v58, 0.0 }
 0x37d   :  { %v3828_v29 = vpop.eup %3827  ;;  %2957 = vst [vmem:[#allocation2 + $0x30] sm:$0xff] %v2893_v48  ;;  %2958 = vst [vmem:[#allocation2 + $0x38] sm:$0xff] %v2894_v56  ;;  %3841 = vrcp.f32 %v3404_v39  ;;  %v6950_v18 = vpop.xlane.xlu0 %3110  ;;  %v2660_v7 = vand.u32 2147483648, %v6888_v58  ;;  %vm3226_vm0 = vcmp.eq.f32.partialorder %v6890_v33, inf  ;;  %vm3228_vm1 = vcmp.eq.f32.partialorder %v6890_v33, 0.0 }
 0x37e   :  { %v6952_v43 = vpop.xlane.xlu1 %2537  ;;  %v3830_v24 = vpop.eup %3829  ;;  %v2895_v45 = vmul.f32 %v3828_v29, %v6350_v11  ;;  %v2896_v5 = vmul.f32 %v3828_v29, %v6354_v38  ;;  %v3220_v47 = vsel %vm3219_vm10, %v6868_v12, %v3218_v13  ;;  %3843 = vrsqrt.f32 %v6890_v33 }
 0x37f   :  { %v3223_v51 = vsel %vm3221_vm11, %v3222_v14, %v3220_v47  ;;  %v2649_v32 = vmul.f32 %v3830_v24, %v6870_v19  ;;  %3845 = vrsqrt.f32 %v6912_v30  ;;  %v3229_v59 = vand.u32 2147483648, %v6890_v33 }
 0x380   :  { %v3832_v25 = vpop.eup %3831  ;;  %2959 = vst [vmem:[#allocation2 + $0x40] sm:$0xff] %v2895_v45  ;;  %2960 = vst [vmem:[#allocation2 + $0x48] sm:$0xff] %v2896_v5  ;;  %v3405_v42 = vadd.f32 1e-07, %v3223_v51  ;;  %3847 = vrsqrt.f32 %v6914_v44  ;;  %vm3233_vm2 = vcmp.eq.f32.partialorder %v6912_v30, inf  ;;  %vm3235_vm3 = vcmp.eq.f32.partialorder %v6912_v30, 0.0 }
 0x381   :  { %v3469_v11 = vmul.f32 %v3832_v25, %v6334_v10  ;;  %v3470_v38 = vmul.f32 %v3832_v25, %v6340_v0  ;;  %v2651_v12 = vsel %vm2650_vm12, %v6870_v19, %v2649_v32  ;;  %v6976_v10 = vpop.xlane.xlu0 %2540  ;;  %vm2664_vm4 = vcmp.eq.f32.partialorder %v6914_v44, inf }
 0x382   :  { %v6970_v16 = vpop.xlane.xlu1 %3113  ;;  %v3834_v17 = vpop.eup %3833  ;;  %3849 = vrcp.f32 %v3405_v42  ;;  %v2654_v1 = vsel %vm2652_vm13, %v2653_v21, %v2651_v12  ;;  %vm2666_vm5 = vcmp.eq.f32.partialorder %v6914_v44, 0.0  ;;  %v2667_v24 = vand.u32 2147483648, %v6914_v44 }
 0x383   :  { %v3836_v0 = vpop.eup %3835  ;;  %3534 = vst [vmem:[#allocation2 + $0x230] sm:$0xff] %v3469_v11  ;;  %3535 = vst [vmem:[#allocation2 + $0x238] sm:$0xff] %v3470_v38  ;;  %v3471_v37 = vmul.f32 %v3834_v17, %v6352_v6  ;;  %v3472_v53 = vmul.f32 %v3834_v17, %v6356_v26  ;;  %v2830_v34 = vadd.f32 1e-07, %v2654_v1  ;;  %3851 = vrsqrt.f32 %v6935_v62 }
 0x384   :  { %v2656_v19 = vmul.f32 %v3836_v0, %v6888_v58  ;;  %3853 = vrsqrt.f32 %v6937_v2  ;;  %v3236_v6 = vand.u32 2147483648, %v6912_v30  ;;  %vm2671_vm6 = vcmp.eq.f32.partialorder %v6935_v62, inf }
 0x385   :  { %v3838_v46 = vpop.eup %3837  ;;  %3536 = vst [vmem:[#allocation2 + $0x240] sm:$0xff] %v3471_v37  ;;  %3537 = vst [vmem:[#allocation2 + $0x248] sm:$0xff] %v3472_v53  ;;  %3855 = vrcp.f32 %v2830_v34  ;;  %v7005_v45 = vpop.xlane.xlu0 %3116  ;;  %vm2673_vm7 = vcmp.eq.f32.partialorder %v6935_v62, 0.0  ;;  %vm3240_vm8 = vcmp.eq.f32.partialorder %v6937_v2, inf  ;;  %vm3242_vm9 = vcmp.eq.f32.partialorder %v6937_v2, 0.0 }
 0x386   :  { %v6989_v26 = vpop.xlane.xlu1 %2543  ;;  %v3840_v15 = vpop.eup %3839  ;;  %v2897_v27 = vmul.f32 %v3838_v46, %v6364_v41  ;;  %v2898_v55 = vmul.f32 %v3838_v46, %v6370_v22  ;;  %v2658_v63 = vsel %vm2657_vm14, %v6888_v58, %v2656_v19  ;;  %3857 = vrsqrt.f32 %v6950_v18 }
 0x387   :  { %v3842_v48 = vpop.eup %3841  ;;  %v2899_v56 = vmul.f32 %v3840_v15, %v6382_v35  ;;  %v2900_v39 = vmul.f32 %v3840_v15, %v6386_v50  ;;  %v2661_v13 = vsel %vm2659_vm15, %v2660_v7, %v2658_v63  ;;  %3859 = vrsqrt.f32 %v6952_v43 }
 0x388   :  { %v3844_v29 = vpop.eup %3843  ;;  %2961 = vst [vmem:[#allocation2 + $0x50] sm:$0xff] %v2897_v27  ;;  %2962 = vst [vmem:[#allocation2 + $0x58] sm:$0xff] %v2898_v55  ;;  %v3473_v41 = vmul.f32 %v3842_v48, %v6366_v57  ;;  %v3474_v22 = vmul.f32 %v3842_v48, %v6372_v40  ;;  %v2831_v14 = vadd.f32 1e-07, %v2661_v13  ;;  %v2674_v40 = vand.u32 2147483648, %v6935_v62 }
 0x389   :  { %v3846_v35 = vpop.eup %3845  ;;  %2963 = vst [vmem:[#allocation2 + $0x60] sm:$0xff] %v2899_v56  ;;  %2964 = vst [vmem:[#allocation2 + $0x68] sm:$0xff] %v2900_v39  ;;  %v3225_v50 = vmul.f32 %v3844_v29, %v6890_v33  ;;  %v3243_v21 = vand.u32 2147483648, %v6937_v2  ;;  %vm3247_vm10 = vcmp.eq.f32.partialorder %v6950_v18, inf  ;;  %v7038_v53 = vpop.xlane.xlu0 %2546  ;;  %vm3249_vm11 = vcmp.eq.f32.partialorder %v6950_v18, 0.0 }
 0x38a   :  { %v3848_v58 = vpop.eup %3847  ;;  %3538 = vst [vmem:[#allocation2 + $0x250] sm:$0xff] %v3473_v41  ;;  %3539 = vst [vmem:[#allocation2 + $0x258] sm:$0xff] %v3474_v22  ;;  %3861 = vrcp.f32 %v2831_v14  ;;  %v3232_v57 = vmul.f32 %v3846_v35, %v6912_v30  ;;  %v7020_v51 = vpop.xlane.xlu1 %3119  ;;  %v3250_v27 = vand.u32 2147483648, %v6950_v18  ;;  %vm2678_vm12 = vcmp.eq.f32.partialorder %v6952_v43, inf }
 0x38b   :  { %v3227_v5 = vsel %vm3226_vm0, %v6890_v33, %v3225_v50  ;;  %v2663_v47 = vmul.f32 %v3848_v58, %v6914_v44  ;;  %3863 = vrsqrt.f32 %v6976_v10  ;;  %vm2680_vm13 = vcmp.eq.f32.partialorder %v6952_v43, 0.0 }
 0x38c   :  { %v3850_v32 = vpop.eup %3849  ;;  %v3230_v25 = vsel %vm3228_vm1, %v3229_v59, %v3227_v5  ;;  %v3234_v42 = vsel %vm3233_vm2, %v6912_v30, %v3232_v57  ;;  %3865 = vrsqrt.f32 %v6970_v16  ;;  %vm2685_vm14 = vcmp.eq.f32.partialorder %v6976_v10, inf }
 0x38d   :  { %v3852_v11 = vpop.eup %3851  ;;  %v3475_v38 = vmul.f32 %v3850_v32, %v6384_v54  ;;  %v3476_v12 = vmul.f32 %v3850_v32, %v6388_v9  ;;  %v3406_v17 = vadd.f32 1e-07, %v3230_v25  ;;  %v3237_v1 = vsel %vm3235_vm3, %v3236_v6, %v3234_v42  ;;  %v7070_v41 = vpop.xlane.xlu0 %3122 }
 0x38e   :  { %v3854_v7 = vpop.eup %3853  ;;  %v3407_v33 = vadd.f32 1e-07, %v3237_v1  ;;  %v2665_v0 = vsel %vm2664_vm4, %v6914_v44, %v2663_v47  ;;  %v2670_v37 = vmul.f32 %v3852_v11, %v6935_v62  ;;  %v7054_v55 = vpop.xlane.xlu1 %2549  ;;  %vm2687_vm15 = vcmp.eq.f32.partialorder %v6976_v10, 0.0 }
 0x38f   :  { %v3856_v34 = vpop.eup %3855  ;;  %3540 = vst [vmem:[#allocation2 + $0x260] sm:$0xff] %v3475_v38  ;;  %3541 = vst [vmem:[#allocation2 + $0x268] sm:$0xff] %v3476_v12  ;;  %3867 = vrcp.f32 %v3406_v17  ;;  %v2668_v54 = vsel %vm2666_vm5, %v2667_v24, %v2665_v0  ;;  %v3239_v9 = vmul.f32 %v3854_v7, %v6937_v2  ;;  %vm3254_vm0 = vcmp.eq.f32.partialorder %v6970_v16, inf }
 0x390   :  { %v3858_v30 = vpop.eup %3857  ;;  %v2901_v19 = vmul.f32 %v3856_v34, %v6396_v23  ;;  %v2902_v59 = vmul.f32 %v3856_v34, %v6402_v8  ;;  %3869 = vrcp.f32 %v3407_v33  ;;  %v2832_v46 = vadd.f32 1e-07, %v2668_v54 }
 0x391   :  { %v2672_v6 = vsel %vm2671_vm6, %v6935_v62, %v2670_v37  ;;  %v3241_v44 = vsel %vm3240_vm8, %v6937_v2, %v3239_v9  ;;  %v3246_v15 = vmul.f32 %v3858_v30, %v6950_v18  ;;  %v3860_v63 = vpop.eup %3859  ;;  %v2681_v2 = vand.u32 2147483648, %v6952_v43 }
 0x392   :  { %2965 = vst [vmem:[#allocation2 + $0x70] sm:$0xff] %v2901_v19  ;;  %2966 = vst [vmem:[#allocation2 + $0x78] sm:$0xff] %v2902_v59  ;;  %3871 = vrcp.f32 %v2832_v46  ;;  %v2675_v23 = vsel %vm2673_vm7, %v2674_v40, %v2672_v6  ;;  %v3244_v8 = vsel %vm3242_vm9, %v3243_v21, %v3241_v44  ;;  %v2677_v62 = vmul.f32 %v3860_v63, %v6952_v43  ;;  %v8109_v46 = vld [vmem:[#allocation52_spill] sm:$0xff]  ;;  %v8110_v44 = vld [vmem:[#allocation57_spill] sm:$0xff] }
 0x393   :  { %v2833_v48 = vadd.f32 1e-07, %v2675_v23  ;;  %v3408_v56 = vadd.f32 1e-07, %v3244_v8  ;;  %v3248_v39 = vsel %vm3247_vm10, %v6950_v18, %v3246_v15  ;;  %3873 = vrsqrt.f32 %v7005_v45  ;;  %v8112_v8 = vld [vmem:[#allocation56_spill] sm:$0xff] }
 0x394   :  { %v3862_v13 = vpop.eup %3861  ;;  %v3251_v29 = vsel %vm3249_vm11, %v3250_v27, %v3248_v39  ;;  %v2679_v18 = vsel %vm2678_vm12, %v6952_v43, %v2677_v62  ;;  %v3257_v25 = vand.u32 2147483648, %v6970_v16  ;;  %vm3256_vm1 = vcmp.eq.f32.partialorder %v6970_v16, 0.0 }
 0x395   :  { %v3864_v22 = vpop.eup %3863  ;;  %v2903_v14 = vmul.f32 %v3862_v13, %v6414_v3  ;;  %v2904_v24 = vmul.f32 %v3862_v13, %v6418_v49  ;;  %3875 = vrcp.f32 %v2833_v48  ;;  %v3409_v35 = vadd.f32 1e-07, %v3251_v29  ;;  %v7081_v49 = vpop.xlane.xlu1 %3125 }
 0x396   :  { %3877 = vrcp.f32 %v3408_v56  ;;  %v2684_v50 = vmul.f32 %v3864_v22, %v6976_v10  ;;  %v2682_v58 = vsel %vm2680_vm13, %v2681_v2, %v2679_v18  ;;  %v2688_v3 = vand.u32 2147483648, %v6976_v10  ;;  %v3866_v57 = vpop.eup %3865  ;;  %v8113_v22 = vld [vmem:[#allocation58_spill] sm:$0xff] }
 0x397   :  { %2967 = vst [vmem:[#allocation2 + $0x80] sm:$0xff] %v2903_v14  ;;  %2968 = vst [vmem:[#allocation2 + $0x88] sm:$0xff] %v2904_v24  ;;  %3879 = vrcp.f32 %v3409_v35  ;;  %v2834_v40 = vadd.f32 1e-07, %v2682_v58  ;;  %v3253_v32 = vmul.f32 %v3866_v57, %v6970_v16  ;;  %vm3261_vm2 = vcmp.eq.f32.partialorder %v7005_v45, inf  ;;  %v8114_v24 = vld [vmem:[#allocation7_spill] sm:$0xff] }
 0x398   :  { %v2686_v5 = vsel %vm2685_vm14, %v6976_v10, %v2684_v50  ;;  %3881 = vrsqrt.f32 %v6989_v26  ;;  %v7091_v10 = vpop.xlane.xlu0 %2552  ;;  %vm3263_vm3 = vcmp.eq.f32.partialorder %v7005_v45, 0.0  ;;  %v3264_v37 = vand.u32 2147483648, %v7005_v45 }
 0x399   :  { %v3868_v43 = vpop.eup %3867  ;;  %v2689_v47 = vsel %vm2687_vm15, %v2688_v3, %v2686_v5  ;;  %3883 = vrsqrt.f32 %v7038_v53  ;;  %v3255_v1 = vsel %vm3254_vm0, %v6970_v16, %v3253_v32  ;;  %vm2692_vm4 = vcmp.eq.f32.partialorder %v6989_v26, inf  ;;  %v8115_v5 = vld [vmem:[#allocation26_spill] sm:$0xff] }
 0x39a   :  { %v3870_v42 = vpop.eup %3869  ;;  %v3477_v21 = vmul.f32 %v3868_v43, %v6398_v36  ;;  %v3478_v11 = vmul.f32 %v3868_v43, %v6404_v31  ;;  %3885 = vrcp.f32 %v2834_v40  ;;  %v2835_v38 = vadd.f32 1e-07, %v2689_v47  ;;  %v8116_v47 = vld [vmem:[#allocation65_spill] sm:$0xff] }
 0x39b   :  { %v3479_v12 = vmul.f32 %v3870_v42, %v6416_v20  ;;  %v3480_v17 = vmul.f32 %v3870_v42, %v6420_v61  ;;  %v3258_v33 = vsel %vm3256_vm1, %v3257_v25, %v3255_v1  ;;  %v7101_v61 = vpop.xlane.xlu1 %2555  ;;  %vm2694_vm5 = vcmp.eq.f32.partialorder %v6989_v26, 0.0 }
 0x39c   :  { %v3872_v7 = vpop.eup %3871  ;;  %3542 = vst [vmem:[#allocation2 + $0x270] sm:$0xff] %v3477_v21  ;;  %3543 = vst [vmem:[#allocation2 + $0x278] sm:$0xff] %v3478_v11  ;;  %3887 = vrcp.f32 %v2835_v38  ;;  %v3410_v0 = vadd.f32 1e-07, %v3258_v33  ;;  %v7116_v19 = vpop.xlane.xlu0 %3128  ;;  %vm2699_vm6 = vcmp.eq.f32.partialorder %v7038_v53, inf  ;;  %vm2701_vm7 = vcmp.eq.f32.partialorder %v7038_v53, 0.0 }
 0x39d   :  { %v3874_v36 = vpop.eup %3873  ;;  %3544 = vst [vmem:[#allocation2 + $0x280] sm:$0xff] %v3479_v12  ;;  %3545 = vst [vmem:[#allocation2 + $0x288] sm:$0xff] %v3480_v17  ;;  %v2905_v31 = vmul.f32 %v3872_v7, %v6428_v28  ;;  %v2906_v20 = vmul.f32 %v3872_v7, %v6434_v52  ;;  %3889 = vrsqrt.f32 %v7020_v51  ;;  %v2695_v28 = vand.u32 2147483648, %v6989_v26  ;;  %v8117_v7 = vld [vmem:[#allocation25_spill] sm:$0xff] }
 0x39e   :  { %v3260_v16 = vmul.f32 %v3874_v36, %v7005_v45  ;;  %3891 = vrsqrt.f32 %v7070_v41  ;;  %vm3268_vm8 = vcmp.eq.f32.partialorder %v7020_v51, inf  ;;  %vm3270_vm9 = vcmp.eq.f32.partialorder %v7020_v51, 0.0  ;;  %v8118_v36 = vld [vmem:[#allocation63_spill] sm:$0xff] }
 0x39f   :  { %v3876_v34 = vpop.eup %3875  ;;  %2969 = vst [vmem:[#allocation2 + $0x90] sm:$0xff] %v2905_v31  ;;  %2970 = vst [vmem:[#allocation2 + $0x98] sm:$0xff] %v2906_v20  ;;  %3893 = vrcp.f32 %v3410_v0  ;;  %v7130_v13 = vpop.xlane.xlu1 %3131  ;;  %v3271_v2 = vand.u32 2147483648, %v7020_v51  ;;  %vm3275_vm10 = vcmp.eq.f32.partialorder %v7070_v41, inf  ;;  %vm3277_vm11 = vcmp.eq.f32.partialorder %v7070_v41, 0.0 }
 0x3a0   :  { %v3878_v52 = vpop.eup %3877  ;;  %v2907_v54 = vmul.f32 %v3876_v34, %v6446_v60  ;;  %v2908_v9 = vmul.f32 %v3876_v34, %v6450_v4  ;;  %v3262_v30 = vsel %vm3261_vm2, %v7005_v45, %v3260_v16  ;;  %3895 = vrsqrt.f32 %v7054_v55  ;;  %v8111_v4 = vld [vmem:[#allocation59_spill] sm:$0xff]  ;;  %v7148_v57 = vpop.xlane.xlu0 %2558 }
 0x3a1   :  { %v3880_v59 = vpop.eup %3879  ;;  %v3481_v6 = vmul.f32 %v3878_v52, %v8109_v46  ;;  %v3482_v15 = vmul.f32 %v3878_v52, %v8110_v44  ;;  %v3265_v27 = vsel %vm3263_vm3, %v3264_v37, %v3262_v30  ;;  %v2702_v45 = vand.u32 2147483648, %v7038_v53 }
 0x3a2   :  { %v3882_v60 = vpop.eup %3881  ;;  %2971 = vst [vmem:[#allocation2 + $0xa0] sm:$0xff] %v2907_v54  ;;  %2972 = vst [vmem:[#allocation2 + $0xa8] sm:$0xff] %v2908_v9  ;;  %v3483_v23 = vmul.f32 %v3880_v59, %v8111_v4  ;;  %v3484_v63 = vmul.f32 %v3880_v59, %v8112_v8  ;;  %v3411_v48 = vadd.f32 1e-07, %v3265_v27  ;;  %3897 = vrsqrt.f32 %v7091_v10 }
 0x3a3   :  { %v3884_v56 = vpop.eup %3883  ;;  %3546 = vst [vmem:[#allocation2 + $0x290] sm:$0xff] %v3481_v6  ;;  %3547 = vst [vmem:[#allocation2 + $0x298] sm:$0xff] %v3482_v15  ;;  %v2691_v39 = vmul.f32 %v3882_v60, %v6989_v26  ;;  %v3278_v38 = vand.u32 2147483648, %v7070_v41  ;;  %vm2706_vm12 = vcmp.eq.f32.partialorder %v7054_v55, inf  ;;  %vm2708_vm13 = vcmp.eq.f32.partialorder %v7054_v55, 0.0  ;;  %v8119_v15 = vld [vmem:[#allocation8_spill] sm:$0xff] }
 0x3a4   :  { %v3886_v29 = vpop.eup %3885  ;;  %3548 = vst [vmem:[#allocation2 + $0x2a0] sm:$0xff] %v3483_v23  ;;  %3549 = vst [vmem:[#allocation2 + $0x2a8] sm:$0xff] %v3484_v63  ;;  %3899 = vrcp.f32 %v3411_v48  ;;  %v2698_v62 = vmul.f32 %v3884_v56, %v7038_v53  ;;  %v2709_v34 = vand.u32 2147483648, %v7054_v55  ;;  %vm2713_vm14 = vcmp.eq.f32.partialorder %v7091_v10, inf  ;;  %v8120_v60 = vld [vmem:[#allocation62_spill] sm:$0xff] }
 0x3a5   :  { %v2909_v14 = vmul.f32 %v3886_v29, %v8113_v22  ;;  %v2910_v35 = vmul.f32 %v3886_v29, %v8114_v24  ;;  %v2693_v18 = vsel %vm2692_vm4, %v6989_v26, %v2691_v39  ;;  %3901 = vrsqrt.f32 %v7081_v49 }
 0x3a6   :  { %v3888_v50 = vpop.eup %3887  ;;  %v2696_v58 = vsel %vm2694_vm5, %v2695_v28, %v2693_v18  ;;  %v2700_v3 = vsel %vm2699_vm6, %v7038_v53, %v2698_v62  ;;  %3903 = vrsqrt.f32 %v7116_v19  ;;  %v7160_v53 = vpop.xlane.xlu1 %2561  ;;  %vm2715_vm15 = vcmp.eq.f32.partialorder %v7091_v10, 0.0 }
 0x3a7   :  { %v3890_v40 = vpop.eup %3889  ;;  %2973 = vst [vmem:[#allocation2 + $0xb0] sm:$0xff] %v2909_v14  ;;  %2974 = vst [vmem:[#allocation2 + $0xb8] sm:$0xff] %v2910_v35  ;;  %v2911_v43 = vmul.f32 %v3888_v50, %v8115_v5  ;;  %v2912_v32 = vmul.f32 %v3888_v50, %v8116_v47  ;;  %v2836_v25 = vadd.f32 1e-07, %v2696_v58  ;;  %v2703_v26 = vsel %vm2701_vm7, %v2702_v45, %v2700_v3  ;;  %v8121_v35 = vld [vmem:[#allocation64_spill] sm:$0xff]  ;;  %v8122_v50 = vld [vmem:[#allocation82_spill] sm:$0xff] }
 0x3a8   :  { %v3892_v42 = vpop.eup %3891  ;;  %v2837_v21 = vadd.f32 1e-07, %v2703_v26  ;;  %v3267_v11 = vmul.f32 %v3890_v40, %v7020_v51  ;;  %v2716_v59 = vand.u32 2147483648, %v7091_v10  ;;  %vm3282_vm0 = vcmp.eq.f32.partialorder %v7081_v49, inf  ;;  %v8123_v3 = vld [vmem:[#allocation84_spill] sm:$0xff]  ;;  %v8124_v5 = vld [vmem:[#allocation97_spill] sm:$0xff] }
 0x3a9   :  { %v3894_v12 = vpop.eup %3893  ;;  %2975 = vst [vmem:[#allocation2 + $0xc0] sm:$0xff] %v2911_v43  ;;  %2976 = vst [vmem:[#allocation2 + $0xc8] sm:$0xff] %v2912_v32  ;;  %3905 = vrcp.f32 %v2836_v25  ;;  %v3274_v17 = vmul.f32 %v3892_v42, %v7070_v41  ;;  %vm3284_vm1 = vcmp.eq.f32.partialorder %v7081_v49, 0.0  ;;  %v3285_v56 = vand.u32 2147483648, %v7081_v49 }
 0x3aa   :  { %v3896_v1 = vpop.eup %3895  ;;  %v3485_v33 = vmul.f32 %v3894_v12, %v8117_v7  ;;  %v3486_v31 = vmul.f32 %v3894_v12, %v8118_v36  ;;  %3907 = vrcp.f32 %v2837_v21  ;;  %v3269_v20 = vsel %vm3268_vm8, %v7020_v51, %v3267_v11  ;;  %v7178_v51 = vpop.xlane.xlu0 %3134 }
 0x3ab   :  { %v3272_v0 = vsel %vm3270_vm9, %v3271_v2, %v3269_v20  ;;  %v3276_v16 = vsel %vm3275_vm10, %v7070_v41, %v3274_v17  ;;  %v2705_v37 = vmul.f32 %v3896_v1, %v7054_v55  ;;  %3909 = vrsqrt.f32 %v7101_v61  ;;  %v7191_v8 = vpop.xlane.xlu1 %3137  ;;  %v8125_v1 = vld [vmem:[#allocation81_spill] sm:$0xff] }
 0x3ac   :  { %3550 = vst [vmem:[#allocation2 + $0x2b0] sm:$0xff] %v3485_v33  ;;  %3551 = vst [vmem:[#allocation2 + $0x2b8] sm:$0xff] %v3486_v31  ;;  %v3412_v28 = vadd.f32 1e-07, %v3272_v0  ;;  %v3279_v52 = vsel %vm3277_vm11, %v3278_v38, %v3276_v16  ;;  %v3898_v54 = vpop.eup %3897  ;;  %vm3289_vm2 = vcmp.eq.f32.partialorder %v7116_v19, inf  ;;  %vm3291_vm3 = vcmp.eq.f32.partialorder %v7116_v19, 0.0 }
 0x3ad   :  { %v3413_v9 = vadd.f32 1e-07, %v3279_v52  ;;  %v2707_v30 = vsel %vm2706_vm12, %v7054_v55, %v2705_v37  ;;  %v2712_v6 = vmul.f32 %v3898_v54, %v7091_v10  ;;  %v3292_v14 = vand.u32 2147483648, %v7116_v19  ;;  %v8126_v33 = vld [vmem:[#allocation83_spill] sm:$0xff]  ;;  %v8127_v0 = vld [vmem:[#allocation90_spill] sm:$0xff]  ;;  %v8128_v37 = vld [vmem:[#allocation61_spill] sm:$0xff] }
 0x3ae   :  { %v3900_v46 = vpop.eup %3899  ;;  %3911 = vrcp.f32 %v3412_v28  ;;  %v2710_v41 = vsel %vm2708_vm13, %v2709_v34, %v2707_v30  ;;  %v7208_v62 = vpop.xlane.xlu0 %2564  ;;  %vm2720_vm4 = vcmp.eq.f32.partialorder %v7101_v61, inf  ;;  %vm2722_vm5 = vcmp.eq.f32.partialorder %v7101_v61, 0.0 }
 0x3af   :  { %v3902_v44 = vpop.eup %3901  ;;  %v3487_v27 = vmul.f32 %v3900_v46, %v8119_v15  ;;  %v3488_v4 = vmul.f32 %v3900_v46, %v8120_v60  ;;  %3913 = vrcp.f32 %v3413_v9  ;;  %v2838_v23 = vadd.f32 1e-07, %v2710_v41  ;;  %v7221_v32 = vpop.xlane.xlu1 %2567  ;;  %v8129_v41 = vld [vmem:[#allocation67_spill] sm:$0xff] }
 0x3b0   :  { %v2714_v63 = vsel %vm2713_vm14, %v7091_v10, %v2712_v6  ;;  %v3281_v55 = vmul.f32 %v3902_v44, %v7081_v49  ;;  %3915 = vrsqrt.f32 %v7148_v57  ;;  %v3904_v39 = vpop.eup %3903  ;;  %v2723_v42 = vand.u32 2147483648, %v7101_v61  ;;  %v8130_v6 = vld [vmem:[#allocation91_spill] sm:$0xff] }
 0x3b1   :  { %3552 = vst [vmem:[#allocation2 + $0x2c0] sm:$0xff] %v3487_v27  ;;  %3553 = vst [vmem:[#allocation2 + $0x2c8] sm:$0xff] %v3488_v4  ;;  %3917 = vrcp.f32 %v2838_v23  ;;  %v2717_v48 = vsel %vm2715_vm15, %v2716_v59, %v2714_v63  ;;  %v3288_v10 = vmul.f32 %v3904_v39, %v7116_v19  ;;  %vm2727_vm6 = vcmp.eq.f32.partialorder %v7148_v57, inf }
 0x3b2   :  { %v2839_v45 = vadd.f32 1e-07, %v2717_v48  ;;  %v3283_v29 = vsel %vm3282_vm0, %v7081_v49, %v3281_v55  ;;  %3919 = vrsqrt.f32 %v7130_v13  ;;  %vm2729_vm7 = vcmp.eq.f32.partialorder %v7148_v57, 0.0 }
 0x3b3   :  { %v3906_v2 = vpop.eup %3905  ;;  %v3286_v22 = vsel %vm3284_vm1, %v3285_v56, %v3283_v29  ;;  %3921 = vrsqrt.f32 %v7178_v51  ;;  %v3290_v47 = vsel %vm3289_vm2, %v7116_v19, %v3288_v10  ;;  %v2730_v12 = vand.u32 2147483648, %v7148_v57  ;;  %v7234_v19 = vpop.xlane.xlu0 %3140  ;;  %v8131_v56 = vld [vmem:[#allocation92_spill] sm:$0xff] }
 0x3b4   :  { %v3908_v24 = vpop.eup %3907  ;;  %v2913_v18 = vmul.f32 %v3906_v2, %v8121_v35  ;;  %v2914_v58 = vmul.f32 %v3906_v2, %v8122_v50  ;;  %3923 = vrcp.f32 %v2839_v45  ;;  %v3414_v49 = vadd.f32 1e-07, %v3286_v22  ;;  %v7249_v59 = vpop.xlane.xlu1 %3143  ;;  %v8132_v45 = vld [vmem:[#allocation85_spill] sm:$0xff] }
 0x3b5   :  { %v2915_v40 = vmul.f32 %v3908_v24, %v8123_v3  ;;  %v2916_v43 = vmul.f32 %v3908_v24, %v8124_v5  ;;  %v3910_v25 = vpop.eup %3909  ;;  %v3293_v26 = vsel %vm3291_vm3, %v3292_v14, %v3290_v47  ;;  %vm3296_vm8 = vcmp.eq.f32.partialorder %v7130_v13, inf }
 0x3b6   :  { %2977 = vst [vmem:[#allocation2 + $0xd0] sm:$0xff] %v2913_v18  ;;  %2978 = vst [vmem:[#allocation2 + $0xd8] sm:$0xff] %v2914_v58  ;;  %3925 = vrcp.f32 %v3414_v49  ;;  %v3415_v21 = vadd.f32 1e-07, %v3293_v26  ;;  %v2719_v11 = vmul.f32 %v3910_v25, %v7101_v61  ;;  %vm3298_vm9 = vcmp.eq.f32.partialorder %v7130_v13, 0.0  ;;  %v8133_v18 = vld [vmem:[#allocation43_spill] sm:$0xff] }
 0x3b7   :  { %2979 = vst [vmem:[#allocation2 + $0xe0] sm:$0xff] %v2915_v40  ;;  %2980 = vst [vmem:[#allocation2 + $0xe8] sm:$0xff] %v2916_v43  ;;  %3927 = vrsqrt.f32 %v7160_v53  ;;  %v3299_v30 = vand.u32 2147483648, %v7130_v13  ;;  %vm3303_vm10 = vcmp.eq.f32.partialorder %v7178_v51, inf  ;;  %vm3305_vm11 = vcmp.eq.f32.partialorder %v7178_v51, 0.0  ;;  %v7265_v48 = vpop.xlane.xlu0 %2570  ;;  %v8134_v58 = vld [vmem:[#allocation55_spill] sm:$0xff] }
 0x3b8   :  { %v3912_v38 = vpop.eup %3911  ;;  %3929 = vrsqrt.f32 %v7208_v62  ;;  %v2721_v31 = vsel %vm2720_vm4, %v7101_v61, %v2719_v11  ;;  %v3306_v4 = vand.u32 2147483648, %v7178_v51  ;;  %vm2734_vm12 = vcmp.eq.f32.partialorder %v7160_v53, inf  ;;  %v7281_v40 = vpop.xlane.xlu1 %2573  ;;  %v8136_v11 = vld [vmem:[#allocation86_spill] sm:$0xff] }
 0x3b9   :  { %v3914_v17 = vpop.eup %3913  ;;  %v3489_v7 = vmul.f32 %v3912_v38, %v8125_v1  ;;  %v3490_v36 = vmul.f32 %v3912_v38, %v8126_v33  ;;  %3931 = vrcp.f32 %v3415_v21  ;;  %v2724_v28 = vsel %vm2722_vm5, %v2723_v42, %v2721_v31  ;;  %v8135_v42 = vld [vmem:[#allocation79_spill] sm:$0xff] }
 0x3ba   :  { %v3916_v20 = vpop.eup %3915  ;;  %v3491_v16 = vmul.f32 %v3914_v17, %v8127_v0  ;;  %v3492_v34 = vmul.f32 %v3914_v17, %v8128_v37  ;;  %v2840_v54 = vadd.f32 1e-07, %v2724_v28  ;;  %3933 = vrsqrt.f32 %v7191_v8 }
 0x3bb   :  { %v3918_v52 = vpop.eup %3917  ;;  %3554 = vst [vmem:[#allocation2 + $0x2d0] sm:$0xff] %v3489_v7  ;;  %3555 = vst [vmem:[#allocation2 + $0x2d8] sm:$0xff] %v3490_v36  ;;  %v2726_v9 = vmul.f32 %v3916_v20, %v7148_v57  ;;  %vm2736_vm13 = vcmp.eq.f32.partialorder %v7160_v53, 0.0  ;;  %v2737_v24 = vand.u32 2147483648, %v7160_v53  ;;  %vm2741_vm14 = vcmp.eq.f32.partialorder %v7208_v62, inf  ;;  %v7296_v17 = vpop.xlane.xlu0 %3146 }
 0x3bc   :  { %v3920_v46 = vpop.eup %3919  ;;  %3556 = vst [vmem:[#allocation2 + $0x2e0] sm:$0xff] %v3491_v16  ;;  %3557 = vst [vmem:[#allocation2 + $0x2e8] sm:$0xff] %v3492_v34  ;;  %v2917_v61 = vmul.f32 %v3918_v52, %v8129_v41  ;;  %v2918_v44 = vmul.f32 %v3918_v52, %v8130_v6  ;;  %3935 = vrcp.f32 %v2840_v54  ;;  %vm2743_vm15 = vcmp.eq.f32.partialorder %v7208_v62, 0.0  ;;  %v7309_v37 = vpop.xlane.xlu1 %3149  ;;  %v8137_v34 = vld [vmem:[#allocation94_spill] sm:$0xff]  ;;  %v8138_v52 = vld [vmem:[#allocation88_spill] sm:$0xff] }
 0x3bd   :  { %v3922_v15 = vpop.eup %3921  ;;  %v2728_v27 = vsel %vm2727_vm6, %v7148_v57, %v2726_v9  ;;  %v3295_v60 = vmul.f32 %v3920_v46, %v7130_v13  ;;  %3937 = vrsqrt.f32 %v7234_v19  ;;  %vm3310_vm0 = vcmp.eq.f32.partialorder %v7191_v8, inf }
 0x3be   :  { %v3924_v23 = vpop.eup %3923  ;;  %2981 = vst [vmem:[#allocation2 + $0xf0] sm:$0xff] %v2917_v61  ;;  %2982 = vst [vmem:[#allocation2 + $0xf8] sm:$0xff] %v2918_v44  ;;  %v2731_v63 = vsel %vm2729_vm7, %v2730_v12, %v2728_v27  ;;  %v3302_v55 = vmul.f32 %v3922_v15, %v7178_v51  ;;  %v2744_v12 = vand.u32 2147483648, %v7208_v62  ;;  %vm3312_vm1 = vcmp.eq.f32.partialorder %v7191_v8, 0.0  ;;  %v8139_v27 = vld [vmem:[#allocation95_spill] sm:$0xff] }
 0x3bf   :  { %v2919_v39 = vmul.f32 %v3924_v23, %v8131_v56  ;;  %v2920_v29 = vmul.f32 %v3924_v23, %v8132_v45  ;;  %v2841_v2 = vadd.f32 1e-07, %v2731_v63  ;;  %v3297_v22 = vsel %vm3296_vm8, %v7130_v13, %v3295_v60  ;;  %v7320_v6 = vpop.xlane.xlu0 %2576 }
 0x3c0   :  { %v3926_v10 = vpop.eup %3925  ;;  %v3300_v57 = vsel %vm3298_vm9, %v3299_v30, %v3297_v22  ;;  %v3304_v14 = vsel %vm3303_vm10, %v7178_v51, %v3302_v55  ;;  %vm3317_vm2 = vcmp.eq.f32.partialorder %v7234_v19, inf  ;;  %v3320_v61 = vand.u32 2147483648, %v7234_v19  ;;  %v8142_v22 = vld [vmem:[#allocation89_spill] sm:$0xff] }
 0x3c1   :  { %v3928_v35 = vpop.eup %3927  ;;  %2983 = vst [vmem:[#allocation2 + $0x100] sm:$0xff] %v2919_v39  ;;  %2984 = vst [vmem:[#allocation2 + $0x108] sm:$0xff] %v2920_v29  ;;  %v3493_v50 = vmul.f32 %v3926_v10, %v8133_v18  ;;  %v3494_v49 = vmul.f32 %v3926_v10, %v8134_v58  ;;  %3939 = vrcp.f32 %v2841_v2  ;;  %v3416_v3 = vadd.f32 1e-07, %v3300_v57  ;;  %v8141_v29 = vld [vmem:[#allocation27_spill] sm:$0xff]  ;;  %v8143_v18 = vld [vmem:[#allocation96_spill] sm:$0xff] }
 0x3c2   :  { %v3930_v13 = vpop.eup %3929  ;;  %v3307_v5 = vsel %vm3305_vm11, %v3306_v4, %v3304_v14  ;;  %v2733_v43 = vmul.f32 %v3928_v35, %v7160_v53  ;;  %3941 = vrsqrt.f32 %v7221_v32  ;;  %vm3319_vm3 = vcmp.eq.f32.partialorder %v7234_v19, 0.0  ;;  %v8140_v4 = vld [vmem:[#allocation80_spill] sm:$0xff]  ;;  %v8144_v58 = vld [vmem:[#allocation5_spill] sm:$0xff] }
 0x3c3   :  { %v3932_v47 = vpop.eup %3931  ;;  %3558 = vst [vmem:[#allocation2 + $0x2f0] sm:$0xff] %v3493_v50  ;;  %3559 = vst [vmem:[#allocation2 + $0x2f8] sm:$0xff] %v3494_v49  ;;  %3943 = vrcp.f32 %v3416_v3  ;;  %v3417_v25 = vadd.f32 1e-07, %v3307_v5  ;;  %v2740_v26 = vmul.f32 %v3930_v13, %v7208_v62  ;;  %vm2748_vm4 = vcmp.eq.f32.partialorder %v7221_v32, inf  ;;  %v7347_v13 = vpop.xlane.xlu0 %3152 }
 0x3c4   :  { %v3495_v21 = vmul.f32 %v3932_v47, %v8135_v42  ;;  %v3496_v51 = vmul.f32 %v3932_v47, %v8136_v11  ;;  %v2735_v38 = vsel %vm2734_vm12, %v7160_v53, %v2733_v43  ;;  %v3934_v1 = vpop.eup %3933  ;;  %v3313_v53 = vand.u32 2147483648, %v7191_v8 }
 0x3c5   :  { %3945 = vrcp.f32 %v3417_v25  ;;  %v2738_v7 = vsel %vm2736_vm13, %v2737_v24, %v2735_v38  ;;  %v2742_v33 = vsel %vm2741_vm14, %v7208_v62, %v2740_v26  ;;  %v3309_v20 = vmul.f32 %v3934_v1, %v7191_v8 }
 0x3c6   :  { %3560 = vst [vmem:[#allocation2 + $0x300] sm:$0xff] %v3495_v21  ;;  %3561 = vst [vmem:[#allocation2 + $0x308] sm:$0xff] %v3496_v51  ;;  %v2842_v36 = vadd.f32 1e-07, %v2738_v7  ;;  %v2745_v31 = vsel %vm2743_vm15, %v2744_v12, %v2742_v33  ;;  %3947 = vrsqrt.f32 %v7265_v48  ;;  %v3936_v0 = vpop.eup %3935  ;;  %vm2750_vm5 = vcmp.eq.f32.partialorder %v7221_v32, 0.0  ;;  %v8145_v21 = vld [vmem:[#allocation38_spill] sm:$0xff] }
 0x3c7   :  { %v2843_v16 = vadd.f32 1e-07, %v2745_v31  ;;  %3949 = vrsqrt.f32 %v7249_v59  ;;  %v3938_v62 = vpop.eup %3937  ;;  %v2921_v28 = vmul.f32 %v3936_v0, %v8137_v34  ;;  %v2922_v54 = vmul.f32 %v3936_v0, %v8138_v52  ;;  %v8146_v51 = vld [vmem:[#allocation54_spill] sm:$0xff]  ;;  %v8148_v31 = vld [vmem:[#allocation45_spill] sm:$0xff] }
 0x3c8   :  { %3951 = vrcp.f32 %v2842_v36  ;;  %v3311_v9 = vsel %vm3310_vm0, %v7191_v8, %v3309_v20  ;;  %v3316_v46 = vmul.f32 %v3938_v62, %v7234_v19  ;;  %v2751_v45 = vand.u32 2147483648, %v7221_v32  ;;  %v8147_v33 = vld [vmem:[#allocation46_spill] sm:$0xff] }
 0x3c9   :  { %3953 = vrcp.f32 %v2843_v16  ;;  %v3314_v30 = vsel %vm3312_vm1, %v3313_v53, %v3311_v9  ;;  %2985 = vst [vmem:[#allocation2 + $0x110] sm:$0xff] %v2921_v28  ;;  %2986 = vst [vmem:[#allocation2 + $0x118] sm:$0xff] %v2922_v54  ;;  %vm2755_vm6 = vcmp.eq.f32.partialorder %v7265_v48, inf  ;;  %vm2757_vm7 = vcmp.eq.f32.partialorder %v7265_v48, 0.0  ;;  %v7377_v54 = vpop.xlane.xlu0 %2582 }
 0x3ca   :  { %v3418_v41 = vadd.f32 1e-07, %v3314_v30  ;;  %3955 = vrsqrt.f32 %v7296_v17  ;;  %v3318_v15 = vsel %vm3317_vm2, %v7234_v19, %v3316_v46  ;;  %v7331_v19 = vpop.xlane.xlu1 %2579  ;;  %v2758_v24 = vand.u32 2147483648, %v7265_v48  ;;  %v8149_v30 = vld [vmem:[#allocation60_spill] sm:$0xff]  ;;  %v8150_v46 = vld [vmem:[#allocation37_spill] sm:$0xff] }
 0x3cb   :  { %v3940_v44 = vpop.eup %3939  ;;  %v3321_v63 = vsel %vm3319_vm3, %v3320_v61, %v3318_v15  ;;  %vm3324_vm8 = vcmp.eq.f32.partialorder %v7249_v59, inf  ;;  %vm3326_vm9 = vcmp.eq.f32.partialorder %v7249_v59, 0.0  ;;  %vm3331_vm10 = vcmp.eq.f32.partialorder %v7296_v17, inf }
 0x3cc   :  { %v3942_v8 = vpop.eup %3941  ;;  %v2923_v60 = vmul.f32 %v3940_v44, %v8139_v27  ;;  %v2924_v23 = vmul.f32 %v3940_v44, %v8140_v4  ;;  %3957 = vrcp.f32 %v3418_v41  ;;  %v3419_v56 = vadd.f32 1e-07, %v3321_v63  ;;  %v8151_v63 = vld [vmem:[#allocation28_spill] sm:$0xff] }
 0x3cd   :  { %v3944_v55 = vpop.eup %3943  ;;  %v2747_v39 = vmul.f32 %v3942_v8, %v7221_v32  ;;  %3959 = vrsqrt.f32 %v7281_v40  ;;  %vm3333_vm11 = vcmp.eq.f32.partialorder %v7296_v17, 0.0  ;;  %vm2762_vm12 = vcmp.eq.f32.partialorder %v7281_v40, inf }
 0x3ce   :  { %2987 = vst [vmem:[#allocation2 + $0x120] sm:$0xff] %v2923_v60  ;;  %2988 = vst [vmem:[#allocation2 + $0x128] sm:$0xff] %v2924_v23  ;;  %v3497_v2 = vmul.f32 %v3944_v55, %v8141_v29  ;;  %v3498_v10 = vmul.f32 %v3944_v55, %v8142_v22  ;;  %3961 = vrcp.f32 %v3419_v56  ;;  %v7361_v1 = vpop.xlane.xlu1 %3155  ;;  %vm2764_vm13 = vcmp.eq.f32.partialorder %v7281_v40, 0.0  ;;  %v8152_v55 = vld [vmem:[#allocation51_spill] sm:$0xff] }
 0x3cf   :  { %v3946_v57 = vpop.eup %3945  ;;  %v2749_v14 = vsel %vm2748_vm4, %v7221_v32, %v2747_v39  ;;  %3963 = vrsqrt.f32 %v7320_v6  ;;  %v3327_v32 = vand.u32 2147483648, %v7249_v59  ;;  %v2765_v8 = vand.u32 2147483648, %v7281_v40 }
 0x3d0   :  { %v3948_v35 = vpop.eup %3947  ;;  %3562 = vst [vmem:[#allocation2 + $0x310] sm:$0xff] %v3497_v2  ;;  %3563 = vst [vmem:[#allocation2 + $0x318] sm:$0xff] %v3498_v10  ;;  %v3499_v50 = vmul.f32 %v3946_v57, %v8143_v18  ;;  %v3500_v49 = vmul.f32 %v3946_v57, %v8144_v58  ;;  %v2752_v3 = vsel %vm2750_vm5, %v2751_v45, %v2749_v14  ;;  %3965 = vrsqrt.f32 %v7309_v37  ;;  %v7406_v14 = vpop.xlane.xlu0 %3158  ;;  %v8153_v18 = vld [vmem:[#allocation66_spill] sm:$0xff]  ;;  %v8154_v58 = vld [vmem:[#allocation71_spill] sm:$0xff] }
 0x3d1   :  { %v3950_v5 = vpop.eup %3949  ;;  %v2844_v43 = vadd.f32 1e-07, %v2752_v3  ;;  %v2754_v47 = vmul.f32 %v3948_v35, %v7265_v48  ;;  %vm2769_vm14 = vcmp.eq.f32.partialorder %v7320_v6, inf  ;;  %vm2771_vm15 = vcmp.eq.f32.partialorder %v7320_v6, 0.0 }
 0x3d2   :  { %v3952_v25 = vpop.eup %3951  ;;  %3564 = vst [vmem:[#allocation2 + $0x320] sm:$0xff] %v3499_v50  ;;  %3565 = vst [vmem:[#allocation2 + $0x328] sm:$0xff] %v3500_v49  ;;  %v3323_v26 = vmul.f32 %v3950_v5, %v7249_v59  ;;  %v7391_v4 = vpop.xlane.xlu1 %2585  ;;  %v2772_v22 = vand.u32 2147483648, %v7320_v6  ;;  %vm3338_vm0 = vcmp.eq.f32.partialorder %v7309_v37, inf  ;;  %vm3340_vm1 = vcmp.eq.f32.partialorder %v7309_v37, 0.0 }
 0x3d3   :  { %v3954_v42 = vpop.eup %3953  ;;  %v2925_v11 = vmul.f32 %v3952_v25, %v8145_v21  ;;  %v2926_v38 = vmul.f32 %v3952_v25, %v8146_v51  ;;  %3967 = vrcp.f32 %v2844_v43  ;;  %v2756_v12 = vsel %vm2755_vm6, %v7265_v48, %v2754_v47 }
 0x3d4   :  { %v3956_v7 = vpop.eup %3955  ;;  %v2927_v36 = vmul.f32 %v3954_v42, %v8147_v33  ;;  %v2928_v20 = vmul.f32 %v3954_v42, %v8148_v31  ;;  %v2759_v0 = vsel %vm2757_vm7, %v2758_v24, %v2756_v12  ;;  %v3325_v16 = vsel %vm3324_vm8, %v7249_v59, %v3323_v26 }
 0x3d5   :  { %2989 = vst [vmem:[#allocation2 + $0x130] sm:$0xff] %v2925_v11  ;;  %2990 = vst [vmem:[#allocation2 + $0x138] sm:$0xff] %v2926_v38  ;;  %v2845_v53 = vadd.f32 1e-07, %v2759_v0  ;;  %v3328_v62 = vsel %vm3326_vm9, %v3327_v32, %v3325_v16  ;;  %v3330_v34 = vmul.f32 %v3956_v7, %v7296_v17  ;;  %3969 = vrsqrt.f32 %v7347_v13  ;;  %v8155_v38 = vld [vmem:[#allocation87_spill] sm:$0xff]  ;;  %v8156_v7 = vld [vmem:[#allocation34_spill] sm:$0xff] }
 0x3d6   :  { %v3958_v28 = vpop.eup %3957  ;;  %2991 = vst [vmem:[#allocation2 + $0x140] sm:$0xff] %v2927_v36  ;;  %2992 = vst [vmem:[#allocation2 + $0x148] sm:$0xff] %v2928_v20  ;;  %v3420_v52 = vadd.f32 1e-07, %v3328_v62  ;;  %v3334_v48 = vand.u32 2147483648, %v7296_v17  ;;  %v3341_v35 = vand.u32 2147483648, %v7309_v37  ;;  %v7421_v25 = vpop.xlane.xlu1 %3161 }
 0x3d7   :  { %v3960_v9 = vpop.eup %3959  ;;  %v3501_v59 = vmul.f32 %v3958_v28, %v8149_v30  ;;  %v3502_v41 = vmul.f32 %v3958_v28, %v8150_v46  ;;  %3971 = vrcp.f32 %v2845_v53  ;;  %v3332_v61 = vsel %vm3331_vm10, %v7296_v17, %v3330_v34  ;;  %v7436_v36 = vpop.xlane.xlu0 %2588  ;;  %v8157_v20 = vld [vmem:[#allocation53_spill] sm:$0xff]  ;;  %v8158_v16 = vld [vmem:[#allocation50_spill] sm:$0xff] }
 0x3d8   :  { %3973 = vrcp.f32 %v3420_v52  ;;  %v3335_v44 = vsel %vm3333_vm11, %v3334_v48, %v3332_v61  ;;  %v2761_v15 = vmul.f32 %v3960_v9, %v7281_v40  ;;  %v3962_v27 = vpop.eup %3961  ;;  %vm3345_vm2 = vcmp.eq.f32.partialorder %v7347_v13, inf }
 0x3d9   :  { %3566 = vst [vmem:[#allocation2 + $0x330] sm:$0xff] %v3501_v59  ;;  %3567 = vst [vmem:[#allocation2 + $0x338] sm:$0xff] %v3502_v41  ;;  %v3421_v60 = vadd.f32 1e-07, %v3335_v44  ;;  %3975 = vrsqrt.f32 %v7331_v19  ;;  %v3964_v23 = vpop.eup %3963  ;;  %v3503_v17 = vmul.f32 %v3962_v27, %v8151_v63  ;;  %v3504_v56 = vmul.f32 %v3962_v27, %v8152_v55  ;;  %v8159_v59 = vld [vmem:[#allocation35_spill] sm:$0xff]  ;;  %v8160_v41 = vld [vmem:[#allocation36_spill] sm:$0xff] }
 0x3da   :  { %v2763_v39 = vsel %vm2762_vm12, %v7281_v40, %v2761_v15  ;;  %3977 = vrsqrt.f32 %v7377_v54  ;;  %v3966_v45 = vpop.eup %3965  ;;  %v2768_v2 = vmul.f32 %v3964_v23, %v7320_v6  ;;  %vm3347_vm3 = vcmp.eq.f32.partialorder %v7347_v13, 0.0 }
 0x3db   :  { %3979 = vrcp.f32 %v3421_v60  ;;  %v2766_v29 = vsel %vm2764_vm13, %v2765_v8, %v2763_v39  ;;  %3568 = vst [vmem:[#allocation2 + $0x340] sm:$0xff] %v3503_v17  ;;  %3569 = vst [vmem:[#allocation2 + $0x348] sm:$0xff] %v3504_v56  ;;  %v3337_v57 = vmul.f32 %v3966_v45, %v7309_v37  ;;  %vm2776_vm4 = vcmp.eq.f32.partialorder %v7331_v19, inf  ;;  %v7467_v55 = vpop.xlane.xlu0 %3164  ;;  %v8161_v39 = vld [vmem:[#allocation76_spill] sm:$0xff] }
 0x3dc   :  { %v2846_v10 = vadd.f32 1e-07, %v2766_v29  ;;  %v2770_v40 = vsel %vm2769_vm14, %v7320_v6, %v2768_v2  ;;  %3981 = vrsqrt.f32 %v7361_v1  ;;  %v3348_v6 = vand.u32 2147483648, %v7347_v13  ;;  %v8162_v29 = vld [vmem:[#allocation77_spill] sm:$0xff] }
 0x3dd   :  { %v3968_v24 = vpop.eup %3967  ;;  %v2773_v3 = vsel %vm2771_vm15, %v2772_v22, %v2770_v40  ;;  %v3339_v47 = vsel %vm3338_vm0, %v7309_v37, %v3337_v57  ;;  %vm2778_vm5 = vcmp.eq.f32.partialorder %v7331_v19, 0.0  ;;  %v2779_v11 = vand.u32 2147483648, %v7331_v19 }
 0x3de   :  { %v2929_v50 = vmul.f32 %v3968_v24, %v8153_v18  ;;  %v2930_v49 = vmul.f32 %v3968_v24, %v8154_v58  ;;  %3983 = vrcp.f32 %v2846_v10  ;;  %v2847_v43 = vadd.f32 1e-07, %v2773_v3 }
 0x3df   :  { %v3970_v5 = vpop.eup %3969  ;;  %3985 = vrsqrt.f32 %v7406_v14  ;;  %v3342_v26 = vsel %vm3340_vm1, %v3341_v35, %v3339_v47  ;;  %vm2783_vm6 = vcmp.eq.f32.partialorder %v7377_v54, inf  ;;  %vm2785_vm7 = vcmp.eq.f32.partialorder %v7377_v54, 0.0 }
 0x3e0   :  { %2993 = vst [vmem:[#allocation2 + $0x150] sm:$0xff] %v2929_v50  ;;  %2994 = vst [vmem:[#allocation2 + $0x158] sm:$0xff] %v2930_v49  ;;  %v3344_v32 = vmul.f32 %v3970_v5, %v7347_v13  ;;  %3987 = vrcp.f32 %v2847_v43  ;;  %v3422_v21 = vadd.f32 1e-07, %v3342_v26  ;;  %v2786_v30 = vand.u32 2147483648, %v7377_v54  ;;  %v8163_v50 = vld [vmem:[#allocation6_spill] sm:$0xff] }
 0x3e1   :  { %v3972_v42 = vpop.eup %3971  ;;  %3989 = vrsqrt.f32 %v7391_v4  ;;  %vm3352_vm8 = vcmp.eq.f32.partialorder %v7361_v1, inf  ;;  %vm3354_vm9 = vcmp.eq.f32.partialorder %v7361_v1, 0.0  ;;  %vm3359_vm10 = vcmp.eq.f32.partialorder %v7406_v14, inf  ;;  %v8164_v49 = vld [vmem:[#allocation73_spill] sm:$0xff] }
 0x3e2   :  { %v3974_v51 = vpop.eup %3973  ;;  %v2931_v12 = vmul.f32 %v3972_v42, %v8155_v38  ;;  %v2932_v33 = vmul.f32 %v3972_v42, %v8156_v7  ;;  %v3346_v37 = vsel %vm3345_vm2, %v7347_v13, %v3344_v32  ;;  %3991 = vrcp.f32 %v3422_v21  ;;  %v7449_v13 = vpop.xlane.xlu1 %2591  ;;  %v8166_v21 = vld [vmem:[#allocation69_spill] sm:$0xff] }
 0x3e3   :  { %v3976_v31 = vpop.eup %3975  ;;  %v3505_v0 = vmul.f32 %v3974_v51, %v8157_v20  ;;  %v3506_v53 = vmul.f32 %v3974_v51, %v8158_v16  ;;  %v3349_v62 = vsel %vm3347_vm3, %v3348_v6, %v3346_v37  ;;  %3993 = vrsqrt.f32 %v7436_v36  ;;  %v8165_v6 = vld [vmem:[#allocation42_spill] sm:$0xff]  ;;  %v7493_v38 = vpop.xlane.xlu0 %2594 }
 0x3e4   :  { %v3978_v34 = vpop.eup %3977  ;;  %2995 = vst [vmem:[#allocation2 + $0x160] sm:$0xff] %v2931_v12  ;;  %2996 = vst [vmem:[#allocation2 + $0x168] sm:$0xff] %v2932_v33  ;;  %v3423_v28 = vadd.f32 1e-07, %v3349_v62  ;;  %v2775_v52 = vmul.f32 %v3976_v31, %v7331_v19  ;;  %vm3361_vm11 = vcmp.eq.f32.partialorder %v7406_v14, 0.0  ;;  %v3362_v40 = vand.u32 2147483648, %v7406_v14 }
 0x3e5   :  { %v3980_v48 = vpop.eup %3979  ;;  %3570 = vst [vmem:[#allocation2 + $0x350] sm:$0xff] %v3505_v0  ;;  %3571 = vst [vmem:[#allocation2 + $0x358] sm:$0xff] %v3506_v53  ;;  %v2782_v9 = vmul.f32 %v3978_v34, %v7377_v54  ;;  %vm2790_vm12 = vcmp.eq.f32.partialorder %v7391_v4, inf  ;;  %v2793_v32 = vand.u32 2147483648, %v7391_v4  ;;  %vm2792_vm13 = vcmp.eq.f32.partialorder %v7391_v4, 0.0  ;;  %v8167_v0 = vld [vmem:[#allocation68_spill] sm:$0xff] }
 0x3e6   :  { %v3507_v46 = vmul.f32 %v3980_v48, %v8159_v59  ;;  %v3508_v61 = vmul.f32 %v3980_v48, %v8160_v41  ;;  %3995 = vrcp.f32 %v3423_v28  ;;  %v2777_v44 = vsel %vm2776_vm4, %v7331_v19, %v2775_v52  ;;  %v3982_v15 = vpop.eup %3981  ;;  %v7481_v35 = vpop.xlane.xlu1 %3167  ;;  %v8168_v53 = vld [vmem:[#allocation75_spill] sm:$0xff] }
 0x3e7   :  { %v2780_v8 = vsel %vm2778_vm5, %v2779_v11, %v2777_v44  ;;  %v2784_v27 = vsel %vm2783_vm6, %v7377_v54, %v2782_v9  ;;  %3997 = vrsqrt.f32 %v7421_v25  ;;  %v3351_v17 = vmul.f32 %v3982_v15, %v7361_v1  ;;  %v7516_v41 = vpop.xlane.xlu0 %3170  ;;  %v8170_v15 = vld [vmem:[#allocation74_spill] sm:$0xff] }
 0x3e8   :  { %v3984_v60 = vpop.eup %3983  ;;  %3572 = vst [vmem:[#allocation2 + $0x360] sm:$0xff] %v3507_v46  ;;  %3573 = vst [vmem:[#allocation2 + $0x368] sm:$0xff] %v3508_v61  ;;  %v2848_v23 = vadd.f32 1e-07, %v2780_v8  ;;  %v2787_v63 = vsel %vm2785_vm7, %v2786_v30, %v2784_v27  ;;  %v3355_v19 = vand.u32 2147483648, %v7361_v1  ;;  %vm2797_vm14 = vcmp.eq.f32.partialorder %v7436_v36, inf }
 0x3e9   :  { %v3986_v56 = vpop.eup %3985  ;;  %v2933_v45 = vmul.f32 %v3984_v60, %v8161_v39  ;;  %v2934_v2 = vmul.f32 %v3984_v60, %v8162_v29  ;;  %v2849_v22 = vadd.f32 1e-07, %v2787_v63  ;;  %v3353_v54 = vsel %vm3352_vm8, %v7361_v1, %v3351_v17  ;;  %v8169_v61 = vld [vmem:[#allocation72_spill] sm:$0xff]  ;;  %v8171_v60 = vld [vmem:[#allocation29_spill] sm:$0xff]  ;;  %v8172_v63 = vld [vmem:[#allocation31_spill] sm:$0xff] }
 0x3ea   :  { %3999 = vrcp.f32 %v2848_v23  ;;  %v3358_v10 = vmul.f32 %v3986_v56, %v7406_v14  ;;  %v3988_v57 = vpop.eup %3987  ;;  %v3356_v24 = vsel %vm3354_vm9, %v3355_v19, %v3353_v54  ;;  %v2800_v31 = vand.u32 2147483648, %v7436_v36  ;;  %v8174_v54 = vld [vmem:[#allocation10_spill] sm:$0xff] }
 0x3eb   :  { %2997 = vst [vmem:[#allocation2 + $0x170] sm:$0xff] %v2933_v45  ;;  %2998 = vst [vmem:[#allocation2 + $0x178] sm:$0xff] %v2934_v2  ;;  %4001 = vrcp.f32 %v2849_v22  ;;  %v3990_v18 = vpop.eup %3989  ;;  %v2935_v58 = vmul.f32 %v3988_v57, %v8163_v50  ;;  %v2936_v3 = vmul.f32 %v3988_v57, %v8164_v49  ;;  %v3424_v5 = vadd.f32 1e-07, %v3356_v24  ;;  %v8173_v2 = vld [vmem:[#allocation47_spill] sm:$0xff] }
 0x3ec   :  { %v3360_v43 = vsel %vm3359_vm10, %v7406_v14, %v3358_v10  ;;  %v3992_v47 = vpop.eup %3991  ;;  %v2789_v1 = vmul.f32 %v3990_v18, %v7391_v4  ;;  %4003 = vrsqrt.f32 %v7467_v55  ;;  %vm2799_vm15 = vcmp.eq.f32.partialorder %v7436_v36, 0.0 }
 0x3ed   :  { %v3363_v26 = vsel %vm3361_vm11, %v3362_v40, %v3360_v43  ;;  %2999 = vst [vmem:[#allocation2 + $0x180] sm:$0xff] %v2935_v58  ;;  %3000 = vst [vmem:[#allocation2 + $0x188] sm:$0xff] %v2936_v3  ;;  %v3509_v42 = vmul.f32 %v3992_v47, %v8165_v6  ;;  %v3510_v11 = vmul.f32 %v3992_v47, %v8166_v21  ;;  %4005 = vrcp.f32 %v3424_v5  ;;  %v3994_v12 = vpop.eup %3993  ;;  %v8175_v58 = vld [vmem:[#allocation30_spill] sm:$0xff]  ;;  %v8176_v3 = vld [vmem:[#allocation32_spill] sm:$0xff] }
 0x3ee   :  { %v3425_v51 = vadd.f32 1e-07, %v3363_v26  ;;  %v2791_v14 = vsel %vm2790_vm12, %v7391_v4, %v2789_v1  ;;  %4007 = vrsqrt.f32 %v7449_v13  ;;  %v2796_v37 = vmul.f32 %v3994_v12, %v7436_v36  ;;  %v7506_v4 = vpop.xlane.xlu1 %2597  ;;  %v8178_v12 = vld [vmem:[#allocation9_spill] sm:$0xff] }
 0x3ef   :  { %3574 = vst [vmem:[#allocation2 + $0x370] sm:$0xff] %v3509_v42  ;;  %3575 = vst [vmem:[#allocation2 + $0x378] sm:$0xff] %v3510_v11  ;;  %v2794_v33 = vsel %vm2792_vm13, %v2793_v32, %v2791_v14  ;;  %vm3366_vm0 = vcmp.eq.f32.partialorder %v7421_v25, inf  ;;  %v3369_v9 = vand.u32 2147483648, %v7421_v25  ;;  %vm3368_vm1 = vcmp.eq.f32.partialorder %v7421_v25, 0.0  ;;  %v8177_v11 = vld [vmem:[#allocation70_spill] sm:$0xff] }
 0x3f0   :  { %v3996_v7 = vpop.eup %3995  ;;  %4009 = vrcp.f32 %v3425_v51  ;;  %v2850_v34 = vadd.f32 1e-07, %v2794_v33  ;;  %v2798_v28 = vsel %vm2797_vm14, %v7436_v36, %v2796_v37  ;;  %vm3373_vm2 = vcmp.eq.f32.partialorder %v7467_v55, inf }
 0x3f1   :  { %v3998_v20 = vpop.eup %3997  ;;  %v3511_v16 = vmul.f32 %v3996_v7, %v8167_v0  ;;  %v3512_v62 = vmul.f32 %v3996_v7, %v8168_v53  ;;  %4011 = vrsqrt.f32 %v7493_v38  ;;  %v2801_v48 = vsel %vm2799_vm15, %v2800_v31, %v2798_v28 }
 0x3f2   :  { %v3365_v52 = vmul.f32 %v3998_v20, %v7421_v25  ;;  %4013 = vrcp.f32 %v2850_v34  ;;  %v2851_v59 = vadd.f32 1e-07, %v2801_v48  ;;  %vm3375_vm3 = vcmp.eq.f32.partialorder %v7467_v55, 0.0 }
 0x3f3   :  { %3576 = vst [vmem:[#allocation2 + $0x380] sm:$0xff] %v3511_v16  ;;  %3577 = vst [vmem:[#allocation2 + $0x388] sm:$0xff] %v3512_v62  ;;  %4015 = vrsqrt.f32 %v7481_v35  ;;  %v3376_v57 = vand.u32 2147483648, %v7467_v55  ;;  %vm2804_vm4 = vcmp.eq.f32.partialorder %v7449_v13, inf  ;;  %v2807_v47 = vand.u32 2147483648, %v7449_v13  ;;  %v8179_v16 = vld [vmem:[#allocation12_spill] sm:$0xff] }
 0x3f4   :  { %v4000_v30 = vpop.eup %3999  ;;  %v3367_v46 = vsel %vm3366_vm0, %v7421_v25, %v3365_v52  ;;  %4017 = vrcp.f32 %v2851_v59  ;;  %v7523_v25 = vpop.xlane.xlu1 %3173  ;;  %vm2806_vm5 = vcmp.eq.f32.partialorder %v7449_v13, 0.0  ;;  %vm2811_vm6 = vcmp.eq.f32.partialorder %v7493_v38, inf  ;;  %v8180_v62 = vld [vmem:[#allocation11_spill] sm:$0xff] }
 0x3f5   :  { %v4002_v36 = vpop.eup %4001  ;;  %v2937_v44 = vmul.f32 %v4000_v30, %v8169_v61  ;;  %v2938_v8 = vmul.f32 %v4000_v30, %v8170_v15  ;;  %v3370_v27 = vsel %vm3368_vm1, %v3369_v9, %v3367_v46  ;;  %4019 = vrsqrt.f32 %v7516_v41  ;;  %v8181_v46 = vld [vmem:[#allocation33_spill] sm:$0xff] }
 0x3f6   :  { %v2939_v23 = vmul.f32 %v4002_v36, %v8171_v60  ;;  %v2940_v17 = vmul.f32 %v4002_v36, %v8172_v63  ;;  %v3426_v19 = vadd.f32 1e-07, %v3370_v27  ;;  %v4004_v56 = vpop.eup %4003  ;;  %vm2813_vm7 = vcmp.eq.f32.partialorder %v7493_v38, 0.0  ;;  %v8182_v61 = vld [vmem:[#allocation93_spill] sm:$0xff] }
 0x3f7   :  { %3001 = vst [vmem:[#allocation2 + $0x190] sm:$0xff] %v2937_v44  ;;  %3002 = vst [vmem:[#allocation2 + $0x198] sm:$0xff] %v2938_v8  ;;  %v4006_v39 = vpop.eup %4005  ;;  %v3372_v45 = vmul.f32 %v4004_v56, %v7467_v55  ;;  %vm3380_vm8 = vcmp.eq.f32.partialorder %v7481_v35, inf  ;;  %vm3382_vm9 = vcmp.eq.f32.partialorder %v7481_v35, 0.0  ;;  %v3383_v20 = vand.u32 2147483648, %v7481_v35 }
 0x3f8   :  { %3003 = vst [vmem:[#allocation2 + $0x1a0] sm:$0xff] %v2939_v23  ;;  %3004 = vst [vmem:[#allocation2 + $0x1a8] sm:$0xff] %v2940_v17  ;;  %4021 = vrcp.f32 %v3426_v19  ;;  %v4008_v29 = vpop.eup %4007  ;;  %v3513_v22 = vmul.f32 %v4006_v39, %v8173_v2  ;;  %v3514_v10 = vmul.f32 %v4006_v39, %v8174_v54  ;;  %vm3387_vm10 = vcmp.eq.f32.partialorder %v7516_v41, inf }
 0x3f9   :  { %4023 = vrsqrt.f32 %v7506_v4  ;;  %v3374_v40 = vsel %vm3373_vm2, %v7467_v55, %v3372_v45  ;;  %v2803_v18 = vmul.f32 %v4008_v29, %v7449_v13  ;;  %v2814_v55 = vand.u32 2147483648, %v7493_v38 }
 0x3fa   :  { %v4010_v24 = vpop.eup %4009  ;;  %4025 = vrsqrt.f32 %v7523_v25  ;;  %3578 = vst [vmem:[#allocation2 + $0x390] sm:$0xff] %v3513_v22  ;;  %3579 = vst [vmem:[#allocation2 + $0x398] sm:$0xff] %v3514_v10  ;;  %v3377_v43 = vsel %vm3375_vm3, %v3376_v57, %v3374_v40  ;;  %vm3389_vm11 = vcmp.eq.f32.partialorder %v7516_v41, 0.0  ;;  %v3390_v30 = vand.u32 2147483648, %v7516_v41  ;;  %v8183_v22 = vld [vmem:[#allocation41_spill] sm:$0xff]  ;;  %v8184_v10 = vld [vmem:[#allocation14_spill] sm:$0xff] }
 0x3fb   :  { %v4012_v50 = vpop.eup %4011  ;;  %v3515_v49 = vmul.f32 %v4010_v24, %v8175_v58  ;;  %v3516_v5 = vmul.f32 %v4010_v24, %v8176_v3  ;;  %v3427_v26 = vadd.f32 1e-07, %v3377_v43  ;;  %v2805_v1 = vsel %vm2804_vm4, %v7449_v13, %v2803_v18 }
 0x3fc   :  { %v2810_v32 = vmul.f32 %v4012_v50, %v7493_v38  ;;  %v4014_v6 = vpop.eup %4013  ;;  %v2808_v42 = vsel %vm2806_vm5, %v2807_v47, %v2805_v1  ;;  %vm2818_vm12 = vcmp.eq.f32.partialorder %v7506_v4, inf  ;;  %vm2820_vm13 = vcmp.eq.f32.partialorder %v7506_v4, 0.0  ;;  %v8186_v50 = vld [vmem:[#allocation16_spill] sm:$0xff] }
 0x3fd   :  { %3580 = vst [vmem:[#allocation2 + $0x3a0] sm:$0xff] %v3515_v49  ;;  %3581 = vst [vmem:[#allocation2 + $0x3a8] sm:$0xff] %v3516_v5  ;;  %v4016_v21 = vpop.eup %4015  ;;  %v2941_v51 = vmul.f32 %v4014_v6, %v8177_v11  ;;  %v2942_v14 = vmul.f32 %v4014_v6, %v8178_v12  ;;  %4027 = vrcp.f32 %v3427_v26  ;;  %v2852_v7 = vadd.f32 1e-07, %v2808_v42  ;;  %v8188_v5 = vld [vmem:[#allocation18_spill] sm:$0xff]  ;;  %v8189_v26 = vld [vmem:[#allocation13_spill] sm:$0xff] }
 0x3fe   :  { %v2812_v13 = vsel %vm2811_vm6, %v7493_v38, %v2810_v32  ;;  %v3379_v33 = vmul.f32 %v4016_v21, %v7481_v35  ;;  %v4018_v37 = vpop.eup %4017  ;;  %v2821_v23 = vand.u32 2147483648, %v7506_v4  ;;  %vm3394_vm14 = vcmp.eq.f32.partialorder %v7523_v25, inf  ;;  %v8190_v32 = vld [vmem:[#allocation78_spill] sm:$0xff]  ;;  %v8192_v11 = vld [vmem:[#allocation40_spill] sm:$0xff] }
 0x3ff   :  { %3005 = vst [vmem:[#allocation2 + $0x1b0] sm:$0xff] %v2941_v51  ;;  %3006 = vst [vmem:[#allocation2 + $0x1b8] sm:$0xff] %v2942_v14  ;;  %4029 = vrcp.f32 %v2852_v7  ;;  %v2815_v31 = vsel %vm2813_vm7, %v2814_v55, %v2812_v13  ;;  %v4020_v0 = vpop.eup %4019  ;;  %v2943_v53 = vmul.f32 %v4018_v37, %v8179_v16  ;;  %v2944_v38 = vmul.f32 %v4018_v37, %v8180_v62  ;;  %v8191_v55 = vld [vmem:[#allocation17_spill] sm:$0xff]  ;;  %v8193_v7 = vld [vmem:[#allocation19_spill] sm:$0xff] }
 0x400   :  { %v2853_v34 = vadd.f32 1e-07, %v2815_v31  ;;  %v3381_v28 = vsel %vm3380_vm8, %v7481_v35, %v3379_v33  ;;  %v3386_v9 = vmul.f32 %v4020_v0, %v7516_v41  ;;  %v3397_v56 = vand.u32 2147483648, %v7523_v25  ;;  %v8194_v33 = vld [vmem:[#allocation21_spill] sm:$0xff]  ;;  %v8195_v31 = vld [vmem:[#allocation20_spill] sm:$0xff]  ;;  %v8196_v0 = vld [vmem:[#allocation22_spill] sm:$0xff] }
 0x401   :  { %v3384_v48 = vsel %vm3382_vm9, %v3383_v20, %v3381_v28  ;;  %3007 = vst [vmem:[#allocation2 + $0x1c0] sm:$0xff] %v2943_v53  ;;  %3008 = vst [vmem:[#allocation2 + $0x1c8] sm:$0xff] %v2944_v38  ;;  %vm3396_vm15 = vcmp.eq.f32.partialorder %v7523_v25, 0.0 }
 0x402   :  { %v4022_v52 = vpop.eup %4021  ;;  %4031 = vrcp.f32 %v2853_v34  ;;  %v3428_v15 = vadd.f32 1e-07, %v3384_v48  ;;  %v3388_v35 = vsel %vm3387_vm10, %v7516_v41, %v3386_v9 }
 0x403   :  { %v4024_v59 = vpop.eup %4023  ;;  %v3517_v36 = vmul.f32 %v4022_v52, %v8181_v46  ;;  %v3518_v44 = vmul.f32 %v4022_v52, %v8182_v61  ;;  %v3391_v60 = vsel %vm3389_vm11, %v3390_v30, %v3388_v35 }
 0x404   :  { %v4026_v8 = vpop.eup %4025  ;;  %v2817_v27 = vmul.f32 %v4024_v59, %v7506_v4  ;;  %4033 = vrcp.f32 %v3428_v15  ;;  %v3429_v17 = vadd.f32 1e-07, %v3391_v60 }
 0x405   :  { %3582 = vst [vmem:[#allocation2 + $0x3b0] sm:$0xff] %v3517_v36  ;;  %3583 = vst [vmem:[#allocation2 + $0x3b8] sm:$0xff] %v3518_v44  ;;  %v3393_v63 = vmul.f32 %v4026_v8, %v7523_v25 }
 0x406   :  { %v2819_v19 = vsel %vm2818_vm12, %v7506_v4, %v2817_v27  ;;  %4035 = vrcp.f32 %v3429_v17  ;;  %v8185_v4 = vld [vmem:[#allocation44_spill] sm:$0xff] }
 0x407   :  { %v2822_v39 = vsel %vm2820_vm13, %v2821_v23, %v2819_v19  ;;  %v3395_v45 = vsel %vm3394_vm14, %v7523_v25, %v3393_v63  ;;  %v4028_v29 = vpop.eup %4027  ;;  %v8187_v25 = vld [vmem:[#allocation15_spill] sm:$0xff] }
 0x408   :  { %v2854_v41 = vadd.f32 1e-07, %v2822_v39  ;;  %v3398_v2 = vsel %vm3396_vm15, %v3397_v56, %v3395_v45  ;;  %v3519_v54 = vmul.f32 %v4028_v29, %v8183_v22  ;;  %v3520_v57 = vmul.f32 %v4028_v29, %v8184_v10 }
 0x409   :  { %v3430_v24 = vadd.f32 1e-07, %v3398_v2  ;;  %v4030_v40 = vpop.eup %4029 }
 0x40a   :  { %4037 = vrcp.f32 %v2854_v41  ;;  %3584 = vst [vmem:[#allocation2 + $0x3c0] sm:$0xff] %v3519_v54  ;;  %3585 = vst [vmem:[#allocation2 + $0x3c8] sm:$0xff] %v3520_v57  ;;  %v2945_v18 = vmul.f32 %v4030_v40, %v8185_v4  ;;  %v2946_v58 = vmul.f32 %v4030_v40, %v8186_v50 }
 0x40b   :  { %4039 = vrcp.f32 %v3430_v24 }
 0x40c   :  { %v4032_v49 = vpop.eup %4031  ;;  %3009 = vst [vmem:[#allocation2 + $0x1d0] sm:$0xff] %v2945_v18  ;;  %3010 = vst [vmem:[#allocation2 + $0x1d8] sm:$0xff] %v2946_v58 }
 0x40d   :  { %v2947_v3 = vmul.f32 %v4032_v49, %v8187_v25  ;;  %v2948_v43 = vmul.f32 %v4032_v49, %v8188_v5 }
 0x40e   :  { %v4034_v47 = vpop.eup %4033 }
 0x40f   :  { %3011 = vst [vmem:[#allocation2 + $0x1e0] sm:$0xff] %v2947_v3  ;;  %3012 = vst [vmem:[#allocation2 + $0x1e8] sm:$0xff] %v2948_v43  ;;  %v3521_v1 = vmul.f32 %v4034_v47, %v8189_v26  ;;  %v3522_v6 = vmul.f32 %v4034_v47, %v8190_v32 }
 0x410   :  { %v4036_v42 = vpop.eup %4035 }
 0x411   :  { %3586 = vst [vmem:[#allocation2 + $0x3d0] sm:$0xff] %v3521_v1  ;;  %3587 = vst [vmem:[#allocation2 + $0x3d8] sm:$0xff] %v3522_v6  ;;  %v3523_v21 = vmul.f32 %v4036_v42, %v8191_v55  ;;  %v3524_v51 = vmul.f32 %v4036_v42, %v8192_v11 }
 0x413   :  { %3588 = vst [vmem:[#allocation2 + $0x3e0] sm:$0xff] %v3523_v21  ;;  %3589 = vst [vmem:[#allocation2 + $0x3e8] sm:$0xff] %v3524_v51 }
 0x414   :  { %v4038_v12 = vpop.eup %4037 }
 0x415   :  { %v4040_v14 = vpop.eup %4039  ;;  %v2949_v13 = vmul.f32 %v4038_v12, %v8193_v7  ;;  %v2950_v37 = vmul.f32 %v4038_v12, %v8194_v33 }
 0x416   :  { %v3525_v20 = vmul.f32 %v4040_v14, %v8195_v31  ;;  %v3526_v16 = vmul.f32 %v4040_v14, %v8196_v0 }
 0x417   :  { %3013 = vst [vmem:[#allocation2 + $0x1f0] sm:$0xff] %v2949_v13  ;;  %3014 = vst [vmem:[#allocation2 + $0x1f8] sm:$0xff] %v2950_v37 }
 0x418   :  { %3590 = vst [vmem:[#allocation2 + $0x3f0] sm:$0xff] %v3525_v20  ;;  %3591 = vst [vmem:[#allocation2 + $0x3f8] sm:$0xff] %v3526_v16 }
 0x419   :  { %4058 = shalt.err (!%p4055_p4)
}
 0x41a   :  { %s4059_s7 = scalar_lea.hbm %s7609_s5, 16384 }
 0x41b   :  { %p4060_p5 = scmp.ne.s32.totalorder %s7609_s5, %s4059_s7  ;;  %p4063_p6 = scmp.lt.u32.totalorder %s4059_s7, %s7609_s5 }
 0x41d   :  { %p4065_p7 = pnand %p4063_p6, %p4060_p5 }
 0x41f   :  { %4068 = shalt.err (!%p4065_p7)
}
 0x420   :  { %s4075_s1 = smov 256   ;;  %s4076_s12 = smov 16  }
 0x421   :  { %3603 = dma.vmem_to_hbm [thread:$0]  %s3598_s28, 16384, %s7609_s5, [#allocation3], %s4075_s1, %s4075_s1, %s4076_s12  }
 0x422   :  { %4069 = dma.done.wait [#allocation3], 16384  }
 0x423   :  { %4070 = vsyncadd [#allocation3], 4294950912 }
 0x424   :  { %3607 = vsyncpa [#allocation3], 1 }

</bundles_post_ra>
